<compile_context>
chip_gen: v6e
topology: v6e:2x2x1
jax: 0.10.0
libtpu: 0.0.40
codegen_flags: <defaults>
</compile_context>

<pallas_src>
import functools

import jax
import jax.numpy as jnp
from jax.experimental import pallas as pl
from jax.experimental.pallas import tpu as pltpu


# --------------------------- in-kernel helpers ------------------------------


def _gn_relu(h, gamma, beta, A, At, *, eps):
    """GroupNorm (biased var, per-sample) + ReLU on h: (P, C) f32."""
    P, C = h.shape
    G = A.shape[1]
    cpg = C // G
    csum = jnp.sum(h, axis=0, keepdims=True)                  # (1, C)
    csq = jnp.sum(h * h, axis=0, keepdims=True)               # (1, C)
    inv_n = 1.0 / float(P * cpg)
    gmean = jnp.dot(csum, A, preferred_element_type=jnp.float32) * inv_n   # (1, G)
    gmsq = jnp.dot(csq, A, preferred_element_type=jnp.float32) * inv_n     # (1, G)
    gvar = jnp.maximum(gmsq - gmean * gmean, 0.0)              # clamp cancellation
    ginv = jax.lax.rsqrt(gvar + eps)
    mean_c = jnp.dot(gmean, At, preferred_element_type=jnp.float32)        # (1, C)
    inv_c = jnp.dot(ginv, At, preferred_element_type=jnp.float32)          # (1, C)
    y = (h - mean_c) * inv_c * gamma + beta
    return jnp.maximum(y, 0.0)


# ------------------------------ Pallas kernels ------------------------------


def _conv3x3_gn_relu_kernel(xp_ref, w_ref, b_ref, gamma_ref, beta_ref,
                            A_ref, At_ref, out_ref, *, H, W, eps):
    """One sample: 3x3 'same' conv (as 9 shifted MXU matmuls) + GroupNorm + ReLU.

    xp_ref : (1, H+2, W+2, Cin)  bf16   zero-padded input sample
    w_ref  : (9, Cin, Cout)      bf16   tap-major conv weights
    b/gamma/beta : (1, Cout)     f32
    A_ref  : (Cout, G) f32 ;  At_ref : (G, Cout) f32   (hoisted group gathers)
    out_ref: (1, H, W, Cout)     bf16
    """
    Cin = w_ref.shape[1]
    Cout = w_ref.shape[2]
    P = H * W
    xp = xp_ref[0].astype(jnp.float32)                        # (H+2, W+2, Cin)
    acc = None
    for dy in range(3):
        for dx in range(3):
            xs = xp[dy:dy + H, dx:dx + W, :].reshape(P, Cin).astype(jnp.bfloat16)
            d = jnp.dot(xs, w_ref[dy * 3 + dx],
                        preferred_element_type=jnp.float32)   # (P, Cout) f32
            acc = d if acc is None else acc + d
    h = acc + b_ref[...]
    y = _gn_relu(h, gamma_ref[...], beta_ref[...], A_ref[...], At_ref[...], eps=eps)
    out_ref[0] = y.astype(out_ref.dtype).reshape(H, W, Cout)


def _cls_head_bce_kernel(xp_ref, apat_ref, w1x_ref, w1a_ref, b1_ref,
                         gamma1_ref, beta1_ref, A_ref, At_ref, w2_ref,
                         b2_ref, t_ref, out_ref, hp_ref, *, H, W, eps):
    """One sample, fully fused class head:
       conv3x3(C+1 -> C) -> GN -> ReLU -> conv3x3(C -> 1) -> BCE partial sum.

    xp_ref   : (1, H+2, W+2, C) bf16   zero-padded tower output
    apat_ref : (1, H*W, 9)      bf16   9-tap patches of the (1-channel) act map
    w1x_ref  : (9, C, C) bf16 ; w1a_ref : (9, C) bf16 (act-channel rows of w1)
    b1/gamma1/beta1 : (1, C) f32 ; A : (C, G) f32 ; At : (G, C) f32
    w2_ref   : (9, 1, C) bf16 ; b2_ref : (1,) f32 SMEM ; t_ref : (1,) f32 SMEM
    out_ref  : (1, 1) f32              per-sample sum of elementwise BCE
    hp_ref   : VMEM scratch (H+2, W+32, C) f32  (zero-padded intermediate; the
               interior starts at a sublane-tile-aligned column so all scratch
               stores are aligned)
    """
    C = w1x_ref.shape[1]
    P = H * W
    W0 = 16                                                   # aligned interior col

    # ---- conv1: act-channel contribution (tiny K=9 matmul) + 9 shifted matmuls
    acc = jnp.dot(apat_ref[0], w1a_ref[...],
                  preferred_element_type=jnp.float32)         # (P, C) f32
    xp = xp_ref[0].astype(jnp.float32)                        # (H+2, W+2, C)
    for dy in range(3):
        for dx in range(3):
            xs = xp[dy:dy + H, dx:dx + W, :].reshape(P, C).astype(jnp.bfloat16)
            acc = acc + jnp.dot(xs, w1x_ref[dy * 3 + dx],
                                preferred_element_type=jnp.float32)
    h = acc + b1_ref[...]
    y = _gn_relu(h, gamma1_ref[...], beta1_ref[...], A_ref[...], At_ref[...],
                 eps=eps)                                     # (P, C) f32

    # ---- zero-padded copy of y in VMEM for the final 3x3 conv (no HBM trip)
    hp_ref[...] = jnp.zeros_like(hp_ref)
    hp_ref[1:1 + H, W0:W0 + W, :] = y.reshape(H, W, C)
    hp = hp_ref[...]                                          # (H+2, W+32, C)

    # ---- conv2: C -> 1 logits as 9 tap mat-vec products, f32 accumulation
    z = None
    for dy in range(3):
        for dx in range(3):
            ys = hp[dy:dy + H, W0 - 1 + dx:W0 - 1 + dx + W, :] \
                .reshape(P, C).astype(jnp.bfloat16)
            d = jax.lax.dot_general(ys, w2_ref[dy * 3 + dx],
                                    (((1,), (1,)), ((), ())),
                                    preferred_element_type=jnp.float32)  # (P, 1)
            z = d if z is None else z + d
    z = z + b2_ref[0]

    # ---- numerically stable BCE-with-logits (mean taken outside the kernel).
    # (log(1+exp(-|z|)) vs log1p differs by < 2^-24 in f32 -- negligible here.)
    tgt = t_ref[0]
    bce = jnp.maximum(z, 0.0) - z * tgt + jnp.log(1.0 + jnp.exp(-jnp.abs(z)))
    out_ref[0, 0] = jnp.sum(bce)


# -------------------------------- wrappers ----------------------------------


def conv3x3_gn_relu(xp, w, b, gamma, beta, A, At, *, eps=1e-5):
    """xp: (N, H+2, W+2, Cin) bf16 padded input -> (N, H, W, Cout) bf16."""
    N, Hp2, Wp2, Cin = xp.shape
    H, W = Hp2 - 2, Wp2 - 2
    Cout = w.shape[2]
    G = A.shape[1]
    kernel = functools.partial(_conv3x3_gn_relu_kernel, H=H, W=W, eps=eps)
    return pl.pallas_call(
        kernel,
        out_shape=jax.ShapeDtypeStruct((N, H, W, Cout), jnp.bfloat16),
        grid=(N,),
        in_specs=[
            pl.BlockSpec((1, Hp2, Wp2, Cin), lambda n: (n, 0, 0, 0)),
            pl.BlockSpec((9, Cin, Cout), lambda n: (0, 0, 0)),
            pl.BlockSpec((1, Cout), lambda n: (0, 0)),
            pl.BlockSpec((1, Cout), lambda n: (0, 0)),
            pl.BlockSpec((1, Cout), lambda n: (0, 0)),
            pl.BlockSpec((Cout, G), lambda n: (0, 0)),
            pl.BlockSpec((G, Cout), lambda n: (0, 0)),
        ],
        out_specs=pl.BlockSpec((1, H, W, Cout), lambda n: (n, 0, 0, 0)),
        compiler_params=pltpu.CompilerParams(dimension_semantics=("parallel",)),
    )(xp, w, b, gamma, beta, A, At)


def cls_head_bce(xp, apat, w1x, w1a, b1, gamma1, beta1, A, At, w2, b2, t_arr,
                 *, eps=1e-5):
    """Fused class head -> per-sample BCE sums of shape (N, 1)."""
    N, Hp2, Wp2, C = xp.shape
    H, W = Hp2 - 2, Wp2 - 2
    G = A.shape[1]
    kernel = functools.partial(_cls_head_bce_kernel, H=H, W=W, eps=eps)
    return pl.pallas_call(
        kernel,
        out_shape=jax.ShapeDtypeStruct((N, 1), jnp.float32),
        grid=(N,),
        in_specs=[
            pl.BlockSpec((1, Hp2, Wp2, C), lambda n: (n, 0, 0, 0)),
            pl.BlockSpec((1, H * W, 9), lambda n: (n, 0, 0)),
            pl.BlockSpec((9, C, C), lambda n: (0, 0, 0)),
            pl.BlockSpec((9, C), lambda n: (0, 0)),
            pl.BlockSpec((1, C), lambda n: (0, 0)),
            pl.BlockSpec((1, C), lambda n: (0, 0)),
            pl.BlockSpec((1, C), lambda n: (0, 0)),
            pl.BlockSpec((C, G), lambda n: (0, 0)),
            pl.BlockSpec((G, C), lambda n: (0, 0)),
            pl.BlockSpec((9, 1, C), lambda n: (0, 0, 0)),
            pl.BlockSpec(memory_space=pltpu.MemorySpace.SMEM),
            pl.BlockSpec(memory_space=pltpu.MemorySpace.SMEM),
        ],
        out_specs=pl.BlockSpec((1, 1), lambda n: (n, 0)),
        scratch_shapes=[pltpu.VMEM((Hp2, W + 32, C), jnp.float32)],
        compiler_params=pltpu.CompilerParams(dimension_semantics=("parallel",)),
    )(xp, apat, w1x, w1a, b1, gamma1, beta1, A, At, w2, b2, t_arr)


# ----------------------------- parameter init -------------------------------


def init_params(key, in_channels, num_classes=2, num_convs=2):
    """Matches the module: conv weights ~ N(0, 0.01^2), conv biases = 0,
    GroupNorm weight = 1, bias = 0.  Conv weights stored tap-major, bf16."""
    C = in_channels
    params = {}
    keys = jax.random.split(key, num_convs + 3 * num_classes)
    k = 0
    for i in range(num_convs):
        params[f"tower_{i}_w"] = (0.01 * jax.random.normal(
            keys[k], (9, C, C), jnp.float32)).astype(jnp.bfloat16); k += 1
        params[f"tower_{i}_b"] = jnp.zeros((1, C), jnp.float32)
        params[f"tower_{i}_gamma"] = jnp.ones((1, C), jnp.float32)
        params[f"tower_{i}_beta"] = jnp.zeros((1, C), jnp.float32)
    for c in range(num_classes):
        params[f"cls{c}_w1x"] = (0.01 * jax.random.normal(
            keys[k], (9, C, C), jnp.float32)).astype(jnp.bfloat16); k += 1
        params[f"cls{c}_w1a"] = (0.01 * jax.random.normal(
            keys[k], (9, C), jnp.float32)).astype(jnp.bfloat16); k += 1
        params[f"cls{c}_b1"] = jnp.zeros((1, C), jnp.float32)
        params[f"cls{c}_gamma1"] = jnp.ones((1, C), jnp.float32)
        params[f"cls{c}_beta1"] = jnp.zeros((1, C), jnp.float32)
        params[f"cls{c}_w2"] = (0.01 * jax.random.normal(
            keys[k], (9, 1, C), jnp.float32)).astype(jnp.bfloat16); k += 1
        params[f"cls{c}_b2"] = jnp.zeros((1,), jnp.float32)
    return params


# --------------------------------- forward ----------------------------------


def fcos_discriminator_con_forward(feature_nchw, target, act_maps_nchw, params,
                                   *, num_classes=2, num_convs=2, groups=32,
                                   compute_all_classes=False):
    """Mirrors FCOSDiscriminator_con.forward (with_GA=False, fusion='concat').

    feature_nchw:  (N, C, H, W) f32;  act_maps_nchw: (N, num_classes, H, W) f32
    target: python float in {0, 1, 0.1, 0.9}

    The reference reassigns `loss` each class, so only the LAST class affects
    the returned scalar; with compute_all_classes=False (default) the earlier
    (dead) classes are skipped -- the forward value is identical.
    """
    assert target in (0, 1, 0.1, 0.9)
    # grad-reversal: identity in the forward pass.
    x = jnp.transpose(feature_nchw, (0, 2, 3, 1)).astype(jnp.bfloat16)  # NHWC
    act = jnp.transpose(act_maps_nchw, (0, 2, 3, 1))                    # NHWC f32
    N, H, W, C = x.shape

    # Hoisted GroupNorm group-gather matrices (channel -> group one-hot).
    A = (jnp.arange(C)[:, None] // (C // groups)
         == jnp.arange(groups)[None, :]).astype(jnp.float32)            # (C, G)
    At = A.T                                                            # (G, C)

    def pad1(v):
        return jnp.pad(v, ((0, 0), (1, 1), (1, 1), (0, 0)))

    # dis_tower: num_convs x [conv3x3 -> GN -> ReLU], all fused per layer.
    for i in range(num_convs):
        x = conv3x3_gn_relu(pad1(x), params[f"tower_{i}_w"], params[f"tower_{i}_b"],
                            params[f"tower_{i}_gamma"], params[f"tower_{i}_beta"],
                            A, At)

    xp = pad1(x)                                   # shared across class heads
    t_arr = jnp.array([float(target)], jnp.float32)
    classes = range(num_classes) if compute_all_classes else [num_classes - 1]
    loss = jnp.zeros((), jnp.float32)              # mirrors x.new_zeros([1])
    for c in classes:
        # 9-tap patches of the 1-channel act map (tiny; built in plain JAX).
        ap = jnp.pad(act[..., c], ((0, 0), (1, 1), (1, 1)))             # (N,H+2,W+2)
        apat = jnp.stack([ap[:, dy:dy + H, dx:dx + W]
                          for dy in range(3) for dx in range(3)],
                         axis=-1).reshape(N, H * W, 9).astype(jnp.bfloat16)
        bce_sums = cls_head_bce(xp, apat,
                                params[f"cls{c}_w1x"], params[f"cls{c}_w1a"],
                                params[f"cls{c}_b1"], params[f"cls{c}_gamma1"],
                                params[f"cls{c}_beta1"], A, At,
                                params[f"cls{c}_w2"], params[f"cls{c}_b2"],
                                t_arr)                                   # (N, 1)
        # BCEWithLogitsLoss(reduction='mean') over logits of shape (N,1,H,W).
        loss_c = jnp.sum(bce_sums) / float(N * H * W)
        loss = loss_c                              # reference reassigns loss
        loss = loss + loss / num_classes
    # with_GA=False -> no extra term.
    return loss


# ----------------------------------- main ------------------------------------


if __name__ == "__main__":
    key = jax.random.PRNGKey(0)
    kf, ka, kp = jax.random.split(key, 3)

    # Small shapes consistent with the module (in_channels must be divisible
    # by the 32 GroupNorm groups; 256 in the original, 128 here).
    N, C, H, W = 2, 128, 16, 16
    num_classes = 2

    feature = jax.random.normal(kf, (N, C, H, W), jnp.float32)
    act_maps = jax.nn.sigmoid(
        jax.random.normal(ka, (N, num_classes, H, W), jnp.float32))
    params = init_params(kp, C, num_classes=num_classes, num_convs=2)

    loss = fcos_discriminator_con_forward(feature, 1.0, act_maps, params,
                                          num_classes=num_classes, num_convs=2)
    loss = jax.block_until_ready(loss)
    print("KERNEL_OK")
</pallas_src>

<mosaic_0001>
module attributes {stable_mosaic.version = 11 : i64} {
  func.func @_conv3x3_gn_relu_kernel(%arg0: i32, %arg1: memref<1x18x18x128xbf16, #tpu.memory_space<vmem>>, %arg2: memref<9x128x128xbf16, #tpu.memory_space<vmem>>, %arg3: memref<1x128xf32, #tpu.memory_space<vmem>>, %arg4: memref<1x128xf32, #tpu.memory_space<vmem>>, %arg5: memref<1x128xf32, #tpu.memory_space<vmem>>, %arg6: memref<128x32xf32, #tpu.memory_space<vmem>>, %arg7: memref<32x128xf32, #tpu.memory_space<vmem>>, %arg8: memref<1x16x16x128xbf16, #tpu.memory_space<vmem>>) attributes {dimension_semantics = [#tpu.dimension_semantics<parallel>], iteration_bounds = array<i64: 2>, scalar_prefetch = 0 : i64, scratch_operands = 0 : i64, tpu.core_type = #tpu.core_type<tc>, window_params = [{transform_indices = @transform_0, window_bounds = array<i64: 1, 18, 18, 128>}, {pipeline_mode = #tpu.pipeline_mode<synchronous>, transform_indices = @transform_1, window_bounds = array<i64: 9, 128, 128>}, {pipeline_mode = #tpu.pipeline_mode<synchronous>, transform_indices = @transform_2, window_bounds = array<i64: 1, 128>}, {pipeline_mode = #tpu.pipeline_mode<synchronous>, transform_indices = @transform_3, window_bounds = array<i64: 1, 128>}, {pipeline_mode = #tpu.pipeline_mode<synchronous>, transform_indices = @transform_4, window_bounds = array<i64: 1, 128>}, {pipeline_mode = #tpu.pipeline_mode<synchronous>, transform_indices = @transform_5, window_bounds = array<i64: 128, 32>}, {pipeline_mode = #tpu.pipeline_mode<synchronous>, transform_indices = @transform_6, window_bounds = array<i64: 32, 128>}, {transform_indices = @transform_7, window_bounds = array<i64: 1, 16, 16, 128>}]} {
    %c0 = arith.constant 0 : index
    %c0_0 = arith.constant 0 : index
    %c0_1 = arith.constant 0 : index
    %c0_2 = arith.constant 0 : index
    %0 = vector.load %arg1[%c0, %c0_0, %c0_1, %c0_2] : memref<1x18x18x128xbf16, #tpu.memory_space<vmem>>, vector<1x18x18x128xbf16>
    %1 = vector.shape_cast %0 : vector<1x18x18x128xbf16> to vector<18x18x128xbf16>
    %2 = arith.extf %1 : vector<18x18x128xbf16> to vector<18x18x128xf32>
    %3 = vector.extract_strided_slice %2 {offsets = [0, 0, 0], sizes = [16, 16, 128], strides = [1, 1, 1]} : vector<18x18x128xf32> to vector<16x16x128xf32>
    %4 = vector.shape_cast %3 : vector<16x16x128xf32> to vector<256x128xf32>
    %5 = arith.truncf %4 : vector<256x128xf32> to vector<256x128xbf16>
    %c0_3 = arith.constant 0 : index
    %c0_4 = arith.constant 0 : index
    %c0_5 = arith.constant 0 : index
    %6 = vector.load %arg2[%c0_3, %c0_4, %c0_5] : memref<9x128x128xbf16, #tpu.memory_space<vmem>>, vector<1x128x128xbf16>
    %7 = vector.shape_cast %6 : vector<1x128x128xbf16> to vector<128x128xbf16>
    %cst = arith.constant dense<0.000000e+00> : vector<256x128xf32>
    %8 = tpu.matmul %5, %7, %cst {dimension_numbers = #tpu.dot_dimension_numbers<[1], [0], [0], [1], [0, 0, 1, 1], [], []>} : vector<256x128xbf16>, vector<128x128xbf16>, vector<256x128xf32> -> vector<256x128xf32>
    %9 = vector.extract_strided_slice %2 {offsets = [0, 1, 0], sizes = [16, 16, 128], strides = [1, 1, 1]} : vector<18x18x128xf32> to vector<16x16x128xf32>
    %10 = vector.shape_cast %9 : vector<16x16x128xf32> to vector<256x128xf32>
    %11 = arith.truncf %10 : vector<256x128xf32> to vector<256x128xbf16>
    %c1 = arith.constant 1 : index
    %c0_6 = arith.constant 0 : index
    %c0_7 = arith.constant 0 : index
    %12 = vector.load %arg2[%c1, %c0_6, %c0_7] : memref<9x128x128xbf16, #tpu.memory_space<vmem>>, vector<1x128x128xbf16>
    %13 = vector.shape_cast %12 : vector<1x128x128xbf16> to vector<128x128xbf16>
    %cst_8 = arith.constant dense<0.000000e+00> : vector<256x128xf32>
    %14 = tpu.matmul %11, %13, %cst_8 {dimension_numbers = #tpu.dot_dimension_numbers<[1], [0], [0], [1], [0, 0, 1, 1], [], []>} : vector<256x128xbf16>, vector<128x128xbf16>, vector<256x128xf32> -> vector<256x128xf32>
    %15 = arith.addf %8, %14 : vector<256x128xf32>
    %16 = vector.extract_strided_slice %2 {offsets = [0, 2, 0], sizes = [16, 16, 128], strides = [1, 1, 1]} : vector<18x18x128xf32> to vector<16x16x128xf32>
    %17 = vector.shape_cast %16 : vector<16x16x128xf32> to vector<256x128xf32>
    %18 = arith.truncf %17 : vector<256x128xf32> to vector<256x128xbf16>
    %c2 = arith.constant 2 : index
    %c0_9 = arith.constant 0 : index
    %c0_10 = arith.constant 0 : index
    %19 = vector.load %arg2[%c2, %c0_9, %c0_10] : memref<9x128x128xbf16, #tpu.memory_space<vmem>>, vector<1x128x128xbf16>
    %20 = vector.shape_cast %19 : vector<1x128x128xbf16> to vector<128x128xbf16>
    %cst_11 = arith.constant dense<0.000000e+00> : vector<256x128xf32>
    %21 = tpu.matmul %18, %20, %cst_11 {dimension_numbers = #tpu.dot_dimension_numbers<[1], [0], [0], [1], [0, 0, 1, 1], [], []>} : vector<256x128xbf16>, vector<128x128xbf16>, vector<256x128xf32> -> vector<256x128xf32>
    %22 = arith.addf %15, %21 : vector<256x128xf32>
    %23 = vector.extract_strided_slice %2 {offsets = [1, 0, 0], sizes = [16, 16, 128], strides = [1, 1, 1]} : vector<18x18x128xf32> to vector<16x16x128xf32>
    %24 = vector.shape_cast %23 : vector<16x16x128xf32> to vector<256x128xf32>
    %25 = arith.truncf %24 : vector<256x128xf32> to vector<256x128xbf16>
    %c3 = arith.constant 3 : index
    %c0_12 = arith.constant 0 : index
    %c0_13 = arith.constant 0 : index
    %26 = vector.load %arg2[%c3, %c0_12, %c0_13] : memref<9x128x128xbf16, #tpu.memory_space<vmem>>, vector<1x128x128xbf16>
    %27 = vector.shape_cast %26 : vector<1x128x128xbf16> to vector<128x128xbf16>
    %cst_14 = arith.constant dense<0.000000e+00> : vector<256x128xf32>
    %28 = tpu.matmul %25, %27, %cst_14 {dimension_numbers = #tpu.dot_dimension_numbers<[1], [0], [0], [1], [0, 0, 1, 1], [], []>} : vector<256x128xbf16>, vector<128x128xbf16>, vector<256x128xf32> -> vector<256x128xf32>
    %29 = arith.addf %22, %28 : vector<256x128xf32>
    %30 = vector.extract_strided_slice %2 {offsets = [1, 1, 0], sizes = [16, 16, 128], strides = [1, 1, 1]} : vector<18x18x128xf32> to vector<16x16x128xf32>
    %31 = vector.shape_cast %30 : vector<16x16x128xf32> to vector<256x128xf32>
    %32 = arith.truncf %31 : vector<256x128xf32> to vector<256x128xbf16>
    %c4 = arith.constant 4 : index
    %c0_15 = arith.constant 0 : index
    %c0_16 = arith.constant 0 : index
    %33 = vector.load %arg2[%c4, %c0_15, %c0_16] : memref<9x128x128xbf16, #tpu.memory_space<vmem>>, vector<1x128x128xbf16>
    %34 = vector.shape_cast %33 : vector<1x128x128xbf16> to vector<128x128xbf16>
    %cst_17 = arith.constant dense<0.000000e+00> : vector<256x128xf32>
    %35 = tpu.matmul %32, %34, %cst_17 {dimension_numbers = #tpu.dot_dimension_numbers<[1], [0], [0], [1], [0, 0, 1, 1], [], []>} : vector<256x128xbf16>, vector<128x128xbf16>, vector<256x128xf32> -> vector<256x128xf32>
    %36 = arith.addf %29, %35 : vector<256x128xf32>
    %37 = vector.extract_strided_slice %2 {offsets = [1, 2, 0], sizes = [16, 16, 128], strides = [1, 1, 1]} : vector<18x18x128xf32> to vector<16x16x128xf32>
    %38 = vector.shape_cast %37 : vector<16x16x128xf32> to vector<256x128xf32>
    %39 = arith.truncf %38 : vector<256x128xf32> to vector<256x128xbf16>
    %c5 = arith.constant 5 : index
    %c0_18 = arith.constant 0 : index
    %c0_19 = arith.constant 0 : index
    %40 = vector.load %arg2[%c5, %c0_18, %c0_19] : memref<9x128x128xbf16, #tpu.memory_space<vmem>>, vector<1x128x128xbf16>
    %41 = vector.shape_cast %40 : vector<1x128x128xbf16> to vector<128x128xbf16>
    %cst_20 = arith.constant dense<0.000000e+00> : vector<256x128xf32>
    %42 = tpu.matmul %39, %41, %cst_20 {dimension_numbers = #tpu.dot_dimension_numbers<[1], [0], [0], [1], [0, 0, 1, 1], [], []>} : vector<256x128xbf16>, vector<128x128xbf16>, vector<256x128xf32> -> vector<256x128xf32>
    %43 = arith.addf %36, %42 : vector<256x128xf32>
    %44 = vector.extract_strided_slice %2 {offsets = [2, 0, 0], sizes = [16, 16, 128], strides = [1, 1, 1]} : vector<18x18x128xf32> to vector<16x16x128xf32>
    %45 = vector.shape_cast %44 : vector<16x16x128xf32> to vector<256x128xf32>
    %46 = arith.truncf %45 : vector<256x128xf32> to vector<256x128xbf16>
    %c6 = arith.constant 6 : index
    %c0_21 = arith.constant 0 : index
    %c0_22 = arith.constant 0 : index
    %47 = vector.load %arg2[%c6, %c0_21, %c0_22] : memref<9x128x128xbf16, #tpu.memory_space<vmem>>, vector<1x128x128xbf16>
    %48 = vector.shape_cast %47 : vector<1x128x128xbf16> to vector<128x128xbf16>
    %cst_23 = arith.constant dense<0.000000e+00> : vector<256x128xf32>
    %49 = tpu.matmul %46, %48, %cst_23 {dimension_numbers = #tpu.dot_dimension_numbers<[1], [0], [0], [1], [0, 0, 1, 1], [], []>} : vector<256x128xbf16>, vector<128x128xbf16>, vector<256x128xf32> -> vector<256x128xf32>
    %50 = arith.addf %43, %49 : vector<256x128xf32>
    %51 = vector.extract_strided_slice %2 {offsets = [2, 1, 0], sizes = [16, 16, 128], strides = [1, 1, 1]} : vector<18x18x128xf32> to vector<16x16x128xf32>
    %52 = vector.shape_cast %51 : vector<16x16x128xf32> to vector<256x128xf32>
    %53 = arith.truncf %52 : vector<256x128xf32> to vector<256x128xbf16>
    %c7 = arith.constant 7 : index
    %c0_24 = arith.constant 0 : index
    %c0_25 = arith.constant 0 : index
    %54 = vector.load %arg2[%c7, %c0_24, %c0_25] : memref<9x128x128xbf16, #tpu.memory_space<vmem>>, vector<1x128x128xbf16>
    %55 = vector.shape_cast %54 : vector<1x128x128xbf16> to vector<128x128xbf16>
    %cst_26 = arith.constant dense<0.000000e+00> : vector<256x128xf32>
    %56 = tpu.matmul %53, %55, %cst_26 {dimension_numbers = #tpu.dot_dimension_numbers<[1], [0], [0], [1], [0, 0, 1, 1], [], []>} : vector<256x128xbf16>, vector<128x128xbf16>, vector<256x128xf32> -> vector<256x128xf32>
    %57 = arith.addf %50, %56 : vector<256x128xf32>
    %58 = vector.extract_strided_slice %2 {offsets = [2, 2, 0], sizes = [16, 16, 128], strides = [1, 1, 1]} : vector<18x18x128xf32> to vector<16x16x128xf32>
    %59 = vector.shape_cast %58 : vector<16x16x128xf32> to vector<256x128xf32>
    %60 = arith.truncf %59 : vector<256x128xf32> to vector<256x128xbf16>
    %c8 = arith.constant 8 : index
    %c0_27 = arith.constant 0 : index
    %c0_28 = arith.constant 0 : index
    %61 = vector.load %arg2[%c8, %c0_27, %c0_28] : memref<9x128x128xbf16, #tpu.memory_space<vmem>>, vector<1x128x128xbf16>
    %62 = vector.shape_cast %61 : vector<1x128x128xbf16> to vector<128x128xbf16>
    %cst_29 = arith.constant dense<0.000000e+00> : vector<256x128xf32>
    %63 = tpu.matmul %60, %62, %cst_29 {dimension_numbers = #tpu.dot_dimension_numbers<[1], [0], [0], [1], [0, 0, 1, 1], [], []>} : vector<256x128xbf16>, vector<128x128xbf16>, vector<256x128xf32> -> vector<256x128xf32>
    %64 = arith.addf %57, %63 : vector<256x128xf32>
    %c0_30 = arith.constant 0 : index
    %c0_31 = arith.constant 0 : index
    %65 = vector.load %arg3[%c0_30, %c0_31] : memref<1x128xf32, #tpu.memory_space<vmem>>, vector<1x128xf32>
    %66 = vector.broadcast %65 : vector<1x128xf32> to vector<256x128xf32>
    %67 = arith.addf %64, %66 : vector<256x128xf32>
    %c0_32 = arith.constant 0 : index
    %c0_33 = arith.constant 0 : index
    %68 = vector.load %arg4[%c0_32, %c0_33] : memref<1x128xf32, #tpu.memory_space<vmem>>, vector<1x128xf32>
    %c0_34 = arith.constant 0 : index
    %c0_35 = arith.constant 0 : index
    %69 = vector.load %arg5[%c0_34, %c0_35] : memref<1x128xf32, #tpu.memory_space<vmem>>, vector<1x128xf32>
    %c0_36 = arith.constant 0 : index
    %c0_37 = arith.constant 0 : index
    %70 = vector.load %arg6[%c0_36, %c0_37] : memref<128x32xf32, #tpu.memory_space<vmem>>, vector<128x32xf32>
    %c0_38 = arith.constant 0 : index
    %c0_39 = arith.constant 0 : index
    %71 = vector.load %arg7[%c0_38, %c0_39] : memref<32x128xf32, #tpu.memory_space<vmem>>, vector<32x128xf32>
    %cst_40 = arith.constant dense<0.000000e+00> : vector<128xf32>
    %72 = vector.multi_reduction <add>, %67, %cst_40 [0] : vector<256x128xf32> to vector<128xf32>
    %73 = vector.shape_cast %72 : vector<128xf32> to vector<1x128xf32>
    %74 = arith.mulf %67, %67 : vector<256x128xf32>
    %cst_41 = arith.constant dense<0.000000e+00> : vector<128xf32>
    %75 = vector.multi_reduction <add>, %74, %cst_41 [0] : vector<256x128xf32> to vector<128xf32>
    %76 = vector.shape_cast %75 : vector<128xf32> to vector<1x128xf32>
    %cst_42 = arith.constant dense<0.000000e+00> : vector<1x32xf32>
    %77 = tpu.matmul %73, %70, %cst_42 {dimension_numbers = #tpu.dot_dimension_numbers<[1], [0], [0], [1], [0, 0, 1, 1], [], []>} : vector<1x128xf32>, vector<128x32xf32>, vector<1x32xf32> -> vector<1x32xf32>
    %cst_43 = arith.constant 9.765625E-4 : f32
    %78 = vector.broadcast %cst_43 : f32 to vector<1x32xf32>
    %79 = arith.mulf %77, %78 : vector<1x32xf32>
    %cst_44 = arith.constant dense<0.000000e+00> : vector<1x32xf32>
    %80 = tpu.matmul %76, %70, %cst_44 {dimension_numbers = #tpu.dot_dimension_numbers<[1], [0], [0], [1], [0, 0, 1, 1], [], []>} : vector<1x128xf32>, vector<128x32xf32>, vector<1x32xf32> -> vector<1x32xf32>
    %cst_45 = arith.constant 9.765625E-4 : f32
    %81 = vector.broadcast %cst_45 : f32 to vector<1x32xf32>
    %82 = arith.mulf %80, %81 : vector<1x32xf32>
    %83 = arith.mulf %79, %79 : vector<1x32xf32>
    %84 = arith.subf %82, %83 : vector<1x32xf32>
    %cst_46 = arith.constant 0.000000e+00 : f32
    %85 = vector.broadcast %cst_46 : f32 to vector<1x32xf32>
    %86 = arith.maximumf %84, %85 : vector<1x32xf32>
    %cst_47 = arith.constant 9.99999974E-6 : f32
    %87 = vector.broadcast %cst_47 : f32 to vector<1x32xf32>
    %88 = arith.addf %86, %87 : vector<1x32xf32>
    %89 = math.rsqrt %88 : vector<1x32xf32>
    %cst_48 = arith.constant dense<0.000000e+00> : vector<1x128xf32>
    %90 = tpu.matmul %79, %71, %cst_48 {dimension_numbers = #tpu.dot_dimension_numbers<[1], [0], [0], [1], [0, 0, 1, 1], [], []>} : vector<1x32xf32>, vector<32x128xf32>, vector<1x128xf32> -> vector<1x128xf32>
    %cst_49 = arith.constant dense<0.000000e+00> : vector<1x128xf32>
    %91 = tpu.matmul %89, %71, %cst_49 {dimension_numbers = #tpu.dot_dimension_numbers<[1], [0], [0], [1], [0, 0, 1, 1], [], []>} : vector<1x32xf32>, vector<32x128xf32>, vector<1x128xf32> -> vector<1x128xf32>
    %92 = vector.broadcast %90 : vector<1x128xf32> to vector<256x128xf32>
    %93 = arith.subf %67, %92 : vector<256x128xf32>
    %94 = vector.broadcast %91 : vector<1x128xf32> to vector<256x128xf32>
    %95 = arith.mulf %93, %94 : vector<256x128xf32>
    %96 = vector.broadcast %68 : vector<1x128xf32> to vector<256x128xf32>
    %97 = arith.mulf %95, %96 : vector<256x128xf32>
    %98 = vector.broadcast %69 : vector<1x128xf32> to vector<256x128xf32>
    %99 = arith.addf %97, %98 : vector<256x128xf32>
    %cst_50 = arith.constant 0.000000e+00 : f32
    %100 = vector.broadcast %cst_50 : f32 to vector<256x128xf32>
    %101 = arith.maximumf %99, %100 : vector<256x128xf32>
    %102 = arith.truncf %101 : vector<256x128xf32> to vector<256x128xbf16>
    %103 = vector.shape_cast %102 : vector<256x128xbf16> to vector<16x16x128xbf16>
    %c0_51 = arith.constant 0 : index
    %c0_52 = arith.constant 0 : index
    %c0_53 = arith.constant 0 : index
    %c0_54 = arith.constant 0 : index
    %104 = vector.load %arg8[%c0_51, %c0_52, %c0_53, %c0_54] : memref<1x16x16x128xbf16, #tpu.memory_space<vmem>>, vector<1x16x16x128xbf16>
    %105 = vector.shape_cast %104 : vector<1x16x16x128xbf16> to vector<16x16x128xbf16>
    %106 = vector.shape_cast %103 : vector<16x16x128xbf16> to vector<1x16x16x128xbf16>
    tpu.vector_store %arg8[%c0_51, %c0_52, %c0_53, %c0_54], %106 {strides = array<i32>} : memref<1x16x16x128xbf16, #tpu.memory_space<vmem>>, vector<1x16x16x128xbf16>,
    return
  }
  func.func @transform_0(%arg0: i32) -> (i32, i32, i32, i32) {
    %c0_i32 = arith.constant 0 : i32
    %c0_i32_0 = arith.constant 0 : i32
    %c0_i32_1 = arith.constant 0 : i32
    %c0_i32_2 = arith.constant 0 : i32
    return %arg0, %c0_i32, %c0_i32_0, %c0_i32_1 : i32, i32, i32, i32
  }
  func.func @transform_1(%arg0: i32) -> (i32, i32, i32) {
    %c0_i32 = arith.constant 0 : i32
    %c0_i32_0 = arith.constant 0 : i32
    %c0_i32_1 = arith.constant 0 : i32
    %c0_i32_2 = arith.constant 0 : i32
    return %c0_i32, %c0_i32_0, %c0_i32_1 : i32, i32, i32
  }
  func.func @transform_2(%arg0: i32) -> (i32, i32) {
    %c0_i32 = arith.constant 0 : i32
    %c0_i32_0 = arith.constant 0 : i32
    %c0_i32_1 = arith.constant 0 : i32
    return %c0_i32, %c0_i32_0 : i32, i32
  }
  func.func @transform_3(%arg0: i32) -> (i32, i32) {
    %c0_i32 = arith.constant 0 : i32
    %c0_i32_0 = arith.constant 0 : i32
    %c0_i32_1 = arith.constant 0 : i32
    return %c0_i32, %c0_i32_0 : i32, i32
  }
  func.func @transform_4(%arg0: i32) -> (i32, i32) {
    %c0_i32 = arith.constant 0 : i32
    %c0_i32_0 = arith.constant 0 : i32
    %c0_i32_1 = arith.constant 0 : i32
    return %c0_i32, %c0_i32_0 : i32, i32
  }
  func.func @transform_5(%arg0: i32) -> (i32, i32) {
    %c0_i32 = arith.constant 0 : i32
    %c0_i32_0 = arith.constant 0 : i32
    %c0_i32_1 = arith.constant 0 : i32
    return %c0_i32, %c0_i32_0 : i32, i32
  }
  func.func @transform_6(%arg0: i32) -> (i32, i32) {
    %c0_i32 = arith.constant 0 : i32
    %c0_i32_0 = arith.constant 0 : i32
    %c0_i32_1 = arith.constant 0 : i32
    return %c0_i32, %c0_i32_0 : i32, i32
  }
  func.func @transform_7(%arg0: i32) -> (i32, i32, i32, i32) {
    %c0_i32 = arith.constant 0 : i32
    %c0_i32_0 = arith.constant 0 : i32
    %c0_i32_1 = arith.constant 0 : i32
    %c0_i32_2 = arith.constant 0 : i32
    return %arg0, %c0_i32, %c0_i32_0, %c0_i32_1 : i32, i32, i32, i32
  }
}

</mosaic_0001>

<bundles_post_ra>
// kernel: tpu_custom_call.1
= control target key start
LH: loop header
LB: loop body
LE: loop exit
PB: predicated region body
PF: predicated region fallthrough
CT: control target
= control target key end

     0   :  { %12 = vsyncpa [#allocation3], 0  ;;  %s7399_s0 = inlined_call_operand.vmem [shape: bf16[2,18,18,128], index: 0, kind: input, shape index: {}]   ;;  %s7400_s1 = inlined_call_operand.vmem [shape: bf16[9,128,128], index: 1, kind: input, shape index: {}]   ;;  %s7401_s2 = inlined_call_operand.vmem [shape: f32[1,128], index: 2, kind: input, shape index: {}]   ;;  %s7402_s3 = inlined_call_operand.vmem [shape: f32[1,128], index: 3, kind: input, shape index: {}]   ;;  %s7403_s4 = inlined_call_operand.vmem [shape: f32[1,128], index: 4, kind: input, shape index: {}]   ;;  %s7404_s5 = inlined_call_operand.vmem [shape: f32[128,32], index: 5, kind: input, shape index: {}]   ;;  %s7405_s6 = inlined_call_operand.vmem [shape: f32[32,128], index: 6, kind: input, shape index: {}]   ;;  %s7406_s7 = inlined_call_operand.hbm [shape: bf16[2,16,16,128], index: 7, kind: output, shape index: {}]  }
   0x1   :  { %14 = vsyncpa [#allocation3 + $0x1], 0  ;;  %s5321_s24 = smov 0   ;;  %s5323_s25 = smov 0  }
   0x2   :  { %s5325_s26 = smov 0   ;;  %s5327_s27 = smov 0  }
   0x3 LB: > { %s5342_s28 = sadd.s32 4294967295, %s5274_s27   ;;  %s3882_s29 = sadd.s32 4294967294, %s5274_s27   ;;  %s5274_s27 = sphi %s5327_s27, %s7634_s27   ;;  %s5270_s26 = sphi %s5325_s26, %s7633_s26   ;;  %s5266_s25 = sphi %s5323_s25, %s7632_s25   ;;  %s5262_s24 = sphi %s5321_s24, %s7631_s24  }
   0x4   : > { %s5346_s30 = sadd.s32 1, %s5274_s27   ;;  %s179_s8 = sadd.s32 1, %s5270_s26 }
   0x5   : > { %s176_s9 = ssub.s32 %s5274_s27, %s5346_s30  ;;  %p189_p0 = scmp.ne.s32.totalorder %s5270_s26, %s5266_s25 }
   0x6   : > { %p177_p1 = scmp.eq.s32.totalorder %s176_s9, 0  ;;  %p190_p2 = scmp.eq.s32.totalorder %s5342_s28, 1 }
   0x7   : > { %p195_p3 = scmp.ne.s32.totalorder %s5266_s25, %s5262_s24  ;;  %p196_p4 = scmp.eq.s32.totalorder %s3882_s29, 1 }
   0x8   : > { %s5357_s10 = scalar_select %p177_p1, %s5270_s26, %s179_s8  }
   0x9   : > { %p5359_p5 = por %p190_p2, %p189_p0  ;;  %p5363_p6 = por %p196_p4, %p195_p3 }
   0xa   : > { %p3885_p7 = scmp.ge.s32.totalorder %s5274_s27, 1  ;;  %p240_p8 = scmp.lt.s32.totalorder %s5274_s27, 3 }
   0xc   : > { %p241_p9 = pnand %p3885_p7, %p240_p8 }
   0xe   : > { %244 = sbr.rel (%p241_p9) target bundleno = 1083 (0x43b), region = 48 }
  0x13   : > { %v5104_v0 = vld [vmem:[%s7400_s1 + $0x78] sm:$0xff]   ;;  %p272_p10 = scmp.lt.s32.totalorder %s5342_s28, 1  ;;  %v5106_v2 = vld [vmem:[%s7400_s1 + $0x70] sm:$0xff]   ;;  %v5108_v4 = vld [vmem:[%s7400_s1 + $0x68] sm:$0xff]   ;;  %vm466_vm0 = vcmask 1046528   ;;  %vm1030_vm1 = vcmask 1045504  }
  0x14   : > { %v5105_v1 = vld [vmem:[%s7400_s1 + $0x38] sm:$0xff]   ;;  %4536 = vmatprep.subr.bf16.mxu0 %v5104_v0  ;;  %v5107_v3 = vld [vmem:[%s7400_s1 + $0x30] sm:$0xff]   ;;  %v5109_v5 = vld [vmem:[%s7400_s1 + $0x28] sm:$0xff]   ;;  %vm5277_vm2 = vmmov 0   ;;  %vm3319_vm3 = vcmask 261120   ;;  %s269_s19 = sand.u32 1, %s5266_s25  }
  0x15   : > { %4584 = vmatprep.subr.bf16.mxu1 %v5105_v1  ;;  %4537 = vmatpush3.bf16.msra.mxu0 %v5104_v0  ;;  %s273_s8 = scalar_select %p272_p10, %s5342_s28, 1  ;;  %v5110_v6 = vld [vmem:[%s7400_s1 + $0x60] sm:$0xff]   ;;  %v5112_v8 = vld [vmem:[%s7400_s1 + $0x58] sm:$0xff]   ;;  %v5114_v10 = vld [vmem:[%s7400_s1 + $0x50] sm:$0xff]  }
  0x16   : > { %4585 = vmatpush3.bf16.msra.mxu1 %v5105_v1  ;;  %4538 = vmatprep.subr.bf16.mxu0 %v5106_v2  ;;  %v5111_v7 = vld [vmem:[%s7400_s1 + $0x20] sm:$0xff]   ;;  %v5113_v9 = vld [vmem:[%s7400_s1 + $0x18] sm:$0xff]   ;;  %v5115_v11 = vld [vmem:[%s7400_s1 + $0x10] sm:$0xff]   ;;  %s7301_s20 = sshll.u32 %s269_s19, 7  ;;  %s4180_s21 = sshll.u32 %s5342_s28, 11 }
  0x17   : > { %4586 = vmatprep.subr.bf16.mxu1 %v5107_v3  ;;  %s5060_s16 = smul.u32 216, %s273_s8  ;;  %v5116_v23 = vld [vmem:[%s7400_s1 + $0x48] sm:$0xff]   ;;  %v5118_v45 = vld [vmem:[%s7400_s1 + $0x40] sm:$0xff]   ;;  %s7331_s22 = scalar_lea.vmem [#allocation2], %s7301_s20 }
  0x18   : > { %v5117_v29 = vld [vmem:[%s7400_s1 + $0x8] sm:$0xff]   ;;  %v5119_v51 = vld [vmem:[%s7400_s1] sm:$0xff]   ;;  %s3820_s29 = sshll.u32 %s7331_s22, 4  ;;  %s7341_s8 = scalar_lea.hbm %s7406_s7, %s4180_s21  ;;  %s7343_s29 = int_to_ptr.vmem [resolvable:$true] %s3820_s29 }
  0x19   : > { %4539 = vmatpush3.bf16.msra.mxu0 %v5106_v2  ;;  %s5404_s23 = scalar_lea.vmem %s7399_s0, %s5060_s16  ;;  %v5122_v2 = vld [vmem:[%s7400_s1 + $0xb8] sm:$0xff]   ;;  %s7359_s13 = scalar_lea.sflag [#allocation3], %s269_s19 }
  0x1a   : > { %4587 = vmatpush3.bf16.msra.mxu1 %v5107_v3  ;;  %4540 = vmatprep.subr.bf16.mxu0 %v5108_v4  ;;  %v5413_v12 = vld [vmem:[%s5404_s23] sm:$0xff]   ;;  %v5416_v13 = vld [vmem:[%s5404_s23 + $0x8] sm:$0x1]  ;;  %v5419_v14 = vld [vmem:[%s5404_s23 + $0xc] sm:$0xff]   ;;  %s5214_s14 = scalar_lea.vmem %s7343_s29, 2048  ;;  %s5278_s15 = smov [#allocation2]  }
  0x1b   : > { %4588 = vmatprep.subr.bf16.mxu1 %v5109_v5  ;;  %v7443_v15 = vunpack.c.l.bf16 %v5413_v12  ;;  %v7440_v16 = vunpack.c.h.bf16 %v5413_v12  ;;  %v7438_v17 = vunpack.c.l.bf16 %v5416_v13  ;;  %v283_v18 = vld [vmem:[%s5404_s23 + $0x14] sm:$0x1]  ;;  %v335_v19 = vunpack.c.l.bf16 %v5419_v14  ;;  %v5428_v22 = vld [vmem:[%s5404_s23 + $0x18] sm:$0xff]   ;;  %4600 = vmatprep.mubr.bf16.mxu1 %v5413_v12  ;;  %v5441_v27 = vld [vmem:[%s5404_s23 + $0x20] sm:$0x1]  ;;  %p5215_p11 = scmp.ne.s32.totalorder %s7343_s29, %s5214_s14 }
  0x1c   : > { %v336_v20 = vunpack.c.h.bf16 %v5419_v14  ;;  %v337_v21 = vunpack.c.l.bf16 %v283_v18  ;;  %v7436_v28 = vunpack.c.l.bf16 %v5428_v22  ;;  %v5450_v35 = vld [vmem:[%s5404_s23 + $0x24] sm:$0xff]   ;;  %v5453_v36 = vld [vmem:[%s5404_s23 + $0x2c] sm:$0x1]  ;;  %v7435_v39 = vunpack.c.h.bf16 %v5428_v22  ;;  %v5459_v40 = vld [vmem:[%s5404_s23 + $0x30] sm:$0xff]  }
  0x1d   : > { %4541 = vmatpush3.bf16.msra.mxu0 %v5108_v4  ;;  %v467_v24 = vrot.slane %v7443_v15, 1  ;;  %v468_v25 = vrot.slane %v7440_v16, 1  ;;  %v470_v26 = vrot.slane %v7438_v17, 1  ;;  %v472_v30 = vrot.slane %v335_v19, 1  ;;  %v5475_v50 = vld [vmem:[%s5404_s23 + $0x38] sm:$0x1]  ;;  %p5216_p12 = pnand %p5215_p11, %p5359_p5 }
  0x1e   : > { %4589 = vmatpush3.bf16.msra.mxu1 %v5109_v5  ;;  %4542 = vmatprep.subr.bf16.mxu0 %v5110_v6  ;;  %v473_v31 = vrot.slane %v336_v20, 1  ;;  %v475_v32 = vrot.slane %v337_v21, 1  ;;  %v5455_v38 = vrot.slane %v335_v19, 2  ;;  %v7433_v43 = vunpack.c.l.bf16 %v5441_v27  ;;  %v5493_v59 = vld [vmem:[%s5404_s23 + $0x3c] sm:$0xff]   ;;  %v5501_v63 = vld [vmem:[%s5404_s23 + $0x44] sm:$0x1] }
  0x1f   : > { %4590 = vmatprep.subr.bf16.mxu1 %v5111_v7  ;;  %v469_v33 = vsel %vm466_vm0, %v467_v24, %v468_v25  ;;  %v471_v34 = vsel %vm466_vm0, %v468_v25, %v470_v26  ;;  %v477_v44 = vrot.slane %v7436_v28, 1  ;;  %v478_v46 = vrot.slane %v7435_v39, 1  ;;  %v5504_v0 = vld [vmem:[%s5404_s23 + $0x48] sm:$0xff]   ;;  %v5507_v1 = vld [vmem:[%s5404_s23 + $0x50] sm:$0x1]  ;;  %v5725_v16 = vld [vmem:[%s5404_s23 + $0xb4] sm:$0xff]   ;;  %p5217_p13 = pneg %p5216_p12 }
  0x20   : > { %v579_v37 = vpack.c.bf16 %v471_v34, %v469_v33  ;;  %v474_v41 = vsel %vm466_vm0, %v472_v30, %v473_v31  ;;  %v476_v42 = vsel %vm466_vm0, %v473_v31, %v475_v32  ;;  %v7429_v47 = vunpack.c.l.bf16 %v5450_v35  ;;  %v5551_v34 = vld [vmem:[%s5404_s23 + $0x60] sm:$0xff]  }
  0x21   : > { %4543 = vmatpush3.bf16.msra.mxu0 %v5110_v6  ;;  %v7426_v48 = vunpack.c.h.bf16 %v5450_v35  ;;  %v7425_v49 = vunpack.c.l.bf16 %v5453_v36  ;;  %v5480_v52 = vrot.slane %v336_v20, 2  ;;  %v480_v53 = vrot.slane %v7433_v43, 1  ;;  %v5528_v20 = vld [vmem:[%s5404_s23 + $0x54] sm:$0xff]  }
  0x22   : > { %4591 = vmatpush3.bf16.msra.mxu1 %v5111_v7  ;;  %4544 = vmatprep.subr.bf16.mxu0 %v5112_v8  ;;  %v7424_v54 = vunpack.c.l.bf16 %v5459_v40  ;;  %v7423_v55 = vunpack.c.h.bf16 %v5459_v40  ;;  %v482_v56 = vrot.slane %v7429_v47, 1  ;;  %v5495_v60 = vpack.c.bf16 %v476_v42, %v474_v41 }
  0x23   : > { %4592 = vmatprep.subr.bf16.mxu1 %v5113_v9  ;;  %4552 = vmatprep.mubr.bf16.mxu0 %v579_v37  ;;  %v483_v57 = vrot.slane %v7426_v48, 1  ;;  %v485_v58 = vrot.slane %v7425_v49, 1  ;;  %v5497_v61 = vrot.slane %v337_v21, 2  ;;  %v7421_v62 = vunpack.c.l.bf16 %v5475_v50  ;;  %v5125_v21 = vld [vmem:[%s7400_s1 + $0xb0] sm:$0xff]   ;;  %v5554_v37 = vld [vmem:[%s5404_s23 + $0x68] sm:$0x1] }
  0x24   : > { %v479_v3 = vsel %vm466_vm0, %v477_v44, %v478_v46  ;;  %v487_v4 = vrot.slane %v7424_v54, 1  ;;  %v481_v5 = vsel %vm466_vm0, %v478_v46, %v480_v53  ;;  %v488_v7 = vrot.slane %v7423_v55, 1  ;;  %v5664_v54 = vld [vmem:[%s5404_s23 + $0x9c] sm:$0xff]  }
  0x25   : > { %4545 = vmatpush3.bf16.msra.mxu0 %v5112_v8  ;;  %v484_v6 = vsel %vm466_vm0, %v482_v56, %v483_v57  ;;  %v7420_v8 = vunpack.c.l.bf16 %v5493_v59  ;;  %v7413_v18 = vunpack.c.l.bf16 %v5501_v63  ;;  %v7412_v19 = vunpack.c.l.bf16 %v5504_v0 }
  0x26   : > { %4593 = vmatpush3.bf16.msra.mxu1 %v5113_v9  ;;  %4546 = vmatprep.subr.bf16.mxu0 %v5114_v10  ;;  %v5135_v9 = vld [vmem:[%s7400_s1 + $0xf8] sm:$0xff]   ;;  %v7411_v25 = vunpack.c.h.bf16 %v5504_v0  ;;  %v7407_v26 = vunpack.c.l.bf16 %v5507_v1  ;;  %v5542_v30 = vpack.c.bf16 %v481_v5, %v479_v3  ;;  %v7408_v44 = vunpack.c.l.bf16 %v5528_v20  ;;  %v5580_v5 = vld [vmem:[%s5404_s23 + $0x6c] sm:$0xff]  }
  0x27   : > { %4594 = vmatprep.subr.bf16.mxu1 %v5115_v11  ;;  %v492_v24 = vrot.slane %v7420_v8, 1  ;;  %v495_v32 = vrot.slane %v7413_v18, 1  ;;  %v497_v33 = vrot.slane %v7412_v19, 1  ;;  %v489_v46 = vsel %vm466_vm0, %v487_v4, %v488_v7 }
  0x28   : > { %v498_v41 = vrot.slane %v7411_v25, 1  ;;  %v500_v42 = vrot.slane %v7407_v26, 1  ;;  %v7409_v53 = vunpack.c.h.bf16 %v5528_v20  ;;  %v7415_v26 = vunpack.c.l.bf16 %v5554_v37 }
  0x29   : > { %4547 = vmatpush3.bf16.msra.mxu0 %v5114_v10  ;;  %v486_v10 = vsel %vm466_vm0, %v483_v57, %v485_v58  ;;  %v5136_v57 = vld [vmem:[%s7400_s1 + $0xf0] sm:$0xff]   ;;  %v7418_v25 = vunpack.c.h.bf16 %v5580_v5 }
  0x2a   : > { %4595 = vmatpush3.bf16.msra.mxu1 %v5115_v11  ;;  %4548 = vmatprep.subr.bf16.mxu0 %v5116_v23  ;;  %v7419_v11 = vunpack.c.h.bf16 %v5493_v59 }
  0x2b   : > { %4596 = vmatprep.subr.bf16.mxu1 %v5117_v29 }
  0x2c   : > { %v493_v31 = vrot.slane %v7419_v11, 1  ;;  %v5651_v11 = vld [vmem:[%s5404_s23 + $0x98] sm:$0x1] }
  0x2d   : > { %4549 = vmatpush3.bf16.msra.mxu0 %v5116_v23  ;;  %v490_v23 = vrot.slane %v7421_v62, 1 }
  0x2e   : > { %4597 = vmatpush3.bf16.msra.mxu1 %v5117_v29  ;;  %4550 = vmatprep.subr.bf16.mxu0 %v5118_v45  ;;  %v5540_v29 = vld [vmem:[%s5404_s23 + $0x5c] sm:$0x1]  ;;  %v494_v3 = vsel %vm466_vm0, %v492_v24, %v493_v31  ;;  %v496_v4 = vsel %vm466_vm0, %v493_v31, %v495_v32  ;;  %v501_v31 = vsel %vm466_vm0, %v498_v41, %v500_v42  ;;  %v7417_v32 = vunpack.c.l.bf16 %v5551_v34 }
  0x2f   : > { %4598 = vmatprep.subr.bf16.mxu1 %v5119_v51  ;;  %v7410_v56 = vunpack.c.l.bf16 %v5540_v29  ;;  %v491_v58 = vsel %vm466_vm0, %v488_v7, %v490_v23  ;;  %v5592_v23 = vld [vmem:[%s5404_s23 + $0x74] sm:$0x1]  ;;  %v5595_v24 = vld [vmem:[%s5404_s23 + $0x78] sm:$0xff]   ;;  %v5611_v42 = vpack.c.bf16 %v496_v4, %v494_v3  ;;  %v5626_v4 = vld [vmem:[%s5404_s23 + $0x84] sm:$0xff]  }
  0x30   : > { %v7422_v3 = vunpack.c.l.bf16 %v5592_v23  ;;  %v7431_v55 = vunpack.c.l.bf16 %v5626_v4 }
  0x31   : > { %4551 = vmatpush3.bf16.msra.mxu0 %v5118_v45  ;;  %v5562_v45 = vpack.c.bf16 %v486_v10, %v484_v6  ;;  %v499_v6 = vsel %vm466_vm0, %v497_v33, %v498_v41  ;;  %v502_v10 = vrot.slane %v7408_v44, 1  ;;  %v505_v7 = vrot.slane %v7410_v56, 1  ;;  %v5602_v44 = vld [vmem:[%s5404_s23 + $0x80] sm:$0x1]  ;;  %v5140_v41 = vld [vmem:[%s7400_s1 + $0xe8] sm:$0xff]   ;;  %7487 = vst [vmem:[#allocation7_spill] sm:$0xff] %v5611_v42 }
  0x32   : > { %4599 = vmatpush3.bf16.msra.mxu1 %v5119_v51  ;;  %4632 = vmatprep.subr.bf16.mxu0 %v5122_v2  ;;  %v5568_v51 = vld [vmem:[%s7400_s1 + $0xa8] sm:$0xff]   ;;  %v7414_v33 = vunpack.c.h.bf16 %v5551_v34  ;;  %v7416_v56 = vunpack.c.l.bf16 %v5580_v5  ;;  %v5620_v19 = vpack.c.bf16 %v501_v31, %v499_v6  ;;  %v513_v6 = vrot.slane %v7418_v25, 1  ;;  %v5648_v25 = vld [vmem:[%s5404_s23 + $0x90] sm:$0xff]  }
  0x33   : > { %4680 = vmatprep.subr.bf16.mxu1 %v5135_v9  ;;  %7485 = vst [vmem:[#allocation5_spill] sm:$0xff] %v5562_v45  ;;  %v7428_v31 = vunpack.c.h.bf16 %v5595_v24 }
  0x34   : > { %4553 = vmatmul.mubr.bf16.vlgmr.msra.gmra.mxu0 %v5495_v60  ;;  %7488 = vst [vmem:[#allocation8_spill] sm:$0xff] %v5620_v19 }
  0x35   : > { %4601 = vmatmul.mubr.bf16.vlgmr.msra.gmra.mxu1 %v5419_v14  ;;  %4633 = vmatpush3.bf16.msra.mxu0 %v5122_v2  ;;  %v503_v2 = vrot.slane %v7409_v53, 1  ;;  %v5604_v53 = vpack.c.bf16 %v491_v58, %v489_v46  ;;  %v508_v46 = vrot.slane %v7414_v33, 1  ;;  %v510_v58 = vrot.slane %v7415_v26, 1  ;;  %v5131_v33 = vld [vmem:[%s7400_s1 + $0xa0] sm:$0xff]  }
  0x36   : > { %4556 = vmatprep.mubr.bf16.mxu0 %v5542_v30  ;;  %4604 = vmatprep.mubr.bf16.mxu1 %v5428_v22  ;;  %v512_v26 = vrot.slane %v7416_v56, 1  ;;  %v515_v56 = vrot.slane %v7422_v3, 1  ;;  %v5134_v3 = vld [vmem:[%s7400_s1 + $0x98] sm:$0xff]  }
  0x37   : > { %4634 = vmatprep.subr.bf16.mxu0 %v5125_v21  ;;  %4681 = vmatpush3.bf16.msra.mxu1 %v5135_v9  ;;  %7486 = vst [vmem:[#allocation6_spill] sm:$0xff] %v5604_v53  ;;  %v507_v9 = vrot.slane %v7417_v32, 1  ;;  %v504_v18 = vsel %vm466_vm0, %v502_v10, %v503_v2  ;;  %v7427_v10 = vunpack.c.l.bf16 %v5595_v24  ;;  %v7430_v32 = vunpack.c.l.bf16 %v5602_v44 }
  0x38   : > { %4682 = vmatprep.subr.bf16.mxu1 %v5136_v57  ;;  %v511_v62 = vsel %vm466_vm0, %v508_v46, %v510_v58  ;;  %v516_v49 = vsel %vm466_vm0, %v513_v6, %v515_v56  ;;  %v7437_v56 = vunpack.c.l.bf16 %v5648_v25 }
  0x39   : > { %4635 = vmatpush3.bf16.msra.mxu0 %v5125_v21  ;;  %v506_v21 = vsel %vm466_vm0, %v503_v2, %v505_v7  ;;  %v5638_v2 = vld [vmem:[%s5404_s23 + $0x8c] sm:$0x1]  ;;  %v5141_v7 = vld [vmem:[%s7400_s1 + $0xe0] sm:$0xff]   ;;  %v509_v8 = vsel %vm466_vm0, %v507_v9, %v508_v46  ;;  %v518_v9 = vrot.slane %v7428_v31, 1  ;;  %v7432_v46 = vunpack.c.h.bf16 %v5626_v4 }
  0x3a   : > { %4636 = vmatprep.subr.bf16.mxu0 %v5568_v51  ;;  %v7434_v58 = vunpack.c.l.bf16 %v5638_v2  ;;  %v520_v48 = vrot.slane %v7430_v32, 1  ;;  %v522_v31 = vrot.slane %v7431_v55, 1  ;;  %v5139_v32 = vld [vmem:[%s7400_s1 + $0x90] sm:$0xff]   ;;  %v7439_v55 = vunpack.c.h.bf16 %v5648_v25 }
  0x3b   : > { %4683 = vmatpush3.bf16.msra.mxu1 %v5136_v57  ;;  %v5655_v57 = vpack.c.bf16 %v506_v21, %v504_v18  ;;  %v517_v18 = vrot.slane %v7427_v10, 1  ;;  %v514_v21 = vsel %vm466_vm0, %v512_v26, %v513_v6  ;;  %v5145_v10 = vld [vmem:[%s7400_s1 + $0xd8] sm:$0xff]   ;;  %v523_v47 = vrot.slane %v7432_v46, 1  ;;  %v5692_v6 = vld [vmem:[%s5404_s23 + $0xa8] sm:$0xff]  }
  0x3c   : > { %4557 = vmatmul.mubr.bf16.gmra.mxu0 %v5562_v45  ;;  %4684 = vmatprep.subr.bf16.mxu1 %v5140_v41  ;;  %v525_v26 = vrot.slane %v7434_v58, 1  ;;  %v7441_v46 = vunpack.c.l.bf16 %v5651_v11  ;;  %v5701_v43 = vpack.c.bf16 %v516_v49, %v514_v21  ;;  %v527_v39 = vrot.slane %v7437_v56, 1 }
  0x3d   : > { %4605 = vmatmul.mubr.bf16.gmra.mxu1 %v5450_v35  ;;  %4560 = vmatprep.mubr.bf16.mxu0 %v5604_v53  ;;  %7489 = vst [vmem:[#allocation9_spill] sm:$0xff] %v5655_v57  ;;  %v519_v58 = vsel %vm466_vm0, %v517_v18, %v518_v9  ;;  %v528_v28 = vrot.slane %v7439_v55, 1  ;;  %v5716_v18 = vld [vmem:[%s5404_s23 + $0xb0] sm:$0x1]  ;;  %v521_v21 = vsel %vm466_vm0, %v518_v9, %v520_v48  ;;  %v7456_v53 = vunpack.c.h.bf16 %v5725_v16 }
  0x3e   : > { %4608 = vmatprep.mubr.bf16.mxu1 %v5459_v40  ;;  %4637 = vmatpush3.bf16.msra.mxu0 %v5568_v51  ;;  %v5679_v51 = vld [vmem:[%s5404_s23 + $0xa4] sm:$0x1]  ;;  %v530_v49 = vrot.slane %v7441_v46, 1  ;;  %v5728_v46 = vld [vmem:[%s5404_s23 + $0xbc] sm:$0x1]  ;;  %v526_v48 = vsel %vm466_vm0, %v523_v47, %v525_v26 }
  0x3f   : > { %4638 = vmatprep.subr.bf16.mxu0 %v5131_v33  ;;  %4685 = vmatpush3.bf16.msra.mxu1 %v5140_v41  ;;  %v5694_v41 = vpack.c.bf16 %v511_v62, %v509_v8  ;;  %v7442_v62 = vunpack.c.l.bf16 %v5664_v54  ;;  %v5146_v8 = vld [vmem:[%s7400_s1 + $0xd0] sm:$0xff]   ;;  %v7447_v56 = vunpack.c.l.bf16 %v5679_v51  ;;  %v529_v15 = vsel %vm466_vm0, %v527_v39, %v528_v28 }
  0x40   : > { %4686 = vmatprep.subr.bf16.mxu1 %v5141_v7  ;;  %v531_v55 = vsel %vm466_vm0, %v528_v28, %v530_v49  ;;  %v7453_v28 = vunpack.c.l.bf16 %v5725_v16  ;;  %v5752_v49 = vpack.c.bf16 %v521_v21, %v519_v58  ;;  %v5149_v21 = vld [vmem:[%s7400_s1 + $0x80] sm:$0xff]  }
  0x41   : > { %7490 = vst [vmem:[#allocation10_spill] sm:$0xff] %v5694_v41  ;;  %v532_v17 = vrot.slane %v7442_v62, 1  ;;  %v7452_v62 = vunpack.c.h.bf16 %v5692_v6 }
  0x42   : > { %4639 = vmatpush3.bf16.msra.mxu0 %v5131_v33  ;;  %v7446_v33 = vunpack.c.h.bf16 %v5664_v54 }
  0x43   : > { %4640 = vmatprep.subr.bf16.mxu0 %v5134_v3  ;;  %4687 = vmatpush3.bf16.msra.mxu1 %v5141_v7  ;;  %v524_v7 = vsel %vm466_vm0, %v522_v31, %v523_v47  ;;  %v5144_v31 = vld [vmem:[%s7400_s1 + $0x88] sm:$0xff]   ;;  %v7454_v47 = vunpack.c.l.bf16 %v5716_v18  ;;  %v538_v39 = vrot.slane %v7452_v62, 1  ;;  %v5764_v62 = vpack.c.bf16 %v531_v55, %v529_v15 }
  0x44   : > { %4561 = vmatmul.mubr.bf16.gmra.mxu0 %v5611_v42  ;;  %4688 = vmatprep.subr.bf16.mxu1 %v5145_v10  ;;  %v533_v9 = vrot.slane %v7446_v33, 1  ;;  %v535_v42 = vrot.slane %v7447_v56, 1  ;;  %v7491_v33 = vunpack.c.l.bf16 %v5692_v6  ;;  %v7493_v55 = vunpack.c.h.bf16 %v5413_v12 }
  0x45   : > { %4609 = vmatmul.mubr.bf16.gmra.mxu1 %v5493_v59  ;;  %4564 = vmatprep.mubr.bf16.mxu0 %v5620_v19  ;;  %v540_v19 = vrot.slane %v7454_v47, 1 }
  0x46   : > { %4612 = vmatprep.mubr.bf16.mxu1 %v5504_v0  ;;  %4641 = vmatpush3.bf16.msra.mxu0 %v5134_v3  ;;  %v534_v26 = vsel %vm466_vm0, %v532_v17, %v533_v9  ;;  %v537_v3 = vrot.slane %v7491_v33, 1  ;;  %v536_v56 = vsel %vm466_vm0, %v533_v9, %v535_v42  ;;  %v5150_v17 = vld [vmem:[%s7400_s1 + $0xc8] sm:$0xff]   ;;  %v7455_v33 = vunpack.c.l.bf16 %v5728_v46 }
  0x47   : > { %4642 = vmatprep.subr.bf16.mxu0 %v5139_v32  ;;  %4689 = vmatpush3.bf16.msra.mxu1 %v5145_v10  ;;  %v5761_v10 = vpack.c.bf16 %v526_v48, %v524_v7  ;;  %v5766_v58 = vpack.c.bf16 %v536_v56, %v534_v26  ;;  %v5770_v42 = vrot.slane %v7453_v28, 1  ;;  %v5151_v7 = vld [vmem:[%s7400_s1 + $0xc0] sm:$0xff]   ;;  %v7492_v48 = vunpack.c.l.bf16 %v5413_v12 }
  0x48   : > { %4690 = vmatprep.subr.bf16.mxu1 %v5146_v8  ;;  %v5781_v15 = vsel %vm466_vm0, %v537_v3, %v538_v39  ;;  %v7494_v56 = vunpack.c.l.bf16 %v5416_v13  ;;  %v1038_v28 = vsel %vm1030_vm1, %v5455_v38, %v5480_v52  ;;  %v5792_v47 = vsel %vm466_vm0, %v538_v39, %v540_v19 }
  0x49   : > { %v1031_v9 = vrot.slane %v7492_v48, 2  ;;  %v5796_v3 = vrot.slane %v7456_v53, 1  ;;  %v1040_v12 = vsel %vm1030_vm1, %v5480_v52, %v5497_v61  ;;  %v7495_v13 = vunpack.c.l.bf16 %v5428_v22 }
  0x4a   : > { %4643 = vmatpush3.bf16.msra.mxu0 %v5139_v32  ;;  %v1032_v32 = vrot.slane %v7493_v55, 2  ;;  %v1034_v26 = vrot.slane %v7494_v56, 2  ;;  %v5807_v38 = vrot.slane %v7455_v33, 1  ;;  %v7496_v48 = vunpack.c.h.bf16 %v5428_v22 }
  0x4b   : > { %4644 = vmatprep.subr.bf16.mxu0 %v5144_v31  ;;  %4691 = vmatpush3.bf16.msra.mxu1 %v5146_v8  ;;  %v1041_v8 = vrot.slane %v7495_v13, 2  ;;  %v5820_v55 = vpack.c.bf16 %v1040_v12, %v1038_v28  ;;  %v7497_v56 = vunpack.c.l.bf16 %v5441_v27  ;;  %v7500_v28 = vunpack.c.l.bf16 %v5453_v36  ;;  %v5848_v36 = vld [vmem:[%s7400_s1 + $0x178] sm:$0xff]  }
  0x4c   : > { %4565 = vmatmul.mubr.bf16.gmra.mxu0 %v5655_v57  ;;  %4692 = vmatprep.subr.bf16.mxu1 %v5150_v17  ;;  %v5810_v19 = vsel %vm1030_vm1, %v1031_v9, %v1032_v32  ;;  %v5813_v39 = vsel %vm1030_vm1, %v1032_v32, %v1034_v26  ;;  %v1042_v52 = vrot.slane %v7496_v48, 2  ;;  %v7498_v9 = vunpack.c.l.bf16 %v5450_v35  ;;  %v5829_v32 = vld [vmem:[%s7400_s1 + $0x138] sm:$0xff]  }
  0x4d   : > { %4613 = vmatmul.mubr.bf16.gmra.mxu1 %v5528_v20  ;;  %4568 = vmatprep.mubr.bf16.mxu0 %v5694_v41  ;;  %v1044_v13 = vrot.slane %v7497_v56, 2  ;;  %v7499_v26 = vunpack.c.h.bf16 %v5450_v35  ;;  %v1049_v12 = vrot.slane %v7500_v28, 2  ;;  %v7501_v27 = vunpack.c.l.bf16 %v5459_v40 }
  0x4e   : > { %4616 = vmatprep.mubr.bf16.mxu1 %v5551_v34  ;;  %4645 = vmatpush3.bf16.msra.mxu0 %v5144_v31  ;;  %v1046_v33 = vrot.slane %v7498_v9, 2  ;;  %v1043_v31 = vsel %vm1030_vm1, %v1041_v8, %v1042_v52  ;;  %v7503_v53 = vunpack.c.l.bf16 %v5475_v50  ;;  %v7504_v8 = vunpack.c.l.bf16 %v5493_v59 }
  0x4f   : > { %4646 = vmatprep.subr.bf16.mxu0 %v5149_v21  ;;  %4693 = vmatpush3.bf16.msra.mxu1 %v5150_v17  ;;  %v1047_v48 = vrot.slane %v7499_v26, 2  ;;  %v1051_v56 = vrot.slane %v7501_v27, 2  ;;  %v1045_v9 = vsel %vm1030_vm1, %v1042_v52, %v1044_v13  ;;  %v7502_v17 = vunpack.c.h.bf16 %v5459_v40 }
  0x50   : > { %4694 = vmatprep.subr.bf16.mxu1 %v5151_v7  ;;  %v1054_v41 = vrot.slane %v7503_v53, 2  ;;  %v1056_v57 = vrot.slane %v7504_v8, 2  ;;  %v5850_v26 = vpack.c.bf16 %v1045_v9, %v1043_v31  ;;  %v7505_v13 = vunpack.c.h.bf16 %v5493_v59 }
  0x51   : > { %v1052_v61 = vrot.slane %v7502_v17, 2  ;;  %v1048_v28 = vsel %vm1030_vm1, %v1046_v33, %v1047_v48  ;;  %v1050_v52 = vsel %vm1030_vm1, %v1047_v48, %v1049_v12  ;;  %v7506_v8 = vunpack.c.l.bf16 %v5501_v63 }
  0x52   : > { %v1057_v27 = vrot.slane %v7505_v13, 2  ;;  %4647 = vmatpush3.bf16.msra.mxu0 %v5149_v21  ;;  %v5856_v50 = vpack.c.bf16 %v1050_v52, %v1048_v28  ;;  %v7507_v48 = vunpack.c.l.bf16 %v5504_v0  ;;  %v7508_v21 = vunpack.c.h.bf16 %v5504_v0 }
  0x53   : > { %v1053_v53 = vsel %vm1030_vm1, %v1051_v56, %v1052_v61  ;;  %v1055_v17 = vsel %vm1030_vm1, %v1052_v61, %v1054_v41  ;;  %v1059_v45 = vrot.slane %v7506_v8, 2  ;;  %4695 = vmatpush3.bf16.msra.mxu1 %v5151_v7  ;;  %4728 = vmatprep.subr.bf16.mxu0 %v5829_v32  ;;  %v7509_v63 = vunpack.c.l.bf16 %v5507_v1 }
  0x54   : > { %v5863_v31 = vpack.c.bf16 %v1055_v17, %v1053_v53  ;;  %v1058_v33 = vsel %vm1030_vm1, %v1056_v57, %v1057_v27  ;;  %v1061_v12 = vrot.slane %v7507_v48, 2  ;;  %v1062_v9 = vrot.slane %v7508_v21, 2  ;;  %4569 = vmatmul.mubr.bf16.gmra.mxu0 %v5701_v43  ;;  %4776 = vmatprep.subr.bf16.mxu1 %v5848_v36 }
  0x55   : > { %v1060_v41 = vsel %vm1030_vm1, %v1057_v27, %v1059_v45  ;;  %v1064_v61 = vrot.slane %v7509_v63, 2  ;;  %v7510_v7 = vunpack.c.l.bf16 %v5528_v20  ;;  %v7511_v28 = vunpack.c.h.bf16 %v5528_v20  ;;  %4617 = vmatmul.mubr.bf16.gmra.mxu1 %v5580_v5  ;;  %4572 = vmatprep.mubr.bf16.mxu0 %v5752_v49 }
  0x56   : > { %v5881_v57 = vpack.c.bf16 %v1060_v41, %v1058_v33  ;;  %v1063_v13 = vsel %vm1030_vm1, %v1061_v12, %v1062_v9  ;;  %v7512_v45 = vunpack.c.l.bf16 %v5540_v29  ;;  %v7513_v27 = vunpack.c.l.bf16 %v5551_v34  ;;  %4620 = vmatprep.mubr.bf16.mxu1 %v5595_v24 }
  0x57   : > { %v1066_v56 = vrot.slane %v7510_v7, 2  ;;  %v1067_v52 = vrot.slane %v7511_v28, 2  ;;  %v1065_v17 = vsel %vm1030_vm1, %v1062_v9, %v1064_v61  ;;  %v7514_v48 = vunpack.c.h.bf16 %v5551_v34 }
  0x58   : > { %v1069_v1 = vrot.slane %v7512_v45, 2  ;;  %v1071_v53 = vrot.slane %v7513_v27, 2  ;;  %v7515_v33 = vunpack.c.l.bf16 %v5554_v37  ;;  %v5895_v63 = vpack.c.bf16 %v1065_v17, %v1063_v13 }
  0x59   : > { %v1068_v8 = vsel %vm1030_vm1, %v1066_v56, %v1067_v52  ;;  %v1072_v21 = vrot.slane %v7514_v48, 2  ;;  %v7516_v12 = vunpack.c.l.bf16 %v5580_v5  ;;  %v7517_v28 = vunpack.c.h.bf16 %v5580_v5 }
  0x5a   : > { %v1074_v41 = vrot.slane %v7515_v33, 2  ;;  %v1070_v29 = vsel %vm1030_vm1, %v1067_v52, %v1069_v1  ;;  %v7518_v56 = vunpack.c.l.bf16 %v5592_v23  ;;  %v7519_v52 = vunpack.c.l.bf16 %v5595_v24 }
  0x5b   : > { %v1076_v7 = vrot.slane %v7516_v12, 2  ;;  %v1077_v45 = vrot.slane %v7517_v28, 2  ;;  %v5902_v27 = vpack.c.bf16 %v1070_v29, %v1068_v8  ;;  %v1073_v9 = vsel %vm1030_vm1, %v1071_v53, %v1072_v21 }
  0x5c   : > { %v1075_v61 = vsel %vm1030_vm1, %v1072_v21, %v1074_v41  ;;  %v1079_v37 = vrot.slane %v7518_v56, 2  ;;  %v1081_v1 = vrot.slane %v7519_v52, 2  ;;  %v7520_v17 = vunpack.c.h.bf16 %v5595_v24  ;;  %4573 = vmatmul.mubr.bf16.gmra.mxu0 %v5761_v10 }
  0x5d   : > { %v5908_v48 = vpack.c.bf16 %v1075_v61, %v1073_v9  ;;  %v1078_v13 = vsel %vm1030_vm1, %v1076_v7, %v1077_v45  ;;  %v7521_v29 = vunpack.c.l.bf16 %v5602_v44  ;;  %v7522_v21 = vunpack.c.l.bf16 %v5626_v4  ;;  %4621 = vmatmul.mubr.bf16.gmra.mxu1 %v5626_v4  ;;  %4576 = vmatprep.mubr.bf16.mxu0 %v5764_v62 }
  0x5e   : > { %v1082_v33 = vrot.slane %v7520_v17, 2  ;;  %v1080_v8 = vsel %vm1030_vm1, %v1077_v45, %v1079_v37  ;;  %v7523_v23 = vunpack.c.h.bf16 %v5626_v4  ;;  %v7524_v9 = vunpack.c.l.bf16 %v5638_v2  ;;  %4624 = vmatprep.mubr.bf16.mxu1 %v5648_v25 }
  0x5f   : > { %v1084_v53 = vrot.slane %v7521_v29, 2  ;;  %v1086_v41 = vrot.slane %v7522_v21, 2  ;;  %v5922_v28 = vpack.c.bf16 %v1080_v8, %v1078_v13  ;;  %v7525_v56 = vunpack.c.l.bf16 %v5648_v25 }
  0x60   : > { %v1087_v12 = vrot.slane %v7523_v23, 2  ;;  %v1083_v7 = vsel %vm1030_vm1, %v1081_v1, %v1082_v33  ;;  %v1089_v61 = vrot.slane %v7524_v9, 2  ;;  %v7526_v37 = vunpack.c.h.bf16 %v5648_v25 }
  0x61   : > { %v1091_v52 = vrot.slane %v7525_v56, 2  ;;  %v1085_v44 = vsel %vm1030_vm1, %v1082_v33, %v1084_v53  ;;  %v7527_v13 = vunpack.c.l.bf16 %v5651_v11  ;;  %v7528_v29 = vunpack.c.l.bf16 %v5664_v54 }
  0x62   : > { %v1088_v45 = vsel %vm1030_vm1, %v1086_v41, %v1087_v12  ;;  %v1092_v17 = vrot.slane %v7526_v37, 2  ;;  %v5938_v2 = vpack.c.bf16 %v1085_v44, %v1083_v7  ;;  %v1090_v1 = vsel %vm1030_vm1, %v1087_v12, %v1089_v61 }
  0x63   : > { %v1094_v8 = vrot.slane %v7527_v13, 2  ;;  %v1096_v21 = vrot.slane %v7528_v29, 2  ;;  %v7529_v33 = vunpack.c.h.bf16 %v5664_v54  ;;  %v5946_v41 = vpack.c.bf16 %v1090_v1, %v1088_v45 }
  0x64   : > { %v1093_v11 = vsel %vm1030_vm1, %v1091_v52, %v1092_v17  ;;  %v7530_v9 = vunpack.c.l.bf16 %v5679_v51  ;;  %v7531_v61 = vunpack.c.l.bf16 %v5692_v6  ;;  %v7532_v37 = vunpack.c.h.bf16 %v5692_v6  ;;  %4577 = vmatmul.mubr.bf16.gmra.mxu0 %v5766_v58 }
  0x65   : > { %v1097_v53 = vrot.slane %v7529_v33, 2  ;;  %v1095_v23 = vsel %vm1030_vm1, %v1092_v17, %v1094_v8  ;;  %v7533_v1 = vunpack.c.l.bf16 %v5716_v18  ;;  %v7534_v17 = vunpack.c.l.bf16 %v5725_v16  ;;  %4625 = vmatmul.mubr.bf16.gmra.mxu1 %v5664_v54 }
  0x66   : > { %v1099_v7 = vrot.slane %v7530_v9, 2  ;;  %v5952_v56 = vpack.c.bf16 %v1095_v23, %v1093_v11  ;;  %v1101_v44 = vrot.slane %v7531_v61, 2  ;;  %v1102_v13 = vrot.slane %v7532_v37, 2  ;;  %4628 = vmatprep.mubr.bf16.mxu1 %v5692_v6 }
  0x67   : > { %v1098_v12 = vsel %vm1030_vm1, %v1096_v21, %v1097_v53  ;;  %v1104_v52 = vrot.slane %v7533_v1, 2  ;;  %v1106_v8 = vrot.slane %v7534_v17, 2  ;;  %v7535_v51 = vunpack.c.h.bf16 %v5725_v16  ;;  %v5167_v1 = vld [vmem:[%s7400_s1 + $0x148] sm:$0xff]   ;;  %v5168_v17 = vld [vmem:[%s7400_s1 + $0x140] sm:$0xff]  }
  0x68   : > { %v1100_v45 = vsel %vm1030_vm1, %v1097_v53, %v1099_v7  ;;  %v5968_v21 = vpack.c.bf16 %v5792_v47, %v5781_v15  ;;  %v1103_v11 = vsel %vm1030_vm1, %v1101_v44, %v1102_v13  ;;  %v7536_v23 = vunpack.c.l.bf16 %v5728_v46  ;;  %v5159_v44 = vld [vmem:[%s7400_s1 + $0x110] sm:$0xff]  }
  0x69   : > { %v1107_v29 = vrot.slane %v7535_v51, 2  ;;  %v5970_v33 = vpack.c.bf16 %v1100_v45, %v1098_v12  ;;  %v1105_v18 = vsel %vm1030_vm1, %v1102_v13, %v1104_v52  ;;  %v544_v46 = vsel %vm466_vm0, %v5770_v42, %v5796_v3  ;;  %v5153_v42 = vld [vmem:[%s7400_s1 + $0x130] sm:$0xff]   ;;  %v5162_v45 = vld [vmem:[%s7400_s1 + $0x108] sm:$0xff]   ;;  %v5165_v52 = vld [vmem:[%s7400_s1 + $0x100] sm:$0xff]  }
  0x6a   : > { %v1109_v53 = vrot.slane %v7536_v23, 2  ;;  %v5977_v7 = vpack.c.bf16 %v1105_v18, %v1103_v11  ;;  %4580 = vmatprep.mubr.bf16.mxu0 %v5968_v21  ;;  %v546_v47 = vsel %vm466_vm0, %v5796_v3, %v5807_v38  ;;  %v7537_v12 = vpack.c.bf16 %v5813_v39, %v5810_v19  ;;  %v5158_v3 = vld [vmem:[%s7400_s1 + $0x170] sm:$0xff]   ;;  %v5160_v38 = vld [vmem:[%s7400_s1 + $0x168] sm:$0xff]   ;;  %v5155_v19 = vld [vmem:[%s7400_s1 + $0x120] sm:$0xff]  }
  0x6b   : > { %v1108_v9 = vsel %vm1030_vm1, %v1106_v8, %v1107_v29  ;;  %v5992_v15 = vpack.c.bf16 %v546_v47, %v544_v46  ;;  %v5161_v39 = vld [vmem:[%s7400_s1 + $0x160] sm:$0xff]   ;;  %v5164_v13 = vld [vmem:[%s7400_s1 + $0x150] sm:$0xff]   ;;  %v5169_v8 = vld [vmem:[%s7400_s1 + $0x1b8] sm:$0xff]  }
  0x6c   : > { %v1110_v61 = vsel %vm1030_vm1, %v1107_v29, %v1109_v53  ;;  %v5174_v51 = vld [vmem:[%s7400_s1 + $0x1f8] sm:$0xff]   ;;  %v6079_v29 = vld [vmem:[%s5404_s23 + $0xc0] sm:$0xff]   ;;  %v5170_v11 = vld [vmem:[%s7400_s1 + $0x1b0] sm:$0xff]  }
  0x6d   : > { %v5981_v37 = vpack.c.bf16 %v1110_v61, %v1108_v9  ;;  %4581 = vmatmul.mubr.bf16.gmra.mxu0 %v5992_v15  ;;  %4629 = vmatmul.mubr.bf16.gmra.mxu1 %v5725_v16  ;;  %v5175_v23 = vld [vmem:[%s7400_s1 + $0x1f0] sm:$0xff]   ;;  %v7538_v53 = vld [vmem:[#allocation5_spill] sm:$0xff]  ;;  %v7539_v9 = vld [vmem:[#allocation6_spill] sm:$0xff] }
  0x6e   : > { %4648 = vmatprep.mubr.bf16.mxu0 %v7537_v12  ;;  %4696 = vmatprep.mubr.bf16.mxu1 %v5419_v14  ;;  %v5154_v14 = vld [vmem:[%s7400_s1 + $0x128] sm:$0xff]   ;;  %v5172_v18 = vld [vmem:[%s7400_s1 + $0x1a0] sm:$0xff]   ;;  %v7540_v46 = vld [vmem:[#allocation7_spill] sm:$0xff] }
  0x6f   : > { %v5178_v61 = vld [vmem:[%s7400_s1 + $0x1e0] sm:$0xff]   ;;  %v5173_v47 = vld [vmem:[%s7400_s1 + $0x198] sm:$0xff]  }
  0x70   : > { %v5180_v12 = vld [vmem:[%s7400_s1 + $0x1d8] sm:$0xff]  }
  0x75   : > { %4649 = vmatmul.mubr.bf16.vlgmr.msra.gmra.mxu0 %v5820_v55  ;;  %4697 = vmatmul.mubr.bf16.vlgmr.msra.gmra.mxu1 %v5428_v22 }
  0x76   : > { %4729 = vmatpush3.bf16.msra.mxu0 %v5829_v32  ;;  %4652 = vmatprep.mubr.bf16.mxu0 %v5850_v26  ;;  %v5156_v32 = vld [vmem:[%s7400_s1 + $0x118] sm:$0xff]  }
  0x77   : > { %4730 = vmatprep.subr.bf16.mxu0 %v5153_v42  ;;  %4700 = vmatprep.mubr.bf16.mxu1 %v5450_v35 }
  0x78   : > { %4777 = vmatpush3.bf16.msra.mxu1 %v5848_v36  ;;  %v5163_v36 = vld [vmem:[%s7400_s1 + $0x158] sm:$0xff]  }
  0x79   : > { %4778 = vmatprep.subr.bf16.mxu1 %v5158_v3 }
  0x7a   : > { %4731 = vmatpush3.bf16.msra.mxu0 %v5153_v42  ;;  %v5176_v42 = vld [vmem:[%s7400_s1 + $0x190] sm:$0xff]  }
  0x7b   : > { %4732 = vmatprep.subr.bf16.mxu0 %v5154_v14 }
  0x7c   : > { %4779 = vmatpush3.bf16.msra.mxu1 %v5158_v3  ;;  %v7541_v3 = vld [vmem:[#allocation8_spill] sm:$0xff] }
  0x7d   : > { %4653 = vmatmul.mubr.bf16.gmra.mxu0 %v5856_v50  ;;  %4780 = vmatprep.subr.bf16.mxu1 %v5160_v38 }
  0x7e   : > { %4701 = vmatmul.mubr.bf16.gmra.mxu1 %v5459_v40  ;;  %4656 = vmatprep.mubr.bf16.mxu0 %v5863_v31 }
  0x7f   : > { %4704 = vmatprep.mubr.bf16.mxu1 %v5493_v59  ;;  %4733 = vmatpush3.bf16.msra.mxu0 %v5154_v14  ;;  %v5181_v14 = vld [vmem:[%s7400_s1 + $0x1d0] sm:$0xff]  }
  0x80   : > { %4734 = vmatprep.subr.bf16.mxu0 %v5155_v19  ;;  %4781 = vmatpush3.bf16.msra.mxu1 %v5160_v38  ;;  %v7542_v38 = vld [vmem:[#allocation9_spill] sm:$0xff] }
  0x81   : > { %4782 = vmatprep.subr.bf16.mxu1 %v5161_v39 }
  0x83   : > { %4735 = vmatpush3.bf16.msra.mxu0 %v5155_v19  ;;  %v5179_v19 = vld [vmem:[%s7400_s1 + $0x188] sm:$0xff]  }
  0x84   : > { %4736 = vmatprep.subr.bf16.mxu0 %v5156_v32  ;;  %4783 = vmatpush3.bf16.msra.mxu1 %v5161_v39  ;;  %v5183_v39 = vld [vmem:[%s7400_s1 + $0x1c8] sm:$0xff]  }
  0x85   : > { %4657 = vmatmul.mubr.bf16.gmra.mxu0 %v5881_v57  ;;  %4784 = vmatprep.subr.bf16.mxu1 %v5163_v36 }
  0x86   : > { %4705 = vmatmul.mubr.bf16.gmra.mxu1 %v5504_v0  ;;  %4660 = vmatprep.mubr.bf16.mxu0 %v5895_v63 }
  0x87   : > { %4708 = vmatprep.mubr.bf16.mxu1 %v5528_v20  ;;  %4737 = vmatpush3.bf16.msra.mxu0 %v5156_v32  ;;  %v5182_v32 = vld [vmem:[%s7400_s1 + $0x180] sm:$0xff]  }
  0x88   : > { %4738 = vmatprep.subr.bf16.mxu0 %v5159_v44  ;;  %4785 = vmatpush3.bf16.msra.mxu1 %v5163_v36  ;;  %v7543_v36 = vld [vmem:[#allocation10_spill] sm:$0xff] }
  0x89   : > { %4786 = vmatprep.subr.bf16.mxu1 %v5164_v13 }
  0x8b   : > { %4739 = vmatpush3.bf16.msra.mxu0 %v5159_v44  ;;  %v5184_v44 = vld [vmem:[%s7400_s1 + $0x1c0] sm:$0xff]  }
  0x8c   : > { %4740 = vmatprep.subr.bf16.mxu0 %v5162_v45  ;;  %4787 = vmatpush3.bf16.msra.mxu1 %v5164_v13  ;;  %v5185_v13 = vld [vmem:[%s7400_s1 + $0x238] sm:$0xff]  }
  0x8d   : > { %4661 = vmatmul.mubr.bf16.gmra.mxu0 %v5902_v27  ;;  %4788 = vmatprep.subr.bf16.mxu1 %v5167_v1 }
  0x8e   : > { %4709 = vmatmul.mubr.bf16.gmra.mxu1 %v5551_v34  ;;  %4664 = vmatprep.mubr.bf16.mxu0 %v5908_v48 }
  0x8f   : > { %4712 = vmatprep.mubr.bf16.mxu1 %v5580_v5  ;;  %4741 = vmatpush3.bf16.msra.mxu0 %v5162_v45  ;;  %v328_v45 = vld [vmem:[%s5404_s23 + $0xc8] sm:$0x1] }
  0x90   : > { %4742 = vmatprep.subr.bf16.mxu0 %v5165_v52  ;;  %4789 = vmatpush3.bf16.msra.mxu1 %v5167_v1  ;;  %v380_v1 = vunpack.c.l.bf16 %v6079_v29 }
  0x91   : > { %4790 = vmatprep.subr.bf16.mxu1 %v5168_v17 }
  0x93   : > { %4743 = vmatpush3.bf16.msra.mxu0 %v5165_v52  ;;  %v381_v52 = vunpack.c.h.bf16 %v6079_v29 }
  0x94   : > { %4791 = vmatpush3.bf16.msra.mxu1 %v5168_v17  ;;  %4824 = vmatprep.subr.bf16.mxu0 %v5169_v8  ;;  %v382_v17 = vunpack.c.l.bf16 %v328_v45 }
  0x95   : > { %4665 = vmatmul.mubr.bf16.gmra.mxu0 %v5922_v28  ;;  %4872 = vmatprep.subr.bf16.mxu1 %v5174_v51 }
  0x96   : > { %4713 = vmatmul.mubr.bf16.gmra.mxu1 %v5595_v24  ;;  %4668 = vmatprep.mubr.bf16.mxu0 %v5938_v2 }
  0x97   : > { %4716 = vmatprep.mubr.bf16.mxu1 %v5626_v4 }
  0x9d   : > { %4669 = vmatmul.mubr.bf16.gmra.mxu0 %v5946_v41 }
  0x9e   : > { %4717 = vmatmul.mubr.bf16.gmra.mxu1 %v5648_v25  ;;  %4672 = vmatprep.mubr.bf16.mxu0 %v5952_v56 }
  0x9f   : > { %4720 = vmatprep.mubr.bf16.mxu1 %v5664_v54 }
  0xa5   : > { %4673 = vmatmul.mubr.bf16.gmra.mxu0 %v5970_v33 }
  0xa6   : > { %4721 = vmatmul.mubr.bf16.gmra.mxu1 %v5692_v6  ;;  %4676 = vmatprep.mubr.bf16.mxu0 %v5977_v7 }
  0xa7   : > { %4724 = vmatprep.mubr.bf16.mxu1 %v5725_v16 }
  0xad   : > { %4677 = vmatmul.mubr.bf16.gmra.mxu0 %v5981_v37 }
  0xae   : > { %4725 = vmatmul.mubr.bf16.gmra.mxu1 %v6079_v29  ;;  %4744 = vmatprep.mubr.bf16.mxu0 %v5495_v60  ;;  %v5171_v60 = vld [vmem:[%s7400_s1 + $0x1a8] sm:$0xff]  }
  0xaf   : > { %4792 = vmatprep.mubr.bf16.mxu1 %v5820_v55  ;;  %v5177_v55 = vld [vmem:[%s7400_s1 + $0x1e8] sm:$0xff]  }
  0xb5   : > { %4745 = vmatmul.mubr.bf16.vlgmr.msra.gmra.mxu0 %v5542_v30 }
  0xb6   : > { %4825 = vmatpush3.bf16.msra.mxu0 %v5169_v8  ;;  %4793 = vmatmul.mubr.bf16.vlgmr.msra.gmra.mxu1 %v5850_v26  ;;  %v1679_v8 = vrot.slane %v380_v1, 1 }
  0xb7   : > { %4748 = vmatprep.mubr.bf16.mxu0 %v7538_v53  ;;  %4826 = vmatprep.subr.bf16.mxu0 %v5170_v11 }
  0xb8   : > { %4796 = vmatprep.mubr.bf16.mxu1 %v5856_v50  ;;  %4873 = vmatpush3.bf16.msra.mxu1 %v5174_v51  ;;  %v1680_v51 = vrot.slane %v381_v52, 1 }
  0xb9   : > { %4874 = vmatprep.subr.bf16.mxu1 %v5175_v23 }
  0xba   : > { %4827 = vmatpush3.bf16.msra.mxu0 %v5170_v11  ;;  %v1945_v11 = vrot.slane %v380_v1, 2 }
  0xbb   : > { %4828 = vmatprep.subr.bf16.mxu0 %v5171_v60 }
  0xbc   : > { %4875 = vmatpush3.bf16.msra.mxu1 %v5175_v23  ;;  %v1946_v23 = vrot.slane %v381_v52, 2 }
  0xbd   : > { %4749 = vmatmul.mubr.bf16.gmra.mxu0 %v7539_v9  ;;  %4876 = vmatprep.subr.bf16.mxu1 %v5177_v55 }
  0xbe   : > { %4797 = vmatmul.mubr.bf16.gmra.mxu1 %v5863_v31  ;;  %4752 = vmatprep.mubr.bf16.mxu0 %v7540_v46 }
  0xbf   : > { %4800 = vmatprep.mubr.bf16.mxu1 %v5881_v57  ;;  %4829 = vmatpush3.bf16.msra.mxu0 %v5171_v60  ;;  %v1682_v60 = vrot.slane %v382_v17, 1 }
  0xc0   : > { %4830 = vmatprep.subr.bf16.mxu0 %v5172_v18  ;;  %4877 = vmatpush3.bf16.msra.mxu1 %v5177_v55  ;;  %v6158_v55 = vld [vmem:[%s5404_s23 + $0xcc] sm:$0xff]  }
  0xc1   : > { %4878 = vmatprep.subr.bf16.mxu1 %v5178_v61 }
  0xc3   : > { %4831 = vmatpush3.bf16.msra.mxu0 %v5172_v18  ;;  %v1948_v18 = vrot.slane %v382_v17, 2 }
  0xc4   : > { %4832 = vmatprep.subr.bf16.mxu0 %v5173_v47  ;;  %4879 = vmatpush3.bf16.msra.mxu1 %v5178_v61  ;;  %v6161_v61 = vld [vmem:[%s5404_s23 + $0xd4] sm:$0x1]  ;;  %s5218_s23 = sshll.u32 %s5278_s15, 4  ;;  %s5219_s23 = int_to_ptr.vmem [resolvable:$false] %s5218_s23 }
  0xc5   : > { %4753 = vmatmul.mubr.bf16.gmra.mxu0 %v7541_v3  ;;  %4880 = vmatprep.subr.bf16.mxu1 %v5180_v12  ;;  %v385_v45 = vunpack.c.l.bf16 %v6161_v61  ;;  %s5220_s16 = scalar_lea.vmem %s5219_s23, 4096  ;;  %p5221_p0 = scmp.lt.s32.totalorder %s7343_s29, %s5219_s23 }
  0xc6   : > { %4801 = vmatmul.mubr.bf16.gmra.mxu1 %v5895_v63  ;;  %4756 = vmatprep.mubr.bf16.mxu0 %v7542_v38  ;;  %p5222_p1 = scmp.lt.s32.totalorder %s5220_s16, %s5214_s14 }
  0xc7   : > { %4804 = vmatprep.mubr.bf16.mxu1 %v5902_v27  ;;  %4833 = vmatpush3.bf16.msra.mxu0 %v5173_v47  ;;  %v383_v47 = vunpack.c.l.bf16 %v6158_v55  ;;  %v2742_v52 = vrot.slane %v385_v45, 2 }
  0xc8   : > { %4834 = vmatprep.subr.bf16.mxu0 %v5176_v42  ;;  %4881 = vmatpush3.bf16.msra.mxu1 %v5180_v12  ;;  %v384_v12 = vunpack.c.h.bf16 %v6158_v55  ;;  %p5223_p2 = por %p5222_p1, %p5221_p0 }
  0xc9   : > { %4882 = vmatprep.subr.bf16.mxu1 %v5181_v14 }
  0xca   : > { %p5224_p3 = pnand %p5223_p2, %p5217_p13 }
  0xcb   : > { %4835 = vmatpush3.bf16.msra.mxu0 %v5176_v42  ;;  %v1681_v42 = vsel %vm466_vm0, %v1679_v8, %v1680_v51 }
  0xcc   : > { %4836 = vmatprep.subr.bf16.mxu0 %v5179_v19  ;;  %4883 = vmatpush3.bf16.msra.mxu1 %v5181_v14  ;;  %v1683_v14 = vsel %vm466_vm0, %v1680_v51, %v1682_v60 }
  0xcd   : > { %4757 = vmatmul.mubr.bf16.gmra.mxu0 %v7543_v36  ;;  %4884 = vmatprep.subr.bf16.mxu1 %v5183_v39  ;;  %v6178_v1 = vpack.c.bf16 %v1683_v14, %v1681_v42 }
  0xce   : > { %4805 = vmatmul.mubr.bf16.gmra.mxu1 %v5908_v48  ;;  %4760 = vmatprep.mubr.bf16.mxu0 %v5701_v43 }
  0xcf   : > { %4808 = vmatprep.mubr.bf16.mxu1 %v5922_v28  ;;  %4837 = vmatpush3.bf16.msra.mxu0 %v5179_v19  ;;  %v1947_v19 = vsel %vm1030_vm1, %v1945_v11, %v1946_v23 }
  0xd0   : > { %4838 = vmatprep.subr.bf16.mxu0 %v5182_v32  ;;  %4885 = vmatpush3.bf16.msra.mxu1 %v5183_v39  ;;  %v1949_v39 = vsel %vm1030_vm1, %v1946_v23, %v1948_v18  ;;  %v5186_v23 = vld [vmem:[%s7400_s1 + $0x230] sm:$0xff]  }
  0xd1   : > { %4886 = vmatprep.subr.bf16.mxu1 %v5184_v44  ;;  %v6182_v17 = vpack.c.bf16 %v1949_v39, %v1947_v19 }
  0xd3   : > { %4839 = vmatpush3.bf16.msra.mxu0 %v5182_v32  ;;  %v2739_v32 = vrot.slane %v383_v47, 2 }
  0xd4   : > { %4887 = vmatpush3.bf16.msra.mxu1 %v5184_v44  ;;  %4920 = vmatprep.subr.bf16.mxu0 %v5185_v13  ;;  %v2740_v44 = vrot.slane %v384_v12, 2 }
  0xd5   : > { %4761 = vmatmul.mubr.bf16.gmra.mxu0 %v5752_v49 }
  0xd6   : > { %4809 = vmatmul.mubr.bf16.gmra.mxu1 %v5938_v2  ;;  %4764 = vmatprep.mubr.bf16.mxu0 %v5761_v10  ;;  %v6185_v8 = vsel %vm1030_vm1, %v2739_v32, %v2740_v44  ;;  %v6188_v51 = vsel %vm1030_vm1, %v2740_v44, %v2742_v52 }
  0xd7   : > { %4812 = vmatprep.mubr.bf16.mxu1 %v5946_v41  ;;  %7544 = vst [vmem:[#allocation5_spill] sm:$0xff] %v6185_v8 }
  0xdd   : > { %4765 = vmatmul.mubr.bf16.gmra.mxu0 %v5764_v62 }
  0xde   : > { %4813 = vmatmul.mubr.bf16.gmra.mxu1 %v5952_v56  ;;  %4768 = vmatprep.mubr.bf16.mxu0 %v5766_v58 }
  0xdf   : > { %4816 = vmatprep.mubr.bf16.mxu1 %v5970_v33 }
  0xe5   : > { %4769 = vmatmul.mubr.bf16.gmra.mxu0 %v5968_v21 }
  0xe6   : > { %4817 = vmatmul.mubr.bf16.gmra.mxu1 %v5977_v7  ;;  %4772 = vmatprep.mubr.bf16.mxu0 %v5992_v15 }
  0xe7   : > { %4820 = vmatprep.mubr.bf16.mxu1 %v5981_v37 }
  0xed   : > { %4773 = vmatmul.mubr.bf16.gmra.mxu0 %v6178_v1 }
  0xee   : > { %4821 = vmatmul.mubr.bf16.gmra.mxu1 %v6182_v17  ;;  %4840 = vmatprep.mubr.bf16.mxu0 %v5428_v22  ;;  %v5187_v22 = vld [vmem:[%s7400_s1 + $0x228] sm:$0xff]  }
  0xef   : > { %4888 = vmatprep.mubr.bf16.mxu1 %v5542_v30 }
  0xf4   : > { %v4554_v60 = vpop.f32.mrf.mxu0 }
  0xf5   : > { %4841 = vmatmul.mubr.bf16.vlgmr.msra.gmra.mxu0 %v5450_v35  ;;  %v4602_v18 = vpop.f32.mrf.mxu1 }
  0xf6   : > { %4921 = vmatpush3.bf16.msra.mxu0 %v5185_v13  ;;  %4889 = vmatmul.mubr.bf16.vlgmr.msra.gmra.mxu1 %v7538_v53  ;;  %v6201_v42 = vadd.f32 %v4602_v18, %v4554_v60  ;;  %v694_v14 = vpop.f32.mrf.mxu0 }
  0xf7   : > { %4844 = vmatprep.mubr.bf16.mxu0 %v5459_v40  ;;  %4922 = vmatprep.subr.bf16.mxu0 %v5186_v23  ;;  %v903_v30 = vpop.f32.mrf.mxu1  ;;  %v5188_v40 = vld [vmem:[%s7400_s1 + $0x220] sm:$0xff]  }
  0xf8   : > { %4892 = vmatprep.mubr.bf16.mxu1 %v7539_v9  ;;  %v6208_v19 = vadd.f32 %v903_v30, %v694_v14  ;;  %v4555_v35 = vpop.f32.mrf.mxu0  ;;  %v5189_v14 = vld [vmem:[%s7400_s1 + $0x218] sm:$0xff]  }
  0xf9   : > { %v4603_v39 = vpop.f32.mrf.mxu1 }
  0xfa   : > { %4923 = vmatpush3.bf16.msra.mxu0 %v5186_v23  ;;  %v6210_v13 = vadd.f32 %v4603_v39, %v4555_v35  ;;  %v697_v53 = vpop.f32.mrf.mxu0 }
  0xfb   : > { %4924 = vmatprep.subr.bf16.mxu0 %v5187_v22  ;;  %v906_v32 = vpop.f32.mrf.mxu1 }
  0xfc   : > { %v6215_v44 = vadd.f32 %v906_v32, %v697_v53  ;;  %v4558_v52 = vpop.f32.mrf.mxu0 }
  0xfd   : > { %4845 = vmatmul.mubr.bf16.gmra.mxu0 %v5493_v59  ;;  %v4606_v9 = vpop.f32.mrf.mxu1 }
  0xfe   : > { %4893 = vmatmul.mubr.bf16.gmra.mxu1 %v7540_v46  ;;  %4848 = vmatprep.mubr.bf16.mxu0 %v5504_v0  ;;  %v6220_v23 = vadd.f32 %v4606_v9, %v4558_v52  ;;  %v710_v60 = vpop.f32.mrf.mxu0 }
  0xff   : > { %4896 = vmatprep.mubr.bf16.mxu1 %v7541_v3  ;;  %4925 = vmatpush3.bf16.msra.mxu0 %v5187_v22  ;;  %v919_v18 = vpop.f32.mrf.mxu1  ;;  %v5190_v3 = vld [vmem:[%s7400_s1 + $0x210] sm:$0xff]  }
 0x100   : > { %4926 = vmatprep.subr.bf16.mxu0 %v5188_v40  ;;  %v6226_v30 = vadd.f32 %v919_v18, %v710_v60  ;;  %v4559_v59 = vpop.f32.mrf.mxu0  ;;  %v5191_v60 = vld [vmem:[%s7400_s1 + $0x208] sm:$0xff]  }
 0x101   : > { %v4607_v35 = vpop.f32.mrf.mxu1 }
 0x102   : > { %v6228_v39 = vadd.f32 %v4607_v35, %v4559_v59  ;;  %v713_v46 = vpop.f32.mrf.mxu0 }
 0x103   : > { %4927 = vmatpush3.bf16.msra.mxu0 %v5188_v40  ;;  %v922_v0 = vpop.f32.mrf.mxu1 }
 0x104   : > { %4928 = vmatprep.subr.bf16.mxu0 %v5189_v14  ;;  %v6233_v22 = vadd.f32 %v922_v0, %v713_v46  ;;  %v4562_v53 = vpop.f32.mrf.mxu0 }
 0x105   : > { %4849 = vmatmul.mubr.bf16.gmra.mxu0 %v5528_v20  ;;  %v4610_v32 = vpop.f32.mrf.mxu1 }
 0x106   : > { %4897 = vmatmul.mubr.bf16.gmra.mxu1 %v7542_v38  ;;  %4852 = vmatprep.mubr.bf16.mxu0 %v5551_v34  ;;  %v6238_v52 = vadd.f32 %v4610_v32, %v4562_v53  ;;  %v726_v9 = vpop.f32.mrf.mxu0 }
 0x107   : > { %4900 = vmatprep.mubr.bf16.mxu1 %v7543_v36  ;;  %4929 = vmatpush3.bf16.msra.mxu0 %v5189_v14  ;;  %v935_v40 = vpop.f32.mrf.mxu1  ;;  %v5193_v36 = vld [vmem:[%s7400_s1 + $0x200] sm:$0xff]  }
 0x108   : > { %4930 = vmatprep.subr.bf16.mxu0 %v5190_v3  ;;  %v6244_v18 = vadd.f32 %v935_v40, %v726_v9  ;;  %v4563_v20 = vpop.f32.mrf.mxu0 }
 0x109   : > { %v4611_v59 = vpop.f32.mrf.mxu1 }
 0x10a   : > { %v6246_v35 = vadd.f32 %v4611_v59, %v4563_v20  ;;  %v729_v38 = vpop.f32.mrf.mxu0 }
 0x10b   : > { %4931 = vmatpush3.bf16.msra.mxu0 %v5190_v3  ;;  %v938_v34 = vpop.f32.mrf.mxu1 }
 0x10c   : > { %4932 = vmatprep.subr.bf16.mxu0 %v5191_v60  ;;  %v6251_v14 = vadd.f32 %v938_v34, %v729_v38  ;;  %v4566_v46 = vpop.f32.mrf.mxu0 }
 0x10d   : > { %4853 = vmatmul.mubr.bf16.gmra.mxu0 %v5580_v5  ;;  %v4614_v0 = vpop.f32.mrf.mxu1 }
 0x10e   : > { %4901 = vmatmul.mubr.bf16.gmra.mxu1 %v5701_v43  ;;  %4856 = vmatprep.mubr.bf16.mxu0 %v5595_v24  ;;  %v6256_v53 = vadd.f32 %v4614_v0, %v4566_v46  ;;  %v742_v32 = vpop.f32.mrf.mxu0 }
 0x10f   : > { %4904 = vmatprep.mubr.bf16.mxu1 %v5752_v49  ;;  %4933 = vmatpush3.bf16.msra.mxu0 %v5191_v60  ;;  %v951_v3 = vpop.f32.mrf.mxu1 }
 0x110   : > { %4934 = vmatprep.subr.bf16.mxu0 %v5193_v36  ;;  %v6259_v9 = vadd.f32 %v951_v3, %v742_v32  ;;  %v4567_v40 = vpop.f32.mrf.mxu0 }
 0x111   : > { %v4615_v20 = vpop.f32.mrf.mxu1 }
 0x112   : > { %v6261_v59 = vadd.f32 %v4615_v20, %v4567_v40  ;;  %v745_v5 = vpop.f32.mrf.mxu0 }
 0x113   : > { %4935 = vmatpush3.bf16.msra.mxu0 %v5193_v36  ;;  %v954_v38 = vpop.f32.mrf.mxu1 }
 0x114   : > { %v6263_v43 = vadd.f32 %v954_v38, %v745_v5  ;;  %v4570_v24 = vpop.f32.mrf.mxu0 }
 0x115   : > { %4857 = vmatmul.mubr.bf16.gmra.mxu0 %v5626_v4  ;;  %v4618_v34 = vpop.f32.mrf.mxu1 }
 0x116   : > { %4905 = vmatmul.mubr.bf16.gmra.mxu1 %v5761_v10  ;;  %4860 = vmatprep.mubr.bf16.mxu0 %v5648_v25  ;;  %v6268_v49 = vadd.f32 %v4618_v34, %v4570_v24  ;;  %v6270_v60 = vpop.f32.mrf.mxu0 }
 0x117   : > { %4908 = vmatprep.mubr.bf16.mxu1 %v5764_v62  ;;  %v6273_v46 = vpop.f32.mrf.mxu1 }
 0x118   : > { %v4571_v36 = vpop.f32.mrf.mxu0 }
 0x119   : > { %v4619_v0 = vpop.f32.mrf.mxu1 }
 0x11a   : > { %v6275_v32 = vadd.f32 %v4619_v0, %v4571_v36  ;;  %v6277_v3 = vpop.f32.mrf.mxu0 }
 0x11b   : > { %v6279_v4 = vpop.f32.mrf.mxu1 }
 0x11c   : > { %v4574_v40 = vpop.f32.mrf.mxu0 }
 0x11d   : > { %4861 = vmatmul.mubr.bf16.gmra.mxu0 %v5664_v54  ;;  %v4622_v25 = vpop.f32.mrf.mxu1  ;;  %v2473_v54 = vrot.slane %v383_v47, 1 }
 0x11e   : > { %4909 = vmatmul.mubr.bf16.gmra.mxu1 %v5766_v58  ;;  %4864 = vmatprep.mubr.bf16.mxu0 %v5692_v6  ;;  %v6284_v10 = vadd.f32 %v4622_v25, %v4574_v40  ;;  %v6286_v62 = vpop.f32.mrf.mxu0  ;;  %v2474_v6 = vrot.slane %v384_v12, 1  ;;  %v2476_v58 = vrot.slane %v385_v45, 1 }
 0x11f   : > { %4912 = vmatprep.mubr.bf16.mxu1 %v5968_v21  ;;  %v6289_v20 = vpop.f32.mrf.mxu1 }
 0x120   : > { %v4575_v5 = vpop.f32.mrf.mxu0  ;;  %v2475_v47 = vsel %vm466_vm0, %v2473_v54, %v2474_v6  ;;  %v2477_v61 = vsel %vm466_vm0, %v2474_v6, %v2476_v58 }
 0x121   : > { %v4623_v38 = vpop.f32.mrf.mxu1 }
 0x122   : > { %v6291_v24 = vadd.f32 %v4623_v38, %v4575_v5  ;;  %v6293_v34 = vpop.f32.mrf.mxu0 }
 0x123   : > { %v6301_v36 = vpop.f32.mrf.mxu1 }
 0x124   : > { %v4578_v21 = vpop.f32.mrf.mxu0 }
 0x125   : > { %4865 = vmatmul.mubr.bf16.gmra.mxu0 %v5725_v16  ;;  %v4626_v0 = vpop.f32.mrf.mxu1  ;;  %v2480_v16 = vpack.c.bf16 %v2477_v61, %v2475_v47 }
 0x126   : > { %4913 = vmatmul.mubr.bf16.gmra.mxu1 %v5992_v15  ;;  %4868 = vmatprep.mubr.bf16.mxu0 %v6079_v29  ;;  %v6306_v40 = vadd.f32 %v4626_v0, %v4578_v21  ;;  %v790_v25 = vpop.f32.mrf.mxu0 }
 0x127   : > { %4916 = vmatprep.mubr.bf16.mxu1 %v6178_v1  ;;  %v999_v12 = vpop.f32.mrf.mxu1 }
 0x128   : > { %v6311_v45 = vadd.f32 %v999_v12, %v790_v25  ;;  %v4579_v5 = vpop.f32.mrf.mxu0 }
 0x129   : > { %v4627_v38 = vpop.f32.mrf.mxu1 }
 0x12a   : > { %v6313_v11 = vadd.f32 %v4627_v38, %v4579_v5  ;;  %v793_v15 = vpop.f32.mrf.mxu0 }
 0x12b   : > { %v1002_v8 = vpop.f32.mrf.mxu1 }
 0x12c   : > { %v6315_v29 = vadd.f32 %v1002_v8, %v793_v15 }
 0x12d   : > { %v4582_v21 = vpop.f32.mrf.mxu0  ;;  %4869 = vmatmul.mubr.bf16.gmra.mxu0 %v6158_v55  ;;  %v4630_v1 = vpop.f32.mrf.mxu1 }
 0x12e   : > { %4917 = vmatmul.mubr.bf16.gmra.mxu1 %v2480_v16  ;;  %4936 = vmatprep.mubr.bf16.mxu0 %v5850_v26  ;;  %v6319_v54 = vadd.f32 %v4630_v1, %v4582_v21 }
 0x12f   : > { %v806_v6 = vpop.f32.mrf.mxu0  ;;  %v1015_v58 = vpop.f32.mrf.mxu1 }
 0x130   : > { %v6321_v0 = vadd.f32 %v1015_v58, %v806_v6 }
 0x131   : > { %v4583_v25 = vpop.f32.mrf.mxu0  ;;  %v4631_v47 = vpop.f32.mrf.mxu1 }
 0x132   : > { %v6323_v61 = vadd.f32 %v4631_v47, %v4583_v25 }
 0x133   : > { %v809_v12 = vpop.f32.mrf.mxu0  ;;  %v1018_v8 = vpop.f32.mrf.mxu1 }
 0x134   : > { %v6325_v5 = vadd.f32 %v1018_v8, %v809_v12 }
 0x135   : > { %v4650_v38 = vpop.f32.mrf.mxu0  ;;  %4937 = vmatmul.mubr.bf16.vlgmr.msra.gmra.mxu0 %v5856_v50  ;;  %v4698_v26 = vpop.f32.mrf.mxu1 }
 0x136   : > { %v1387_v55 = vadd.f32 %v4650_v38, %v6201_v42  ;;  %4940 = vmatprep.mubr.bf16.mxu0 %v5863_v31 }
 0x137   : > { %v1258_v16 = vpop.f32.mrf.mxu0  ;;  %v1517_v1 = vpop.f32.mrf.mxu1 }
 0x138   : > { %v1385_v15 = vadd.f32 %v1258_v16, %v6208_v19  ;;  %v6331_v21 = vadd.f32 %v4698_v26, %v1387_v55 }
 0x139   : > { %v4651_v6 = vpop.f32.mrf.mxu0  ;;  %v4699_v47 = vpop.f32.mrf.mxu1 }
 0x13a   : > { %v1388_v58 = vadd.f32 %v4651_v6, %v6210_v13  ;;  %v6334_v25 = vadd.f32 %v1517_v1, %v1385_v15 }
 0x13b   : > { %v1261_v12 = vpop.f32.mrf.mxu0  ;;  %v1520_v42 = vpop.f32.mrf.mxu1 }
 0x13c   : > { %v1386_v50 = vadd.f32 %v1261_v12, %v6215_v44  ;;  %v6337_v8 = vadd.f32 %v4699_v47, %v1388_v58 }
 0x13d   : > { %v4654_v38 = vpop.f32.mrf.mxu0  ;;  %4941 = vmatmul.mubr.bf16.gmra.mxu0 %v5881_v57 }
 0x13e   : > { %v1391_v31 = vadd.f32 %v4654_v38, %v6220_v23  ;;  %v6341_v19 = vadd.f32 %v1520_v42, %v1386_v50  ;;  %v4702_v55 = vpop.f32.mrf.mxu1  ;;  %4944 = vmatprep.mubr.bf16.mxu0 %v5895_v63 }
 0x13f   : > { %v1274_v13 = vpop.f32.mrf.mxu0 }
 0x140   : > { %v1389_v26 = vadd.f32 %v1274_v13, %v6226_v30  ;;  %v6345_v16 = vadd.f32 %v4702_v55, %v1391_v31  ;;  %v1533_v15 = vpop.f32.mrf.mxu1 }
 0x141   : > { %v4655_v44 = vpop.f32.mrf.mxu0 }
 0x142   : > { %v1392_v1 = vadd.f32 %v4655_v44, %v6228_v39  ;;  %v6348_v6 = vadd.f32 %v1533_v15, %v1389_v26  ;;  %v4703_v58 = vpop.f32.mrf.mxu1 }
 0x143   : > { %v1277_v57 = vpop.f32.mrf.mxu0 }
 0x144   : > { %v1390_v23 = vadd.f32 %v1277_v57, %v6233_v22  ;;  %v6351_v47 = vadd.f32 %v4703_v58, %v1392_v1  ;;  %v1536_v12 = vpop.f32.mrf.mxu1 }
 0x145   : > { %v4658_v50 = vpop.f32.mrf.mxu0  ;;  %4945 = vmatmul.mubr.bf16.gmra.mxu0 %v5902_v27 }
 0x146   : > { %v1395_v63 = vadd.f32 %v4658_v50, %v6238_v52  ;;  %v6355_v30 = vadd.f32 %v1536_v12, %v1390_v23  ;;  %v4706_v42 = vpop.f32.mrf.mxu1  ;;  %4948 = vmatprep.mubr.bf16.mxu0 %v5908_v48 }
 0x147   : > { %v1290_v39 = vpop.f32.mrf.mxu0 }
 0x148   : > { %v1393_v38 = vadd.f32 %v1290_v39, %v6244_v18  ;;  %v6359_v31 = vadd.f32 %v4706_v42, %v1395_v63  ;;  %v1549_v55 = vpop.f32.mrf.mxu1 }
 0x149   : > { %v4659_v22 = vpop.f32.mrf.mxu0 }
 0x14a   : > { %v1396_v13 = vadd.f32 %v4659_v22, %v6246_v35  ;;  %v6362_v26 = vadd.f32 %v1549_v55, %v1393_v38  ;;  %v4707_v15 = vpop.f32.mrf.mxu1 }
 0x14b   : > { %v1293_v27 = vpop.f32.mrf.mxu0 }
 0x14c   : > { %v1394_v52 = vadd.f32 %v1293_v27, %v6251_v14  ;;  %v6365_v44 = vadd.f32 %v4707_v15, %v1396_v13  ;;  %v1552_v1 = vpop.f32.mrf.mxu1 }
 0x14d   : > { %v4662_v58 = vpop.f32.mrf.mxu0  ;;  %4949 = vmatmul.mubr.bf16.gmra.mxu0 %v5922_v28 }
 0x14e   : > { %v1399_v48 = vadd.f32 %v4662_v58, %v6256_v53  ;;  %v6369_v18 = vadd.f32 %v1552_v1, %v1394_v52  ;;  %v4710_v57 = vpop.f32.mrf.mxu1  ;;  %4952 = vmatprep.mubr.bf16.mxu0 %v5938_v2  ;;  %v968_v2 = vadd.f32 %v6273_v46, %v6270_v60  ;;  %v971_v58 = vadd.f32 %v6279_v4, %v6277_v3 }
 0x14f   : > { %v1306_v35 = vpop.f32.mrf.mxu0 }
 0x150   : > { %v1397_v23 = vadd.f32 %v1306_v35, %v6259_v9  ;;  %v6373_v12 = vadd.f32 %v4710_v57, %v1399_v48  ;;  %v1565_v50 = vpop.f32.mrf.mxu1 }
 0x151   : > { %v4663_v14 = vpop.f32.mrf.mxu0 }
 0x152   : > { %v1400_v63 = vadd.f32 %v4663_v14, %v6261_v59  ;;  %v6376_v42 = vadd.f32 %v1565_v50, %v1397_v23  ;;  %v4711_v39 = vpop.f32.mrf.mxu1  ;;  %v984_v23 = vadd.f32 %v6289_v20, %v6286_v62 }
 0x153   : > { %v1309_v28 = vpop.f32.mrf.mxu0 }
 0x154   : > { %v1398_v53 = vadd.f32 %v1309_v28, %v6263_v43  ;;  %v6379_v38 = vadd.f32 %v4711_v39, %v1400_v63  ;;  %v1568_v55 = vpop.f32.mrf.mxu1 }
 0x155   : > { %v4666_v22 = vpop.f32.mrf.mxu0  ;;  %4953 = vmatmul.mubr.bf16.gmra.mxu0 %v5946_v41 }
 0x156   : > { %v1403_v9 = vadd.f32 %v4666_v22, %v6268_v49  ;;  %v6385_v13 = vadd.f32 %v1568_v55, %v1398_v53  ;;  %v4714_v59 = vpop.f32.mrf.mxu1  ;;  %4956 = vmatprep.mubr.bf16.mxu0 %v5952_v56  ;;  %v987_v53 = vadd.f32 %v6301_v36, %v6293_v34 }
 0x157   : > { %v1322_v15 = vpop.f32.mrf.mxu0 }
 0x158   : > { %v1401_v27 = vadd.f32 %v1322_v15, %v968_v2  ;;  %v6388_v52 = vadd.f32 %v4714_v59, %v1403_v9  ;;  %v1581_v43 = vpop.f32.mrf.mxu1 }
 0x159   : > { %v4667_v1 = vpop.f32.mrf.mxu0 }
 0x15a   : > { %v1404_v41 = vadd.f32 %v4667_v1, %v6275_v32  ;;  %v6393_v48 = vadd.f32 %v1581_v43, %v1401_v27  ;;  %v4715_v60 = vpop.f32.mrf.mxu1 }
 0x15b   : > { %v1325_v49 = vpop.f32.mrf.mxu0 }
 0x15c   : > { %v1402_v46 = vadd.f32 %v1325_v49, %v971_v58  ;;  %v6395_v57 = vadd.f32 %v4715_v60, %v1404_v41  ;;  %v1584_v35 = vpop.f32.mrf.mxu1 }
 0x15d   : > { %v4670_v56 = vpop.f32.mrf.mxu0  ;;  %4957 = vmatmul.mubr.bf16.gmra.mxu0 %v5970_v33 }
 0x15e   : > { %v1407_v50 = vadd.f32 %v4670_v56, %v6284_v10  ;;  %v6401_v14 = vadd.f32 %v1584_v35, %v1402_v46  ;;  %v4718_v3 = vpop.f32.mrf.mxu1  ;;  %4960 = vmatprep.mubr.bf16.mxu0 %v5977_v7 }
 0x15f   : > { %v1338_v32 = vpop.f32.mrf.mxu0 }
 0x160   : > { %v1405_v4 = vadd.f32 %v1338_v32, %v984_v23  ;;  %v6404_v63 = vadd.f32 %v4718_v3, %v1407_v50  ;;  %v1597_v39 = vpop.f32.mrf.mxu1 }
 0x161   : > { %v4671_v28 = vpop.f32.mrf.mxu0 }
 0x162   : > { %v1408_v33 = vadd.f32 %v4671_v28, %v6291_v24  ;;  %v6409_v55 = vadd.f32 %v1597_v39, %v1405_v4  ;;  %v4719_v62 = vpop.f32.mrf.mxu1 }
 0x163   : > { %v1341_v10 = vpop.f32.mrf.mxu0 }
 0x164   : > { %v1406_v20 = vadd.f32 %v1341_v10, %v987_v53  ;;  %v6411_v22 = vadd.f32 %v4719_v62, %v1408_v33  ;;  %v1600_v2 = vpop.f32.mrf.mxu1 }
 0x165   : > { %v4674_v7 = vpop.f32.mrf.mxu0  ;;  %4961 = vmatmul.mubr.bf16.gmra.mxu0 %v5981_v37 }
 0x166   : > { %v1411_v9 = vadd.f32 %v4674_v7, %v6306_v40  ;;  %v6415_v59 = vadd.f32 %v1600_v2, %v1406_v20  ;;  %v4722_v15 = vpop.f32.mrf.mxu1  ;;  %4964 = vmatprep.mubr.bf16.mxu0 %v6182_v17  ;;  %v7545_v17 = vld [vmem:[#allocation5_spill] sm:$0xff] }
 0x167   : > { %v1354_v34 = vpop.f32.mrf.mxu0  ;;  %v7546_v35 = vpack.c.bf16 %v6188_v51, %v7545_v17 }
 0x168   : > { %v1409_v24 = vadd.f32 %v1354_v34, %v6311_v45  ;;  %v6419_v36 = vadd.f32 %v4722_v15, %v1411_v9  ;;  %v1613_v27 = vpop.f32.mrf.mxu1 }
 0x169   : > { %v4675_v43 = vpop.f32.mrf.mxu0 }
 0x16a   : > { %v1412_v1 = vadd.f32 %v4675_v43, %v6313_v11  ;;  %v6422_v58 = vadd.f32 %v1613_v27, %v1409_v24  ;;  %v4723_v41 = vpop.f32.mrf.mxu1 }
 0x16b   : > { %v1357_v37 = vpop.f32.mrf.mxu0 }
 0x16c   : > { %v1410_v40 = vadd.f32 %v1357_v37, %v6315_v29  ;;  %v6425_v60 = vadd.f32 %v4723_v41, %v1412_v1  ;;  %v1616_v49 = vpop.f32.mrf.mxu1 }
 0x16d   : > { %v4678_v46 = vpop.f32.mrf.mxu0  ;;  %4965 = vmatmul.mubr.bf16.gmra.mxu0 %v7546_v35 }
 0x16e   : > { %v1415_v45 = vadd.f32 %v4678_v46, %v6319_v54  ;;  %v6431_v56 = vadd.f32 %v1616_v49, %v1410_v40  ;;  %v4726_v23 = vpop.f32.mrf.mxu1 }
 0x16f   : > { %v1370_v11 = vpop.f32.mrf.mxu0 }
 0x170   : > { %v1413_v50 = vadd.f32 %v1370_v11, %v6321_v0  ;;  %v6434_v3 = vadd.f32 %v4726_v23, %v1415_v45  ;;  %v1629_v32 = vpop.f32.mrf.mxu1 }
 0x171   : > { %v4679_v29 = vpop.f32.mrf.mxu0 }
 0x172   : > { %v1416_v4 = vadd.f32 %v4679_v29, %v6323_v61  ;;  %v6437_v39 = vadd.f32 %v1629_v32, %v1413_v50  ;;  %v4727_v28 = vpop.f32.mrf.mxu1 }
 0x173   : > { %v1373_v53 = vpop.f32.mrf.mxu0 }
 0x174   : > { %v1414_v51 = vadd.f32 %v1373_v53, %v6325_v5  ;;  %v6440_v33 = vadd.f32 %v4727_v28, %v1416_v4  ;;  %v1632_v54 = vpop.f32.mrf.mxu1 }
 0x175   : > { %v4746_v62 = vpop.f32.mrf.mxu0 }
 0x176   : > { %v6442_v10 = vadd.f32 %v1632_v54, %v1414_v51  ;;  %v1915_v0 = vadd.f32 %v4746_v62, %v6331_v21  ;;  %v4794_v20 = vpop.f32.mrf.mxu1 }
 0x177   : > { %v1786_v2 = vpop.f32.mrf.mxu0 }
 0x178   : > { %v1913_v7 = vadd.f32 %v1786_v2, %v6334_v25  ;;  %v6446_v9 = vadd.f32 %v4794_v20, %v1915_v0  ;;  %v2052_v61 = vpop.f32.mrf.mxu1 }
 0x179   : > { %v4747_v15 = vpop.f32.mrf.mxu0 }
 0x17a   : > { %v1916_v34 = vadd.f32 %v4747_v15, %v6337_v8  ;;  %v6449_v24 = vadd.f32 %v2052_v61, %v1913_v7  ;;  %v4795_v5 = vpop.f32.mrf.mxu1 }
 0x17b   : > { %v1789_v27 = vpop.f32.mrf.mxu0 }
 0x17c   : > { %v6452_v43 = vadd.f32 %v1789_v27, %v6341_v19  ;;  %v6454_v1 = vadd.f32 %v4795_v5, %v1916_v34  ;;  %v6456_v21 = vpop.f32.mrf.mxu1  ;;  %v7464_v5 = vmov 0.0  }
 0x17d   : > { %v4750_v41 = vpop.f32.mrf.mxu0  ;;  %4968 = vmatprep.subr.mxu1 %v7464_v5 }
 0x17e   : > { %v1919_v25 = vadd.f32 %v4750_v41, %v6345_v16  ;;  %v4798_v37 = vpop.f32.mrf.mxu1 }
 0x17f   : > { %v1802_v40 = vpop.f32.mrf.mxu0 }
 0x180   : > { %v6460_v49 = vadd.f32 %v1802_v40, %v6348_v6  ;;  %v6462_v8 = vadd.f32 %v4798_v37, %v1919_v25  ;;  %v6464_v46 = vpop.f32.mrf.mxu1 }
 0x181   : > { %v4751_v17 = vpop.f32.mrf.mxu0 }
 0x182   : > { %v1920_v19 = vadd.f32 %v4751_v17, %v6351_v47  ;;  %v4799_v35 = vpop.f32.mrf.mxu1 }
 0x183   : > { %v1805_v45 = vpop.f32.mrf.mxu0 }
 0x184   : > { %v6468_v23 = vadd.f32 %v1805_v45, %v6355_v30  ;;  %v6470_v11 = vadd.f32 %v4799_v35, %v1920_v19  ;;  %v6472_v16 = vpop.f32.mrf.mxu1 }
 0x185   : > { %v4754_v50 = vpop.f32.mrf.mxu0 }
 0x186   : > { %v1923_v6 = vadd.f32 %v4754_v50, %v6359_v31  ;;  %v4802_v32 = vpop.f32.mrf.mxu1  ;;  %v6525_v50 = vld [vmem:[%s7404_s5 + $0x70] sm:$0xff] }
 0x187   : > { %v1818_v29 = vpop.f32.mrf.mxu0  ;;  %7548 = vst [vmem:[#allocation7_spill] sm:$0xff] %v6525_v50 }
 0x188   : > { %v6476_v4 = vadd.f32 %v1818_v29, %v6362_v26  ;;  %v6478_v28 = vadd.f32 %v4802_v32, %v1923_v6  ;;  %v6480_v47 = vpop.f32.mrf.mxu1 }
 0x189   : > { %v4755_v53 = vpop.f32.mrf.mxu0 }
 0x18a   : > { %v1924_v30 = vadd.f32 %v4755_v53, %v6365_v44  ;;  %v4803_v51 = vpop.f32.mrf.mxu1 }
 0x18b   : > { %v1821_v54 = vpop.f32.mrf.mxu0 }
 0x18c   : > { %v6484_v62 = vadd.f32 %v1821_v54, %v6369_v18  ;;  %v6486_v0 = vadd.f32 %v4803_v51, %v1924_v30  ;;  %v6488_v31 = vpop.f32.mrf.mxu1  ;;  %v6540_v54 = vld [vmem:[%s7404_s5 + $0x68] sm:$0xff] }
 0x18d   : > { %v4758_v20 = vpop.f32.mrf.mxu0  ;;  %7549 = vst [vmem:[#allocation8_spill] sm:$0xff] %v6540_v54 }
 0x18e   : > { %v1927_v26 = vadd.f32 %v4758_v20, %v6373_v12  ;;  %v4806_v2 = vpop.f32.mrf.mxu1 }
 0x18f   : > { %v1834_v7 = vpop.f32.mrf.mxu0 }
 0x190   : > { %v6492_v61 = vadd.f32 %v1834_v7, %v6376_v42  ;;  %v6494_v15 = vadd.f32 %v4806_v2, %v1927_v26  ;;  %v6496_v44 = vpop.f32.mrf.mxu1  ;;  %v6510_v42 = vld [vmem:[%s7404_s5 + $0x78] sm:$0xff] }
 0x191   : > { %v4759_v34 = vpop.f32.mrf.mxu0  ;;  %7547 = vst [vmem:[#allocation6_spill] sm:$0xff] %v6510_v42  ;;  %4969 = vmatpush3.msra.mxu1 %v6510_v42 }
 0x192   : > { %v1928_v18 = vadd.f32 %v4759_v34, %v6379_v38  ;;  %v4807_v27 = vpop.f32.mrf.mxu1  ;;  %4970 = vmatprep.subr.mxu1 %v7464_v5 }
 0x193   : > { %v1837_v41 = vpop.f32.mrf.mxu0  ;;  %4971 = vmatpush3.msra.mxu1 %v6525_v50 }
 0x194   : > { %v6501_v25 = vadd.f32 %v1837_v41, %v6385_v13  ;;  %v6503_v12 = vadd.f32 %v4807_v27, %v1928_v18  ;;  %v6505_v37 = vpop.f32.mrf.mxu1  ;;  %4972 = vmatprep.subr.mxu1 %v7464_v5  ;;  %v6555_v18 = vld [vmem:[%s7404_s5 + $0x60] sm:$0xff] }
 0x195   : > { %v4762_v40 = vpop.f32.mrf.mxu0  ;;  %4973 = vmatpush3.msra.mxu1 %v6540_v54  ;;  %7552 = vst [vmem:[#allocation5_spill] sm:$0xff] %v6555_v18 }
 0x196   : > { %v1931_v17 = vadd.f32 %v4762_v40, %v6388_v52  ;;  %v4810_v38 = vpop.f32.mrf.mxu1  ;;  %4974 = vmatprep.subr.mxu1 %v7464_v5 }
 0x197   : > { %v1850_v19 = vpop.f32.mrf.mxu0  ;;  %4975 = vmatpush3.msra.mxu1 %v6555_v18  ;;  %v6706_v18 = vld [vmem:[%s7404_s5 + $0x8] sm:$0xff] }
 0x198   : > { %v6516_v13 = vadd.f32 %v1850_v19, %v6393_v48  ;;  %v6518_v35 = vadd.f32 %v4810_v38, %v1931_v17  ;;  %v6520_v45 = vpop.f32.mrf.mxu1  ;;  %4976 = vmatprep.subr.mxu1 %v7464_v5  ;;  %v6570_v19 = vld [vmem:[%s7404_s5 + $0x58] sm:$0xff]  ;;  %7574 = vst [vmem:[#allocation31_spill] sm:$0xff] %v6706_v18 }
 0x199   : > { %v4763_v6 = vpop.f32.mrf.mxu0  ;;  %7555 = vst [vmem:[#allocation13_spill] sm:$0xff] %v6570_v19  ;;  %4977 = vmatpush3.msra.mxu1 %v6570_v19 }
 0x19a   : > { %v1932_v52 = vadd.f32 %v4763_v6, %v6395_v57  ;;  %v4811_v32 = vpop.f32.mrf.mxu1  ;;  %4978 = vmatprep.subr.mxu1 %v7464_v5 }
 0x19b   : > { %v1853_v29 = vpop.f32.mrf.mxu0 }
 0x19c   : > { %v6531_v48 = vadd.f32 %v1853_v29, %v6401_v14  ;;  %v6533_v53 = vadd.f32 %v4811_v32, %v1932_v52  ;;  %v6535_v30 = vpop.f32.mrf.mxu1 }
 0x19d   : > { %v4766_v51 = vpop.f32.mrf.mxu0 }
 0x19e   : > { %v1935_v20 = vadd.f32 %v4766_v51, %v6404_v63  ;;  %v4814_v57 = vpop.f32.mrf.mxu1 }
 0x19f   : > { %v1866_v26 = vpop.f32.mrf.mxu0 }
 0x1a0   : > { %v6546_v14 = vadd.f32 %v1866_v26, %v6409_v55  ;;  %v6548_v2 = vadd.f32 %v4814_v57, %v1935_v20  ;;  %v6550_v7 = vpop.f32.mrf.mxu1  ;;  %v6585_v20 = vld [vmem:[%s7404_s5 + $0x50] sm:$0xff] }
 0x1a1   : > { %7551 = vst [vmem:[#allocation10_spill] sm:$0xff] %v6550_v7  ;;  %v4767_v34 = vpop.f32.mrf.mxu0  ;;  %7558 = vst [vmem:[#allocation16_spill] sm:$0xff] %v6585_v20  ;;  %4979 = vmatpush3.msra.mxu1 %v6585_v20 }
 0x1a2   : > { %7550 = vst [vmem:[#allocation9_spill] sm:$0xff] %v6546_v14  ;;  %v1936_v63 = vadd.f32 %v4767_v34, %v6411_v22  ;;  %v4815_v27 = vpop.f32.mrf.mxu1  ;;  %4980 = vmatprep.subr.mxu1 %v7464_v5 }
 0x1a3   : > { %v1869_v41 = vpop.f32.mrf.mxu0 }
 0x1a4   : > { %v6561_v55 = vadd.f32 %v1869_v41, %v6415_v59  ;;  %v6563_v40 = vadd.f32 %v4815_v27, %v1936_v63  ;;  %v6565_v17 = vpop.f32.mrf.mxu1  ;;  %v6600_v41 = vld [vmem:[%s7404_s5 + $0x48] sm:$0xff] }
 0x1a5   : > { %7554 = vst [vmem:[#allocation12_spill] sm:$0xff] %v6565_v17  ;;  %v4770_v38 = vpop.f32.mrf.mxu0  ;;  %7561 = vst [vmem:[#allocation19_spill] sm:$0xff] %v6600_v41  ;;  %4981 = vmatpush3.msra.mxu1 %v6600_v41  ;;  %v6664_v41 = vld [vmem:[%s7404_s5 + $0x28] sm:$0xff] }
 0x1a6   : > { %7553 = vst [vmem:[#allocation11_spill] sm:$0xff] %v6561_v55  ;;  %v1939_v22 = vadd.f32 %v4770_v38, %v6419_v36  ;;  %v4818_v6 = vpop.f32.mrf.mxu1  ;;  %4982 = vmatprep.subr.mxu1 %v7464_v5  ;;  %7570 = vst [vmem:[#allocation27_spill] sm:$0xff] %v6664_v41 }
 0x1a7   : > { %v1882_v52 = vpop.f32.mrf.mxu0 }
 0x1a8   : > { %v6576_v59 = vadd.f32 %v1882_v52, %v6422_v58  ;;  %v6578_v32 = vadd.f32 %v4818_v6, %v1939_v22  ;;  %v6580_v29 = vpop.f32.mrf.mxu1 }
 0x1a9   : > { %7557 = vst [vmem:[#allocation15_spill] sm:$0xff] %v6580_v29  ;;  %v4771_v51 = vpop.f32.mrf.mxu0 }
 0x1aa   : > { %7556 = vst [vmem:[#allocation14_spill] sm:$0xff] %v6576_v59  ;;  %v1940_v36 = vadd.f32 %v4771_v51, %v6425_v60  ;;  %v4819_v57 = vpop.f32.mrf.mxu1 }
 0x1ab   : > { %v1885_v26 = vpop.f32.mrf.mxu0 }
 0x1ac   : > { %v6591_v58 = vadd.f32 %v1885_v26, %v6431_v56  ;;  %v6593_v34 = vadd.f32 %v4819_v57, %v1940_v36  ;;  %v6595_v63 = vpop.f32.mrf.mxu1  ;;  %v6615_v36 = vld [vmem:[%s7404_s5 + $0x40] sm:$0xff] }
 0x1ad   : > { %7560 = vst [vmem:[#allocation18_spill] sm:$0xff] %v6595_v63  ;;  %v4774_v27 = vpop.f32.mrf.mxu0  ;;  %7564 = vst [vmem:[#allocation22_spill] sm:$0xff] %v6615_v36  ;;  %4983 = vmatpush3.msra.mxu1 %v6615_v36  ;;  %v6647_v36 = vld [vmem:[%s7404_s5 + $0x30] sm:$0xff] }
 0x1ae   : > { %7559 = vst [vmem:[#allocation17_spill] sm:$0xff] %v6591_v58  ;;  %v1943_v60 = vadd.f32 %v4774_v27, %v6434_v3  ;;  %v4822_v38 = vpop.f32.mrf.mxu1  ;;  %4984 = vmatprep.subr.mxu1 %v7464_v5  ;;  %7569 = vst [vmem:[#allocation26_spill] sm:$0xff] %v6647_v36 }
 0x1af   : > { %v1898_v22 = vpop.f32.mrf.mxu0 }
 0x1b0   : > { %v6606_v56 = vadd.f32 %v1898_v22, %v6437_v39  ;;  %v6608_v6 = vadd.f32 %v4822_v38, %v1943_v60  ;;  %v6610_v52 = vpop.f32.mrf.mxu1  ;;  %v6630_v22 = vld [vmem:[%s7404_s5 + $0x38] sm:$0xff] }
 0x1b1   : > { %7563 = vst [vmem:[#allocation21_spill] sm:$0xff] %v6610_v52  ;;  %v4775_v51 = vpop.f32.mrf.mxu0  ;;  %7567 = vst [vmem:[#allocation25_spill] sm:$0xff] %v6630_v22  ;;  %4985 = vmatpush3.msra.mxu1 %v6630_v22 }
 0x1b2   : > { %7562 = vst [vmem:[#allocation20_spill] sm:$0xff] %v6606_v56  ;;  %v1944_v3 = vadd.f32 %v4775_v51, %v6440_v33  ;;  %v4823_v57 = vpop.f32.mrf.mxu1 }
 0x1b3   : > { %v1901_v26 = vpop.f32.mrf.mxu0 }
 0x1b4   : > { %v6621_v39 = vadd.f32 %v1901_v26, %v6442_v10  ;;  %v6623_v27 = vadd.f32 %v4823_v57, %v1944_v3  ;;  %v6625_v60 = vpop.f32.mrf.mxu1  ;;  %v7568_v10 = vmov 0.0  }
 0x1b5   : > { %7566 = vst [vmem:[#allocation24_spill] sm:$0xff] %v6625_v60  ;;  %v4842_v38 = vpop.f32.mrf.mxu0  ;;  %4986 = vmatprep.subr.mxu1 %v7568_v10  ;;  %5000 = vmatprep.mubr.msk.f32.mxu1 %vm5277_vm2, %v7568_v10 }
 0x1b6   : > { %7565 = vst [vmem:[#allocation23_spill] sm:$0xff] %v6621_v39  ;;  %v6633_v33 = vadd.f32 %v4842_v38, %v6446_v9  ;;  %v6635_v51 = vpop.f32.mrf.mxu1  ;;  %4987 = vmatpush3.msra.mxu1 %v6647_v36  ;;  %v6685_v36 = vld [vmem:[%s7404_s5 + $0x18] sm:$0xff] }
 0x1b7   : > { %v2311_v5 = vpop.f32.mrf.mxu0  ;;  %4988 = vmatprep.subr.mxu1 %v7568_v10  ;;  %7572 = vst [vmem:[#allocation29_spill] sm:$0xff] %v6685_v36 }
 0x1b8   : > { %v6640_v3 = vadd.f32 %v2311_v5, %v6449_v24  ;;  %v6642_v57 = vpop.f32.mrf.mxu1  ;;  %4989 = vmatpush3.msra.mxu1 %v6664_v41 }
 0x1b9   : > { %v4843_v26 = vpop.f32.mrf.mxu0  ;;  %4990 = vmatprep.subr.mxu1 %v7568_v10 }
 0x1ba   : > { %v6650_v9 = vadd.f32 %v4843_v26, %v6454_v1  ;;  %v6655_v22 = vpop.f32.mrf.mxu1  ;;  %v6675_v26 = vld [vmem:[%s7404_s5 + $0x20] sm:$0xff] }
 0x1bb   : > { %v6653_v38 = vpop.f32.mrf.mxu0  ;;  %7571 = vst [vmem:[#allocation28_spill] sm:$0xff] %v6675_v26  ;;  %4991 = vmatpush3.msra.mxu1 %v6675_v26 }
 0x1bc   : > { %v6666_v20 = vpop.f32.mrf.mxu1  ;;  %4992 = vmatprep.subr.mxu1 %v7568_v10 }
 0x1bd   : > { %v4846_v24 = vpop.f32.mrf.mxu0  ;;  %4993 = vmatpush3.msra.mxu1 %v6685_v36 }
 0x1be   : > { %v6659_v5 = vadd.f32 %v4846_v24, %v6462_v8  ;;  %v6687_v41 = vpop.f32.mrf.mxu1  ;;  %4994 = vmatprep.subr.mxu1 %v7568_v10 }
 0x1bf   : > { %v6668_v1 = vpop.f32.mrf.mxu0 }
 0x1c0   : > { %v6708_v36 = vpop.f32.mrf.mxu1 }
 0x1c1   : > { %v4847_v8 = vpop.f32.mrf.mxu0 }
 0x1c2   : > { %v6679_v24 = vadd.f32 %v4847_v8, %v6470_v11  ;;  %v6696_v11 = vld [vmem:[%s7404_s5 + $0x10] sm:$0xff] }
 0x1c3   : > { %v6689_v19 = vpop.f32.mrf.mxu0  ;;  %7573 = vst [vmem:[#allocation30_spill] sm:$0xff] %v6696_v11  ;;  %4995 = vmatpush3.msra.mxu1 %v6696_v11 }
 0x1c4   : > { %4996 = vmatprep.subr.mxu1 %v7568_v10 }
 0x1c5   : > { %v4850_v8 = vpop.f32.mrf.mxu0  ;;  %4997 = vmatpush3.msra.mxu1 %v6706_v18  ;;  %v6726_v18 = vpop.f32.mrf.mxu1 }
 0x1c6   : > { %v6700_v26 = vadd.f32 %v4850_v8, %v6478_v28  ;;  %4998 = vmatprep.subr.mxu1 %v7568_v10  ;;  %v6717_v28 = vld [vmem:[%s7404_s5] sm:$0xff] }
 0x1c7   : > { %v6710_v54 = vpop.f32.mrf.mxu0  ;;  %7575 = vst [vmem:[#allocation32_spill] sm:$0xff] %v6717_v28  ;;  %4999 = vmatpush3.msra.mxu1 %v6717_v28  ;;  %v6733_v39 = vpop.f32.mrf.mxu1 }
 0x1c8   : > { %5003 = vmatprep.subr.mxu1 %v7568_v10 }
 0x1c9   : > { %v4851_v8 = vpop.f32.mrf.mxu0  ;;  %v6740_v52 = vpop.f32.mrf.mxu1 }
 0x1ca   : > { %v6721_v11 = vadd.f32 %v4851_v8, %v6486_v0 }
 0x1cb   : > { %v6728_v50 = vpop.f32.mrf.mxu0  ;;  %v6747_v58 = vpop.f32.mrf.mxu1 }
 0x1cd   : > { %v4854_v42 = vpop.f32.mrf.mxu0  ;;  %v6754_v59 = vpop.f32.mrf.mxu1 }
 0x1ce   : > { %v6731_v60 = vadd.f32 %v4854_v42, %v6494_v15 }
 0x1cf   : > { %v6735_v28 = vpop.f32.mrf.mxu0  ;;  %v6761_v55 = vpop.f32.mrf.mxu1 }
 0x1d1   : > { %v4855_v0 = vpop.f32.mrf.mxu0  ;;  %v6768_v7 = vpop.f32.mrf.mxu1 }
 0x1d2   : > { %v6738_v8 = vadd.f32 %v4855_v0, %v6503_v12 }
 0x1d3   : > { %v6742_v56 = vpop.f32.mrf.mxu0  ;;  %v6775_v14 = vpop.f32.mrf.mxu1 }
 0x1d5   : > { %v4858_v10 = vpop.f32.mrf.mxu0 }
 0x1d6   : > { %v6745_v63 = vadd.f32 %v4858_v10, %v6518_v35 }
 0x1d7   : > { %v6749_v15 = vpop.f32.mrf.mxu0 }
 0x1d8   : > { %7576 = vst [vmem:[#allocation33_spill] sm:$0xff] %v6745_v63 }
 0x1d9   : > { %v4859_v42 = vpop.f32.mrf.mxu0 }
 0x1da   : > { %v6752_v29 = vadd.f32 %v4859_v42, %v6533_v53 }
 0x1db   : > { %v6756_v12 = vpop.f32.mrf.mxu0 }
 0x1dc   : > { %7577 = vst [vmem:[#allocation34_spill] sm:$0xff] %v6752_v29 }
 0x1dd   : > { %v4862_v0 = vpop.f32.mrf.mxu0 }
 0x1de   : > { %v6759_v17 = vadd.f32 %v4862_v0, %v6548_v2 }
 0x1df   : > { %v6763_v35 = vpop.f32.mrf.mxu0 }
 0x1e0   : > { %7578 = vst [vmem:[#allocation35_spill] sm:$0xff] %v6759_v17  ;;  %7579 = vst [vmem:[#allocation36_spill] sm:$0xff] %v6763_v35  ;;  %v6782_v35 = vpop.f32.mrf.mxu1 }
 0x1e1   : > { %v4863_v10 = vpop.f32.mrf.mxu0 }
 0x1e2   : > { %v6766_v63 = vadd.f32 %v4863_v10, %v6563_v40 }
 0x1e3   : > { %v6770_v53 = vpop.f32.mrf.mxu0 }
 0x1e4   : > { %7580 = vst [vmem:[#allocation37_spill] sm:$0xff] %v6766_v63  ;;  %7581 = vst [vmem:[#allocation38_spill] sm:$0xff] %v6770_v53  ;;  %v6789_v53 = vpop.f32.mrf.mxu1 }
 0x1e5   : > { %v4866_v42 = vpop.f32.mrf.mxu0 }
 0x1e6   : > { %v6773_v29 = vadd.f32 %v4866_v42, %v6578_v32 }
 0x1e7   : > { %v6777_v2 = vpop.f32.mrf.mxu0 }
 0x1e8   : > { %7582 = vst [vmem:[#allocation39_spill] sm:$0xff] %v6773_v29  ;;  %7583 = vst [vmem:[#allocation40_spill] sm:$0xff] %v6777_v2  ;;  %v6796_v2 = vpop.f32.mrf.mxu1 }
 0x1e9   : > { %v4867_v0 = vpop.f32.mrf.mxu0 }
 0x1ea   : > { %v6780_v17 = vadd.f32 %v4867_v0, %v6593_v34  ;;  %v2180_v0 = vadd.f32 %v6456_v21, %v6452_v43 }
 0x1eb   : > { %v6784_v40 = vpop.f32.mrf.mxu0 }
 0x1ec   : > { %7584 = vst [vmem:[#allocation41_spill] sm:$0xff] %v6780_v17 }
 0x1ed   : > { %v4870_v10 = vpop.f32.mrf.mxu0 }
 0x1ee   : > { %v6787_v63 = vadd.f32 %v4870_v10, %v6608_v6  ;;  %v2707_v6 = vadd.f32 %v6642_v57, %v6640_v3  ;;  %v2439_v10 = vadd.f32 %v6653_v38, %v2180_v0  ;;  %v2184_v38 = vadd.f32 %v6472_v16, %v6468_v23 }
 0x1ef   : > { %v6791_v32 = vpop.f32.mrf.mxu0 }
 0x1f0   : > { %7585 = vst [vmem:[#allocation42_spill] sm:$0xff] %v6787_v63  ;;  %7586 = vst [vmem:[#allocation43_spill] sm:$0xff] %v6791_v32  ;;  %v6805_v63 = vpop.f32.mrf.mxu1  ;;  %v2708_v21 = vadd.f32 %v6666_v20, %v2439_v10  ;;  %v2443_v20 = vadd.f32 %v6689_v19, %v2184_v38 }
 0x1f1   : > { %v4871_v42 = vpop.f32.mrf.mxu0 }
 0x1f2   : > { %v6794_v29 = vadd.f32 %v4871_v42, %v6623_v27  ;;  %v2183_v27 = vadd.f32 %v6464_v46, %v6460_v49  ;;  %v2709_v42 = vadd.f32 %v6635_v51, %v6633_v33  ;;  %v6817_v0 = vpop.f32.mrf.mxu1  ;;  %v6822_v49 = vld [vmem:[%s7401_s2] ss:$0 sm:$0xff] }
 0x1f3   : > { %v6798_v34 = vpop.f32.mrf.mxu0 }
 0x1f4   : > { %7587 = vst [vmem:[#allocation44_spill] sm:$0xff] %v6794_v29  ;;  %7588 = vst [vmem:[#allocation45_spill] sm:$0xff] %v6798_v34  ;;  %v2710_v34 = vadd.f32 %v6655_v22, %v6650_v9  ;;  %v2442_v3 = vadd.f32 %v6668_v1, %v2183_v27  ;;  %v2713_v1 = vadd.f32 %v6687_v41, %v6659_v5 }
 0x1f5   : > { %v4938_v17 = vpop.f32.mrf.mxu0  ;;  %v2187_v27 = vadd.f32 %v6480_v47, %v6476_v4  ;;  %v2714_v41 = vadd.f32 %v6726_v18, %v6679_v24  ;;  %v2712_v5 = vadd.f32 %v6733_v39, %v2443_v20 }
 0x1f6   : > { %v2975_v57 = vadd.f32 %v4938_v17, %v2709_v42  ;;  %v2711_v17 = vadd.f32 %v6708_v36, %v2442_v3 }
 0x1f7   : > { %v2846_v32 = vpop.f32.mrf.mxu0  ;;  %v2446_v4 = vadd.f32 %v6710_v54, %v2187_v27 }
 0x1f8   : > { %v2973_v29 = vadd.f32 %v2846_v32, %v2707_v6  ;;  %v6830_v23 = vadd.f32 %v6822_v49, %v2975_v57  ;;  %v6837_v32 = vpop.f32.mrf.mxu1 }
 0x1f9   : > { %v4939_v43 = vpop.f32.mrf.mxu0 }
 0x1fa   : > { %v2976_v46 = vadd.f32 %v4939_v43, %v2710_v34  ;;  %v6825_v22 = vadd.f32 %v6822_v49, %v2973_v29  ;;  %v6862_v47 = vpop.f32.mrf.mxu1 }
 0x1fb   : > { %v2849_v33 = vpop.f32.mrf.mxu0 }
 0x1fc   : > { %v2974_v51 = vadd.f32 %v2849_v33, %v2708_v21  ;;  %v6840_v29 = vadd.f32 %v6822_v49, %v2976_v46  ;;  %v3103_v19 = vmul.f32 %v6825_v22, %v6825_v22  ;;  %v3105_v21 = vmul.f32 %v6830_v23, %v6830_v23 }
 0x1fd   : > { %v4942_v9 = vpop.f32.mrf.mxu0  ;;  %v2188_v46 = vadd.f32 %v6488_v31, %v6484_v62 }
 0x1fe   : > { %v6833_v16 = vadd.f32 %v6822_v49, %v2974_v51  ;;  %v2979_v42 = vadd.f32 %v4942_v9, %v2713_v1  ;;  %v3106_v18 = vmul.f32 %v6840_v29, %v6840_v29 }
 0x1ff   : > { %v2862_v34 = vpop.f32.mrf.mxu0  ;;  %v2447_v9 = vadd.f32 %v6728_v50, %v2188_v46  ;;  %v2715_v50 = vadd.f32 %v6747_v58, %v2446_v4 }
 0x200   : > { %v3066_v36 = vadd.f32 %v6833_v16, %v6825_v22  ;;  %v3104_v6 = vmul.f32 %v6833_v16, %v6833_v16  ;;  %v2977_v10 = vadd.f32 %v2862_v34, %v2711_v17  ;;  %v6869_v17 = vadd.f32 %v6822_v49, %v2979_v42 }
 0x201   : > { %v4943_v43 = vpop.f32.mrf.mxu0 }
 0x202   : > { %v3067_v3 = vadd.f32 %v3066_v36, %v6830_v23  ;;  %v3135_v57 = vadd.f32 %v3104_v6, %v3103_v19  ;;  %v6857_v38 = vadd.f32 %v6822_v49, %v2977_v10  ;;  %v2980_v51 = vadd.f32 %v4943_v43, %v2714_v41  ;;  %v6882_v6 = vpop.f32.mrf.mxu1 }
 0x203   : > { %v2865_v39 = vpop.f32.mrf.mxu0  ;;  %v2191_v19 = vadd.f32 %v6496_v44, %v6492_v61  ;;  %v2717_v36 = vadd.f32 %v6740_v52, %v6700_v26  ;;  %v2718_v61 = vadd.f32 %v6754_v59, %v6721_v11  ;;  %v2716_v43 = vadd.f32 %v6761_v55, %v2447_v9 }
 0x204   : > { %v3136_v24 = vadd.f32 %v3135_v57, %v3105_v21  ;;  %v3068_v33 = vadd.f32 %v3067_v3, %v6840_v29  ;;  %v2978_v20 = vadd.f32 %v2865_v39, %v2712_v5  ;;  %v3107_v31 = vmul.f32 %v6857_v38, %v6857_v38  ;;  %v6897_v46 = vpop.f32.mrf.mxu1 }
 0x205   : > { %v4946_v1 = vpop.f32.mrf.mxu0  ;;  %v6885_v41 = vadd.f32 %v6822_v49, %v2980_v51  ;;  %v2450_v44 = vadd.f32 %v6735_v28, %v2191_v19  ;;  %v3109_v21 = vmul.f32 %v6869_v17, %v6869_v17 }
 0x206   : > { %v3069_v62 = vadd.f32 %v3068_v33, %v6857_v38  ;;  %v3137_v54 = vadd.f32 %v3136_v24, %v3106_v18  ;;  %v6875_v34 = vadd.f32 %v6822_v49, %v2978_v20  ;;  %v2983_v52 = vadd.f32 %v4946_v1, %v2717_v36 }
 0x207   : > { %v2878_v10 = vpop.f32.mrf.mxu0  ;;  %v3110_v11 = vmul.f32 %v6885_v41, %v6885_v41  ;;  %v2192_v24 = vadd.f32 %v6505_v37, %v6501_v25  ;;  %v2719_v33 = vadd.f32 %v6775_v14, %v2450_v44  ;;  %v2721_v25 = vadd.f32 %v6768_v7, %v6731_v60  ;;  %v6922_v14 = vpop.f32.mrf.mxu1 }
 0x208   : > { %v3138_v27 = vadd.f32 %v3137_v54, %v3107_v31  ;;  %v3070_v5 = vadd.f32 %v3069_v62, %v6875_v34  ;;  %v3108_v42 = vmul.f32 %v6875_v34, %v6875_v34  ;;  %v2981_v26 = vadd.f32 %v2878_v10, %v2715_v50 }
 0x209   : > { %v4947_v58 = vpop.f32.mrf.mxu0  ;;  %v6909_v51 = vadd.f32 %v6822_v49, %v2983_v52  ;;  %v2195_v54 = vadd.f32 %v6520_v45, %v6516_v13  ;;  %v2451_v37 = vadd.f32 %v6742_v56, %v2192_v24  ;;  %v2196_v44 = vadd.f32 %v6535_v30, %v6531_v48  ;;  %v7590_v24 = vld [vmem:[#allocation10_spill] sm:$0xff] }
 0x20a   : > { %v3071_v3 = vadd.f32 %v3070_v5, %v6869_v17  ;;  %v3139_v57 = vadd.f32 %v3138_v27, %v3108_v42  ;;  %v6900_v4 = vadd.f32 %v6822_v49, %v2981_v26  ;;  %v2984_v18 = vadd.f32 %v4947_v58, %v2718_v61 }
 0x20b   : > { %v2881_v59 = vpop.f32.mrf.mxu0  ;;  %v2454_v13 = vadd.f32 %v6749_v15, %v2195_v54  ;;  %v3113_v45 = vmul.f32 %v6909_v51, %v6909_v51  ;;  %v2722_v52 = vadd.f32 %v6782_v35, %v6738_v8  ;;  %v2720_v26 = vadd.f32 %v6789_v53, %v2451_v37  ;;  %v6942_v15 = vpop.f32.mrf.mxu1 }
 0x20c   : > { %v3140_v28 = vadd.f32 %v3139_v57, %v3109_v21  ;;  %v3072_v39 = vadd.f32 %v3071_v3, %v6885_v41  ;;  %v2982_v55 = vadd.f32 %v2881_v59, %v2716_v43  ;;  %v3111_v1 = vmul.f32 %v6900_v4, %v6900_v4 }
 0x20d   : > { %v4950_v20 = vpop.f32.mrf.mxu0  ;;  %v6925_v19 = vadd.f32 %v6822_v49, %v2984_v18  ;;  %v2723_v57 = vadd.f32 %v6805_v63, %v2454_v13  ;;  %v2455_v18 = vadd.f32 %v6756_v12, %v2196_v44  ;;  %v7589_v63 = vld [vmem:[#allocation9_spill] sm:$0xff]  ;;  %v7594_v44 = vld [vmem:[#allocation11_spill] sm:$0xff] }
 0x20e   : > { %v3073_v9 = vadd.f32 %v3072_v39, %v6900_v4  ;;  %v3141_v62 = vadd.f32 %v3140_v28, %v3110_v11  ;;  %v6915_v31 = vadd.f32 %v6822_v49, %v2982_v55  ;;  %v2987_v42 = vadd.f32 %v4950_v20, %v2721_v25  ;;  %v2676_v28 = vpop.f32.mrf.mxu1 }
 0x20f   : > { %v2894_v36 = vpop.f32.mrf.mxu0  ;;  %v3114_v43 = vmul.f32 %v6925_v19, %v6925_v19  ;;  %v2199_v12 = vadd.f32 %v7590_v24, %v7589_v63  ;;  %v7597_v24 = vld [vmem:[#allocation14_spill] sm:$0xff] }
 0x210   : > { %v3142_v50 = vadd.f32 %v3141_v62, %v3111_v1  ;;  %v3074_v10 = vadd.f32 %v3073_v9, %v6915_v31  ;;  %v3112_v27 = vmul.f32 %v6915_v31, %v6915_v31  ;;  %v2985_v5 = vadd.f32 %v2894_v36, %v2719_v33  ;;  %v7591_v9 = vld [vmem:[#allocation33_spill] sm:$0xff]  ;;  %v7592_v36 = vld [vmem:[#allocation34_spill] sm:$0xff] }
 0x211   : > { %v4951_v7 = vpop.f32.mrf.mxu0  ;;  %v6950_v8 = vadd.f32 %v6822_v49, %v2987_v42  ;;  %v2725_v1 = vadd.f32 %v6796_v2, %v7591_v9  ;;  %v6974_v2 = vpop.f32.mrf.mxu1 }
 0x212   : > { %v3075_v56 = vadd.f32 %v3074_v10, %v6909_v51  ;;  %v3143_v60 = vadd.f32 %v3142_v50, %v3112_v27  ;;  %v6935_v61 = vadd.f32 %v6822_v49, %v2985_v5  ;;  %v2988_v59 = vadd.f32 %v4951_v7, %v2722_v52  ;;  %v7593_v27 = vld [vmem:[#allocation36_spill] sm:$0xff] }
 0x213   : > { %v2897_v58 = vpop.f32.mrf.mxu0  ;;  %v2726_v50 = vadd.f32 %v6817_v0, %v7592_v36  ;;  %v2724_v10 = vadd.f32 %v6837_v32, %v2455_v18  ;;  %v2458_v5 = vadd.f32 %v7593_v27, %v2199_v12  ;;  %v3117_v13 = vmul.f32 %v6950_v8, %v6950_v8  ;;  %v7595_v52 = vld [vmem:[#allocation12_spill] sm:$0xff]  ;;  %v7596_v18 = vld [vmem:[#allocation38_spill] sm:$0xff]  ;;  %v7598_v12 = vld [vmem:[#allocation15_spill] sm:$0xff] }
 0x214   : > { %v3144_v21 = vadd.f32 %v3143_v60, %v3113_v45  ;;  %v3076_v3 = vadd.f32 %v3075_v56, %v6925_v19  ;;  %v2986_v48 = vadd.f32 %v2897_v58, %v2720_v26  ;;  %v3115_v53 = vmul.f32 %v6935_v61, %v6935_v61 }
 0x215   : > { %v4954_v30 = vpop.f32.mrf.mxu0  ;;  %v6963_v62 = vadd.f32 %v6822_v49, %v2988_v59  ;;  %v2200_v0 = vadd.f32 %v7595_v52, %v7594_v44  ;;  %v7601_v44 = vld [vmem:[#allocation17_spill] sm:$0xff]  ;;  %v7602_v52 = vld [vmem:[#allocation18_spill] sm:$0xff] }
 0x216   : > { %v3077_v35 = vadd.f32 %v3076_v3, %v6935_v61  ;;  %v3145_v11 = vadd.f32 %v3144_v21, %v3114_v43  ;;  %v6956_v39 = vadd.f32 %v6822_v49, %v2986_v48  ;;  %v2991_v56 = vadd.f32 %v4954_v30, %v2725_v1  ;;  %v2679_v30 = vpop.f32.mrf.mxu1 }
 0x217   : > { %v2910_v55 = vpop.f32.mrf.mxu0  ;;  %v3118_v32 = vmul.f32 %v6963_v62, %v6963_v62  ;;  %v2459_v59 = vadd.f32 %v7596_v18, %v2200_v0  ;;  %v2204_v0 = vadd.f32 %v7602_v52, %v7601_v44  ;;  %v7608_v52 = vld [vmem:[#allocation23_spill] sm:$0xff] }
 0x218   : > { %v3146_v33 = vadd.f32 %v3145_v11, %v3115_v53  ;;  %v2989_v20 = vadd.f32 %v2910_v55, %v2723_v57  ;;  %v3078_v54 = vadd.f32 %v3077_v35, %v6956_v39  ;;  %v3116_v25 = vmul.f32 %v6956_v39, %v6956_v39 }
 0x219   : > { %v4955_v37 = vpop.f32.mrf.mxu0  ;;  %v2727_v57 = vadd.f32 %v6882_v6, %v2458_v5  ;;  %v6991_v35 = vadd.f32 %v6822_v49, %v2991_v56  ;;  %v7599_v6 = vld [vmem:[#allocation35_spill] sm:$0xff]  ;;  %v2463_v18 = vadd.f32 %v6784_v40, %v2204_v0  ;;  %v7609_v0 = vld [vmem:[#allocation24_spill] sm:$0xff] }
 0x21a   : > { %v3079_v45 = vadd.f32 %v3078_v54, %v6950_v8  ;;  %v3147_v7 = vadd.f32 %v3146_v33, %v3116_v25  ;;  %v6978_v60 = vadd.f32 %v6822_v49, %v2989_v20  ;;  %v2992_v21 = vadd.f32 %v4955_v37, %v2726_v50 }
 0x21b   : > { %v2913_v42 = vpop.f32.mrf.mxu0  ;;  %v2203_v33 = vadd.f32 %v7598_v12, %v7597_v24  ;;  %v2729_v20 = vadd.f32 %v6862_v47, %v7599_v6  ;;  %v2728_v50 = vadd.f32 %v6922_v14, %v2459_v59  ;;  %v3121_v47 = vmul.f32 %v6991_v35, %v6991_v35  ;;  %v7605_v6 = vld [vmem:[#allocation21_spill] sm:$0xff] }
 0x21c   : > { %v2990_v26 = vadd.f32 %v2913_v42, %v2724_v10  ;;  %v3148_v58 = vadd.f32 %v3147_v7, %v3117_v13  ;;  %v3080_v43 = vadd.f32 %v3079_v45, %v6963_v62  ;;  %v3119_v11 = vmul.f32 %v6978_v60, %v6978_v60  ;;  %v7600_v10 = vld [vmem:[#allocation40_spill] sm:$0xff]  ;;  %v4918_v13 = vpop.f32.mrf.mxu1 }
 0x21d   : > { %v4958_v3 = vpop.f32.mrf.mxu0  ;;  %v7003_v25 = vadd.f32 %v6822_v49, %v2992_v21  ;;  %v2462_v27 = vadd.f32 %v7600_v10, %v2203_v33  ;;  %v7604_v33 = vld [vmem:[#allocation20_spill] sm:$0xff]  ;;  %v2732_v10 = vadd.f32 %v2679_v30, %v2463_v18  ;;  %v7611_v18 = vld [vmem:[#allocation45_spill] sm:$0xff] }
 0x21e   : > { %v6988_v48 = vadd.f32 %v6822_v49, %v2990_v26  ;;  %v3081_v53 = vadd.f32 %v3080_v43, %v6978_v60  ;;  %v3149_v55 = vadd.f32 %v3148_v58, %v3118_v32  ;;  %v2995_v5 = vadd.f32 %v4958_v3, %v2729_v20  ;;  %v7603_v32 = vld [vmem:[#allocation37_spill] sm:$0xff] }
 0x21f   : > { %v2926_v63 = vpop.f32.mrf.mxu0  ;;  %v2730_v14 = vadd.f32 %v6897_v46, %v7603_v32  ;;  %v3122_v58 = vmul.f32 %v7003_v25, %v7003_v25  ;;  %v7610_v32 = vld [vmem:[#allocation41_spill] sm:$0xff] }
 0x220   : > { %v3120_v9 = vmul.f32 %v6988_v48, %v6988_v48  ;;  %v2993_v1 = vadd.f32 %v2926_v63, %v2727_v57  ;;  %v3150_v54 = vadd.f32 %v3149_v55, %v3119_v11  ;;  %v3082_v37 = vadd.f32 %v3081_v53, %v6988_v48  ;;  %v2692_v11 = vpop.f32.mrf.mxu1 }
 0x221   : > { %v4959_v36 = vpop.f32.mrf.mxu0  ;;  %v2731_v57 = vadd.f32 %v2676_v28, %v2462_v27  ;;  %v7023_v59 = vadd.f32 %v6822_v49, %v2995_v5  ;;  %v2207_v28 = vadd.f32 %v7605_v6, %v7604_v33  ;;  %v7607_v27 = vld [vmem:[#allocation43_spill] sm:$0xff] }
 0x222   : > { %v3083_v45 = vadd.f32 %v3082_v37, %v6991_v35  ;;  %v3151_v7 = vadd.f32 %v3150_v54, %v3120_v9  ;;  %v7012_v56 = vadd.f32 %v6822_v49, %v2993_v1  ;;  %v2996_v24 = vadd.f32 %v4959_v36, %v2730_v14  ;;  %v7606_v37 = vld [vmem:[#allocation39_spill] sm:$0xff] }
 0x223   : > { %v2929_v42 = vpop.f32.mrf.mxu0  ;;  %v2466_v5 = vadd.f32 %v7607_v27, %v2207_v28  ;;  %v3125_v36 = vmul.f32 %v7023_v59, %v7023_v59 }
 0x224   : > { %v2994_v26 = vadd.f32 %v2929_v42, %v2728_v50  ;;  %v3152_v43 = vadd.f32 %v3151_v7, %v3121_v47  ;;  %v3084_v21 = vadd.f32 %v3083_v45, %v7003_v25  ;;  %v3123_v46 = vmul.f32 %v7012_v56, %v7012_v56  ;;  %v4919_v47 = vpop.f32.mrf.mxu1 }
 0x225   : > { %v4962_v3 = vpop.f32.mrf.mxu0  ;;  %v2733_v50 = vadd.f32 %v6942_v15, %v7606_v37  ;;  %v7042_v45 = vadd.f32 %v6822_v49, %v2996_v24  ;;  %v2734_v15 = vadd.f32 %v6974_v2, %v7610_v32 }
 0x226   : > { %v7026_v53 = vadd.f32 %v6822_v49, %v2994_v26  ;;  %v3085_v55 = vadd.f32 %v3084_v21, %v7012_v56  ;;  %v3153_v63 = vadd.f32 %v3152_v43, %v3122_v58  ;;  %v2208_v26 = vadd.f32 %v7609_v0, %v7608_v52  ;;  %v2695_v24 = vpop.f32.mrf.mxu1 }
 0x227   : > { %v2942_v12 = vpop.f32.mrf.mxu0  ;;  %v2999_v58 = vadd.f32 %v4962_v3, %v2733_v50 }
 0x228   : > { %v3124_v40 = vmul.f32 %v7026_v53, %v7026_v53  ;;  %v3154_v20 = vadd.f32 %v3153_v63, %v3123_v46  ;;  %v3086_v9 = vadd.f32 %v3085_v55, %v7026_v53  ;;  %v2997_v1 = vadd.f32 %v2942_v12, %v2731_v57 }
 0x229   : > { %v4963_v54 = vpop.f32.mrf.mxu0  ;;  %v2467_v55 = vadd.f32 %v7611_v18, %v2208_v26  ;;  %v2735_v63 = vadd.f32 %v2692_v11, %v2466_v5  ;;  %v3126_v12 = vmul.f32 %v7042_v45, %v7042_v45  ;;  %v7061_v6 = vadd.f32 %v6822_v49, %v2999_v58  ;;  %v7613_v5 = vld [vmem:[#allocation44_spill] sm:$0xff] }
 0x22a   : > { %v3087_v7 = vadd.f32 %v3086_v9, %v7023_v59  ;;  %v3155_v42 = vadd.f32 %v3154_v20, %v3124_v40  ;;  %v7050_v43 = vadd.f32 %v6822_v49, %v2997_v1  ;;  %v3000_v33 = vadd.f32 %v4963_v54, %v2734_v15  ;;  %v7612_v1 = vld [vmem:[#allocation42_spill] sm:$0xff] }
 0x22b   : > { %v2945_v44 = vpop.f32.mrf.mxu0  ;;  %v2737_v37 = vadd.f32 %v4918_v13, %v7612_v1  ;;  %v2736_v50 = vadd.f32 %v2695_v24, %v2467_v55  ;;  %v3129_v58 = vmul.f32 %v7061_v6, %v7061_v6 }
 0x22c   : > { %v2998_v30 = vadd.f32 %v2945_v44, %v2732_v10  ;;  %v3156_v14 = vadd.f32 %v3155_v42, %v3125_v36  ;;  %v3088_v21 = vadd.f32 %v3087_v7, %v7042_v45  ;;  %v3127_v11 = vmul.f32 %v7050_v43, %v7050_v43 }
 0x22d   : > { %v4966_v57 = vpop.f32.mrf.mxu0  ;;  %v7068_v10 = vadd.f32 %v6822_v49, %v3000_v33  ;;  %v2738_v36 = vadd.f32 %v4919_v47, %v7613_v5 }
 0x22e   : > { %v7055_v46 = vadd.f32 %v6822_v49, %v2998_v30  ;;  %v3089_v2 = vadd.f32 %v3088_v21, %v7050_v43  ;;  %v3157_v28 = vadd.f32 %v3156_v14, %v3126_v12  ;;  %v3003_v7 = vadd.f32 %v4966_v57, %v2737_v37 }
 0x22f   : > { %v2958_v3 = vpop.f32.mrf.mxu0 }
 0x230   : > { %v3090_v40 = vadd.f32 %v3089_v2, %v7055_v46  ;;  %v3001_v20 = vadd.f32 %v2958_v3, %v2735_v63  ;;  %v3158_v44 = vadd.f32 %v3157_v28, %v3127_v11  ;;  %v3128_v52 = vmul.f32 %v7055_v46, %v7055_v46 }
 0x231   : > { %v4967_v9 = vpop.f32.mrf.mxu0  ;;  %v7083_v47 = vadd.f32 %v6822_v49, %v3003_v7  ;;  %v3130_v63 = vmul.f32 %v7068_v10, %v7068_v10  ;;  %v7615_v11 = vmov 0.0  }
 0x232   : > { %v3091_v54 = vadd.f32 %v3090_v40, %v7061_v6  ;;  %v7075_v13 = vadd.f32 %v6822_v49, %v3001_v20  ;;  %v3004_v15 = vadd.f32 %v4967_v9, %v2738_v36  ;;  %v3159_v30 = vadd.f32 %v3158_v44, %v3128_v52  ;;  %v7617_v36 = vld [vmem:[#allocation8_spill] sm:$0xff]  ;;  %v7619_v44 = vld [vmem:[#allocation13_spill] sm:$0xff] }
 0x233   : > { %v2961_v27 = vpop.f32.mrf.mxu0  ;;  %v3133_v37 = vmul.f32 %v7083_v47, %v7083_v47 }
 0x234   : > { %v3002_v42 = vadd.f32 %v2961_v27, %v2736_v50  ;;  %v3092_v0 = vadd.f32 %v3091_v54, %v7068_v10  ;;  %v7089_v21 = vadd.f32 %v6822_v49, %v3004_v15  ;;  %v3160_v18 = vadd.f32 %v3159_v30, %v3129_v58  ;;  %v7614_v50 = vld [vmem:[#allocation6_spill] sm:$0xff]  ;;  %v7616_v27 = vld [vmem:[#allocation7_spill] sm:$0xff] }
 0x235   : > { %v3131_v33 = vmul.f32 %v7075_v13, %v7075_v13  ;;  %v7622_v30 = vld [vmem:[#allocation22_spill] sm:$0xff] }
 0x236   : > { %v7079_v26 = vadd.f32 %v6822_v49, %v3002_v42  ;;  %v3093_v32 = vadd.f32 %v3092_v0, %v7075_v13  ;;  %v3161_v12 = vadd.f32 %v3160_v18, %v3130_v63  ;;  %v3134_v5 = vmul.f32 %v7089_v21, %v7089_v21  ;;  %v7618_v42 = vld [vmem:[#allocation5_spill] sm:$0xff]  ;;  %v7620_v0 = vld [vmem:[#allocation16_spill] sm:$0xff]  ;;  %v7625_v18 = vld [vmem:[#allocation27_spill] sm:$0xff] }
 0x237   : > { %v7626_v63 = vld [vmem:[#allocation28_spill] sm:$0xff] }
 0x238   : > { %v3094_v14 = vadd.f32 %v3093_v32, %v7079_v26  ;;  %v3162_v28 = vadd.f32 %v3161_v12, %v3131_v33  ;;  %v3132_v49 = vmul.f32 %v7079_v26, %v7079_v26  ;;  %v7621_v32 = vld [vmem:[#allocation19_spill] sm:$0xff] }
 0x239   : > { %v7629_v33 = vld [vmem:[#allocation31_spill] sm:$0xff] }
 0x23a   : > { %v3095_v57 = vadd.f32 %v3094_v14, %v7083_v47  ;;  %v3163_v1 = vadd.f32 %v3162_v28, %v3132_v49  ;;  %v7623_v14 = vld [vmem:[#allocation25_spill] sm:$0xff]  ;;  %v3065_v28 = vld [vmem:[%s7405_s6 + $0x18] sm:$0xff]  ;;  %v3064_v49 = vld [vmem:[%s7405_s6 + $0x10] sm:$0xff] }
 0x23c   : > { %v3096_v55 = vadd.f32 %v3095_v57, %v7089_v21  ;;  %v3164_v54 = vadd.f32 %v3163_v1, %v3133_v37  ;;  %v7624_v57 = vld [vmem:[#allocation26_spill] sm:$0xff] }
 0x23e   : > { %v3097_v24 = vrot.slane %v3096_v55, 4  ;;  %v3165_v7 = vadd.f32 %v3164_v54, %v3134_v5 }
 0x240   : > { %v3098_v2 = vadd.f32 %v3097_v24, %v3096_v55  ;;  %v3166_v52 = vrot.slane %v3165_v7, 4  ;;  %v7627_v24 = vld [vmem:[#allocation29_spill] sm:$0xff] }
 0x242   : > { %v3099_v3 = vrot.slane %v3098_v2, 2  ;;  %v3167_v15 = vadd.f32 %v3166_v52, %v3165_v7 }
 0x244   : > { %v3100_v40 = vadd.f32 %v3099_v3, %v3098_v2  ;;  %v3168_v58 = vrot.slane %v3167_v15, 2  ;;  %v7628_v2 = vld [vmem:[#allocation30_spill] sm:$0xff] }
 0x246   : > { %v3101_v20 = vrot.slane %v3100_v40, 1  ;;  %v3169_v55 = vadd.f32 %v3168_v58, %v3167_v15  ;;  %v3466_v15 = vlaneseq }
 0x248   : > { %v3102_v9 = vadd.f32 %v3101_v20, %v3100_v40  ;;  %v3170_v12 = vrot.slane %v3169_v55, 1  ;;  %v7630_v40 = vld [vmem:[#allocation32_spill] sm:$0xff]  ;;  %v3063_v20 = vld [vmem:[%s7405_s6 + $0x8] sm:$0xff] }
 0x24a   : > { %5001 = vmatmul.mubr.f32.vlgmr.msra.gmra.mxu1 %v3102_v9  ;;  %v3171_v3 = vadd.f32 %v3170_v12, %v3169_v55  ;;  %v3062_v9 = vld [vmem:[%s7405_s6] sm:$0xff] }
 0x24b   : > { %5004 = vmatpush3.msra.mxu1 %v7614_v50  ;;  %5035 = vmatprep.mubr.msk.f32.mxu1 %vm5277_vm2, %v7615_v11 }
 0x24c   : > { %5005 = vmatprep.subr.mxu1 %v7615_v11 }
 0x24d   : > { %5006 = vmatpush3.msra.mxu1 %v7616_v27 }
 0x24e   : > { %5007 = vmatprep.subr.mxu1 %v7615_v11 }
 0x24f   : > { %5008 = vmatpush3.msra.mxu1 %v7617_v36 }
 0x250   : > { %5009 = vmatprep.subr.mxu1 %v7615_v11 }
 0x251   : > { %5010 = vmatpush3.msra.mxu1 %v7618_v42 }
 0x252   : > { %5011 = vmatprep.subr.mxu1 %v7615_v11 }
 0x253   : > { %5012 = vmatpush3.msra.mxu1 %v7619_v44 }
 0x254   : > { %5013 = vmatprep.subr.mxu1 %v7615_v11 }
 0x255   : > { %5014 = vmatpush3.msra.mxu1 %v7620_v0 }
 0x256   : > { %5015 = vmatprep.subr.mxu1 %v7615_v11 }
 0x257   : > { %5016 = vmatpush3.msra.mxu1 %v7621_v32 }
 0x258   : > { %5017 = vmatprep.subr.mxu1 %v7615_v11 }
 0x259   : > { %5018 = vmatpush3.msra.mxu1 %v7622_v30  ;;  %v3467_v30 = vshrl.u32 %v3466_v15, 7 }
 0x25a   : > { %5019 = vmatprep.subr.mxu1 %v7615_v11 }
 0x25b   : > { %5020 = vmatpush3.msra.mxu1 %v7623_v14  ;;  %v3468_v14 = vsub.s32 0, %v3467_v30 }
 0x25c   : > { %5021 = vmatprep.subr.mxu1 %v7615_v11 }
 0x25d   : > { %5022 = vmatpush3.msra.mxu1 %v7624_v57 }
 0x25e   : > { %5023 = vmatprep.subr.mxu1 %v7615_v11 }
 0x25f   : > { %5024 = vmatpush3.msra.mxu1 %v7625_v18 }
 0x260   : > { %5025 = vmatprep.subr.mxu1 %v7615_v11 }
 0x261   : > { %5026 = vmatpush3.msra.mxu1 %v7626_v63 }
 0x262   : > { %5027 = vmatprep.subr.mxu1 %v7615_v11 }
 0x263   : > { %5028 = vmatpush3.msra.mxu1 %v7627_v24 }
 0x264   : > { %5029 = vmatprep.subr.mxu1 %v7615_v11 }
 0x265   : > { %5030 = vmatpush3.msra.mxu1 %v7628_v2 }
 0x266   : > { %5031 = vmatprep.subr.mxu1 %v7615_v11 }
 0x267   : > { %5032 = vmatpush3.msra.mxu1 %v7629_v33 }
 0x268   : > { %5033 = vmatprep.subr.mxu1 %v7615_v11 }
 0x269   : > { %5034 = vmatpush3.msra.mxu1 %v7630_v40 }
 0x26a   : > { %5036 = vmatmul.mubr.f32.vlgmr.msra.gmra.mxu1 %v3171_v3  ;;  %5038 = vmatprep.subr.mxu1 %v7615_v11 }
 0x26b   : > { %5039 = vmatpush3.msra.mxu1 %v3065_v28  ;;  %5046 = vmatprep.mubr.msk.f32.mxu1 %vm5277_vm2, %v7615_v11 }
 0x26c   : > { %5040 = vmatprep.subr.mxu1 %v7615_v11 }
 0x26d   : > { %5041 = vmatpush3.msra.mxu1 %v3064_v49 }
 0x26e   : > { %5042 = vmatprep.subr.mxu1 %v7615_v11 }
 0x26f   : > { %5043 = vmatpush3.msra.mxu1 %v3063_v20 }
 0x270   : > { %5044 = vmatprep.subr.mxu1 %v7615_v11 }
 0x271   : > { %5045 = vmatpush3.msra.mxu1 %v3062_v9 }
 0x272   : > { %5049 = vmatprep.subr.mxu1 %v7615_v11 }
 0x30a   : > { %v3238_v1 = vpop.f32.mrf.mxu1 }
 0x30b   : > { %v3242_v37 = vmul.f32 0.0009765625, %v3238_v1 }
 0x30c   : > { %v5002_v50 = vpop.f32.mrf.mxu1 }
 0x30d   : > { %5047 = vmatmul.mubr.msk.f32.vlgmr.msra.gmra.mxu1 %vm3319_vm3, %v3242_v37  ;;  %v3314_v27 = vmul.f32 %v3242_v37, %v3242_v37 }
 0x30e   : > { %5050 = vmatpush3.msra.mxu1 %v3065_v28  ;;  %5057 = vmatprep.mubr.msk.f32.mxu1 %vm5277_vm2, %v7615_v11 }
 0x30f   : > { %5051 = vmatprep.subr.mxu1 %v7615_v11 }
 0x310   : > { %5052 = vmatpush3.msra.mxu1 %v3064_v49 }
 0x311   : > { %5053 = vmatprep.subr.mxu1 %v7615_v11 }
 0x312   : > { %5054 = vmatpush3.msra.mxu1 %v3063_v20 }
 0x313   : > { %5055 = vmatprep.subr.mxu1 %v7615_v11 }
 0x314   : > { %5056 = vmatpush3.msra.mxu1 %v3062_v9 }
 0x32a   : > { %v3309_v54 = vpop.f32.mrf.mxu1 }
 0x32b   : > { %v3313_v5 = vmul.f32 0.0009765625, %v3309_v54 }
 0x32c   : > { %v5037_v36 = vpop.f32.mrf.mxu1 }
 0x32d   : > { %v3315_v7 = vsub.f32 %v3313_v5, %v3314_v27 }
 0x32f   : > { %v3316_v42 = vmax.f32 %v3315_v7, 0.0 }
 0x331   : > { %v3317_v44 = vadd.f32 1e-05, %v3316_v42  ;;  %v4109_v42 = vld [vmem:[%s7402_s3] ss:$0 sm:$0xff] }
 0x333   : > { %5212 = vrsqrt.f32 %v3317_v44 }
 0x340   : > { %v5213_v52 = vpop.eup %5212 }
 0x341   : > { %5058 = vmatmul.mubr.msk.f32.vlgmr.msra.gmra.mxu1 %vm3319_vm3, %v5213_v52 }
 0x3cd   : > { %v3389_v0 = vpop.f32.mrf.mxu1 }
 0x3ce   : > { %v7162_v58 = vrot.slane %v3389_v0, %v3468_v14 }
 0x3cf   : > { %v5048_v32 = vpop.f32.mrf.mxu1 }
 0x3d0   : > { %v3470_v11 = vsub.f32 %v6825_v22, %v7162_v58  ;;  %v3471_v57 = vsub.f32 %v6833_v16, %v7162_v58  ;;  %v3472_v18 = vsub.f32 %v6830_v23, %v7162_v58  ;;  %v3473_v55 = vsub.f32 %v6840_v29, %v7162_v58 }
 0x3d1   : > { %v3474_v63 = vsub.f32 %v6857_v38, %v7162_v58  ;;  %v3475_v24 = vsub.f32 %v6875_v34, %v7162_v58  ;;  %v3476_v12 = vsub.f32 %v6869_v17, %v7162_v58  ;;  %v3477_v22 = vsub.f32 %v6885_v41, %v7162_v58 }
 0x3d2   : > { %v3478_v16 = vsub.f32 %v6900_v4, %v7162_v58  ;;  %v3479_v23 = vsub.f32 %v6915_v31, %v7162_v58  ;;  %v3480_v29 = vsub.f32 %v6909_v51, %v7162_v58  ;;  %v3481_v38 = vsub.f32 %v6925_v19, %v7162_v58 }
 0x3d3   : > { %v3482_v34 = vsub.f32 %v6935_v61, %v7162_v58  ;;  %v3483_v17 = vsub.f32 %v6956_v39, %v7162_v58  ;;  %v3484_v41 = vsub.f32 %v6950_v8, %v7162_v58  ;;  %v3485_v4 = vsub.f32 %v6963_v62, %v7162_v58 }
 0x3d4   : > { %v3486_v31 = vsub.f32 %v6978_v60, %v7162_v58  ;;  %v3487_v51 = vsub.f32 %v6988_v48, %v7162_v58  ;;  %v3488_v19 = vsub.f32 %v6991_v35, %v7162_v58  ;;  %v3489_v61 = vsub.f32 %v7003_v25, %v7162_v58 }
 0x3d5   : > { %v3490_v39 = vsub.f32 %v7012_v56, %v7162_v58  ;;  %v3491_v8 = vsub.f32 %v7026_v53, %v7162_v58  ;;  %v3492_v62 = vsub.f32 %v7023_v59, %v7162_v58  ;;  %v3493_v60 = vsub.f32 %v7042_v45, %v7162_v58 }
 0x3d6   : > { %v3494_v48 = vsub.f32 %v7050_v43, %v7162_v58  ;;  %v3495_v35 = vsub.f32 %v7055_v46, %v7162_v58  ;;  %v3496_v25 = vsub.f32 %v7061_v6, %v7162_v58  ;;  %v3497_v56 = vsub.f32 %v7068_v10, %v7162_v58 }
 0x3d7   : > { %v3498_v59 = vsub.f32 %v7075_v13, %v7162_v58  ;;  %v3499_v45 = vsub.f32 %v7079_v26, %v7162_v58  ;;  %v3500_v43 = vsub.f32 %v7083_v47, %v7162_v58  ;;  %v3501_v33 = vsub.f32 %v7089_v21, %v7162_v58 }
 0x401   : > { %v3462_v2 = vpop.f32.mrf.mxu1 }
 0x402   : > { %v3505_v53 = vrot.slane %v3462_v2, %v3468_v14 }
 0x403   : > { %v5059_v46 = vpop.f32.mrf.mxu1 }
 0x404   : > { %v3506_v3 = vmul.f32 %v3505_v53, %v3470_v11  ;;  %v3507_v28 = vmul.f32 %v3505_v53, %v3471_v57  ;;  %v3508_v6 = vmul.f32 %v3505_v53, %v3472_v18  ;;  %v3509_v40 = vmul.f32 %v3505_v53, %v3473_v55 }
 0x405   : > { %v3510_v49 = vmul.f32 %v3505_v53, %v3474_v63  ;;  %v3511_v10 = vmul.f32 %v3505_v53, %v3475_v24  ;;  %v3512_v20 = vmul.f32 %v3505_v53, %v3476_v12  ;;  %v3513_v9 = vmul.f32 %v3505_v53, %v3477_v22 }
 0x406   : > { %v3514_v1 = vmul.f32 %v3505_v53, %v3478_v16  ;;  %v3515_v13 = vmul.f32 %v3505_v53, %v3479_v23  ;;  %v3516_v37 = vmul.f32 %v3505_v53, %v3480_v29  ;;  %v3517_v50 = vmul.f32 %v3505_v53, %v3481_v38 }
 0x407   : > { %v3518_v26 = vmul.f32 %v3505_v53, %v3482_v34  ;;  %v3519_v54 = vmul.f32 %v3505_v53, %v3483_v17  ;;  %v3520_v27 = vmul.f32 %v3505_v53, %v3484_v41  ;;  %v3521_v47 = vmul.f32 %v3505_v53, %v3485_v4 }
 0x408   : > { %v3522_v5 = vmul.f32 %v3505_v53, %v3486_v31  ;;  %v3523_v36 = vmul.f32 %v3505_v53, %v3487_v51  ;;  %v3524_v21 = vmul.f32 %v3505_v53, %v3488_v19  ;;  %v3525_v7 = vmul.f32 %v3505_v53, %v3489_v61 }
 0x409   : > { %v3526_v44 = vmul.f32 %v3505_v53, %v3490_v39  ;;  %v3527_v52 = vmul.f32 %v3505_v53, %v3491_v8  ;;  %v3528_v0 = vmul.f32 %v3505_v53, %v3492_v62  ;;  %v3529_v32 = vmul.f32 %v3505_v53, %v3493_v60 }
 0x40a   : > { %v3530_v15 = vmul.f32 %v3505_v53, %v3494_v48  ;;  %v3531_v30 = vmul.f32 %v3505_v53, %v3495_v35  ;;  %v3532_v14 = vmul.f32 %v3505_v53, %v3496_v25  ;;  %v3533_v58 = vmul.f32 %v3505_v53, %v3497_v56  ;;  %v4110_v48 = vld [vmem:[%s7403_s4] ss:$0 sm:$0xff] }
 0x40b   : > { %v3534_v11 = vmul.f32 %v3505_v53, %v3498_v59  ;;  %v3535_v57 = vmul.f32 %v3505_v53, %v3499_v45  ;;  %v3536_v18 = vmul.f32 %v3505_v53, %v3500_v43  ;;  %v3537_v55 = vmul.f32 %v3505_v53, %v3501_v33 }
 0x40c   : > { %v3544_v63 = vmul.f32 %v4109_v42, %v3506_v3  ;;  %v3545_v24 = vmul.f32 %v4109_v42, %v3507_v28  ;;  %v3546_v12 = vmul.f32 %v4109_v42, %v3508_v6  ;;  %v3547_v22 = vmul.f32 %v4109_v42, %v3509_v40 }
 0x40d   : > { %v3548_v16 = vmul.f32 %v4109_v42, %v3510_v49  ;;  %v3549_v23 = vmul.f32 %v4109_v42, %v3511_v10  ;;  %v3550_v29 = vmul.f32 %v4109_v42, %v3512_v20  ;;  %v3551_v38 = vmul.f32 %v4109_v42, %v3513_v9 }
 0x40e   : > { %v3552_v34 = vmul.f32 %v4109_v42, %v3514_v1  ;;  %v3553_v17 = vmul.f32 %v4109_v42, %v3515_v13  ;;  %v3554_v41 = vmul.f32 %v4109_v42, %v3516_v37  ;;  %v3555_v4 = vmul.f32 %v4109_v42, %v3517_v50 }
 0x40f   : > { %v3556_v31 = vmul.f32 %v4109_v42, %v3518_v26  ;;  %v3557_v51 = vmul.f32 %v4109_v42, %v3519_v54  ;;  %v3558_v19 = vmul.f32 %v4109_v42, %v3520_v27  ;;  %v3559_v61 = vmul.f32 %v4109_v42, %v3521_v47 }
 0x410   : > { %v3560_v39 = vmul.f32 %v4109_v42, %v3522_v5  ;;  %v3561_v8 = vmul.f32 %v4109_v42, %v3523_v36  ;;  %v3562_v62 = vmul.f32 %v4109_v42, %v3524_v21  ;;  %v3563_v60 = vmul.f32 %v4109_v42, %v3525_v7 }
 0x411   : > { %v3564_v2 = vmul.f32 %v4109_v42, %v3526_v44  ;;  %v3565_v35 = vmul.f32 %v4109_v42, %v3527_v52  ;;  %v3566_v25 = vmul.f32 %v4109_v42, %v3528_v0  ;;  %v3567_v56 = vmul.f32 %v4109_v42, %v3529_v32 }
 0x412   : > { %v3568_v53 = vmul.f32 %v4109_v42, %v3530_v15  ;;  %v3569_v59 = vmul.f32 %v4109_v42, %v3531_v30  ;;  %v3570_v45 = vmul.f32 %v4109_v42, %v3532_v14  ;;  %v3571_v43 = vmul.f32 %v4109_v42, %v3533_v58 }
 0x413   : > { %v3572_v33 = vmul.f32 %v4109_v42, %v3534_v11  ;;  %v3573_v46 = vmul.f32 %v4109_v42, %v3535_v57  ;;  %v3574_v3 = vmul.f32 %v4109_v42, %v3536_v18  ;;  %v3575_v28 = vmul.f32 %v4109_v42, %v3537_v55 }
 0x414   : > { %v7234_v6 = vadd.f32 %v4110_v48, %v3544_v63  ;;  %v7236_v40 = vadd.f32 %v4110_v48, %v3545_v24  ;;  %v7238_v49 = vadd.f32 %v4110_v48, %v3546_v12  ;;  %v7240_v10 = vadd.f32 %v4110_v48, %v3547_v22 }
 0x415   : > { %v7242_v20 = vadd.f32 %v4110_v48, %v3548_v16  ;;  %v7244_v9 = vadd.f32 %v4110_v48, %v3549_v23  ;;  %v7246_v1 = vadd.f32 %v4110_v48, %v3550_v29  ;;  %v7248_v13 = vadd.f32 %v4110_v48, %v3551_v38 }
 0x416   : > { %v7250_v37 = vadd.f32 %v4110_v48, %v3552_v34  ;;  %v7252_v50 = vadd.f32 %v4110_v48, %v3553_v17  ;;  %v7254_v26 = vadd.f32 %v4110_v48, %v3554_v41  ;;  %v7256_v54 = vadd.f32 %v4110_v48, %v3555_v4 }
 0x417   : > { %v7258_v27 = vadd.f32 %v4110_v48, %v3556_v31  ;;  %v7260_v47 = vadd.f32 %v4110_v48, %v3557_v51  ;;  %v7262_v5 = vadd.f32 %v4110_v48, %v3558_v19  ;;  %v3597_v36 = vadd.f32 %v4110_v48, %v3559_v61 }
 0x418   : > { %v7264_v21 = vadd.f32 %v4110_v48, %v3560_v39  ;;  %v7266_v7 = vadd.f32 %v4110_v48, %v3561_v8  ;;  %v7268_v42 = vadd.f32 %v4110_v48, %v3562_v62  ;;  %v7270_v44 = vadd.f32 %v4110_v48, %v3563_v60 }
 0x419   : > { %v7272_v52 = vadd.f32 %v4110_v48, %v3564_v2  ;;  %v7274_v0 = vadd.f32 %v4110_v48, %v3565_v35  ;;  %v7276_v32 = vadd.f32 %v4110_v48, %v3566_v25  ;;  %v3605_v15 = vadd.f32 %v4110_v48, %v3567_v56 }
 0x41a   : > { %v7279_v30 = vadd.f32 %v4110_v48, %v3568_v53  ;;  %v7281_v14 = vadd.f32 %v4110_v48, %v3569_v59  ;;  %v7283_v58 = vadd.f32 %v4110_v48, %v3570_v45  ;;  %v7285_v11 = vadd.f32 %v4110_v48, %v3571_v43 }
 0x41b   : > { %v7287_v57 = vadd.f32 %v4110_v48, %v3572_v33  ;;  %v7289_v18 = vadd.f32 %v4110_v48, %v3573_v46  ;;  %v7291_v55 = vadd.f32 %v4110_v48, %v3574_v3  ;;  %v7293_v63 = vadd.f32 %v4110_v48, %v3575_v28 }
 0x41c   : > { %v3614_v24 = vmax.f32 %v7234_v6, 0.0  ;;  %v3615_v12 = vmax.f32 %v7236_v40, 0.0  ;;  %v3616_v22 = vmax.f32 %v7238_v49, 0.0  ;;  %v3617_v16 = vmax.f32 %v7240_v10, 0.0 }
 0x41d   : > { %v3618_v23 = vmax.f32 %v7242_v20, 0.0  ;;  %v3619_v29 = vmax.f32 %v7244_v9, 0.0  ;;  %v3620_v38 = vmax.f32 %v7246_v1, 0.0  ;;  %v3621_v34 = vmax.f32 %v7248_v13, 0.0 }
 0x41e   : > { %v3622_v17 = vmax.f32 %v7250_v37, 0.0  ;;  %v3623_v41 = vmax.f32 %v7252_v50, 0.0  ;;  %v3624_v4 = vmax.f32 %v7254_v26, 0.0  ;;  %v3625_v31 = vmax.f32 %v7256_v54, 0.0 }
 0x41f   : > { %v3626_v51 = vmax.f32 %v7258_v27, 0.0  ;;  %v3627_v19 = vmax.f32 %v7260_v47, 0.0  ;;  %v3628_v61 = vmax.f32 %v7262_v5, 0.0  ;;  %v3629_v39 = vmax.f32 %v3597_v36, 0.0 }
 0x420   : > { %v3630_v8 = vmax.f32 %v7264_v21, 0.0  ;;  %v3631_v62 = vmax.f32 %v7266_v7, 0.0  ;;  %v3632_v60 = vmax.f32 %v7268_v42, 0.0  ;;  %v3633_v48 = vmax.f32 %v7270_v44, 0.0 }
 0x421   : > { %v3634_v2 = vmax.f32 %v7272_v52, 0.0  ;;  %v3635_v35 = vmax.f32 %v7274_v0, 0.0  ;;  %v3636_v25 = vmax.f32 %v7276_v32, 0.0  ;;  %v3637_v56 = vmax.f32 %v3605_v15, 0.0 }
 0x422   : > { %v3638_v53 = vmax.f32 %v7279_v30, 0.0  ;;  %v3639_v59 = vmax.f32 %v7281_v14, 0.0  ;;  %v3640_v45 = vmax.f32 %v7283_v58, 0.0  ;;  %v3641_v43 = vmax.f32 %v7285_v11, 0.0 }
 0x423   : > { %v3642_v33 = vmax.f32 %v7287_v57, 0.0  ;;  %v3643_v46 = vmax.f32 %v7289_v18, 0.0  ;;  %v3644_v3 = vmax.f32 %v7291_v55, 0.0  ;;  %v3645_v28 = vmax.f32 %v7293_v63, 0.0 }
 0x424   : > { %v4184_v6 = vpack.c.bf16 %v3615_v12, %v3614_v24  ;;  %v4189_v40 = vpack.c.bf16 %v3617_v16, %v3616_v22  ;;  %v4194_v49 = vpack.c.bf16 %v3619_v29, %v3618_v23  ;;  %v4199_v10 = vpack.c.bf16 %v3621_v34, %v3620_v38 }
 0x425   : > { %v4204_v20 = vpack.c.bf16 %v3623_v41, %v3622_v17  ;;  %v4209_v9 = vpack.c.bf16 %v3625_v31, %v3624_v4  ;;  %v4214_v1 = vpack.c.bf16 %v3627_v19, %v3626_v51  ;;  %v4219_v13 = vpack.c.bf16 %v3629_v39, %v3628_v61 }
 0x426   : > { %4185 = vst [vmem:[%s7331_s22] sm:$0xff] %v4184_v6   ;;  %4261 = vst [vmem:[%s7331_s22 + $0x8] sm:$0xff] %v4189_v40   ;;  %v4224_v37 = vpack.c.bf16 %v3631_v62, %v3630_v8  ;;  %v4229_v50 = vpack.c.bf16 %v3633_v48, %v3632_v60  ;;  %v4234_v26 = vpack.c.bf16 %v3635_v35, %v3634_v2 }
 0x427   : > { %4262 = vst [vmem:[%s7331_s22 + $0x10] sm:$0xff] %v4194_v49   ;;  %4263 = vst [vmem:[%s7331_s22 + $0x18] sm:$0xff] %v4199_v10   ;;  %v4239_v54 = vpack.c.bf16 %v3637_v56, %v3636_v25  ;;  %v4244_v27 = vpack.c.bf16 %v3639_v59, %v3638_v53  ;;  %v4249_v47 = vpack.c.bf16 %v3641_v43, %v3640_v45 }
 0x428   : > { %4264 = vst [vmem:[%s7331_s22 + $0x20] sm:$0xff] %v4204_v20   ;;  %4265 = vst [vmem:[%s7331_s22 + $0x28] sm:$0xff] %v4209_v9   ;;  %v4254_v5 = vpack.c.bf16 %v3643_v46, %v3642_v33  ;;  %v4259_v36 = vpack.c.bf16 %v3645_v28, %v3644_v3 }
 0x429   : > { %4266 = vst [vmem:[%s7331_s22 + $0x30] sm:$0xff] %v4214_v1   ;;  %4267 = vst [vmem:[%s7331_s22 + $0x38] sm:$0xff] %v4219_v13  }
 0x42a   : > { %4268 = vst [vmem:[%s7331_s22 + $0x40] sm:$0xff] %v4224_v37   ;;  %4269 = vst [vmem:[%s7331_s22 + $0x48] sm:$0xff] %v4229_v50  }
 0x42b   : > { %4270 = vst [vmem:[%s7331_s22 + $0x50] sm:$0xff] %v4234_v26   ;;  %4271 = vst [vmem:[%s7331_s22 + $0x58] sm:$0xff] %v4239_v54  }
 0x42c   : > { %4272 = vst [vmem:[%s7331_s22 + $0x60] sm:$0xff] %v4244_v27   ;;  %4273 = vst [vmem:[%s7331_s22 + $0x68] sm:$0xff] %v4249_v47  }
 0x42d   : > { %4274 = vst [vmem:[%s7331_s22 + $0x70] sm:$0xff] %v4254_v5   ;;  %4275 = vst [vmem:[%s7331_s22 + $0x78] sm:$0xff] %v4259_v36  }
 0x42e   : > { %5227 = shalt.err (!%p5224_p3)
}
 0x42f   : > { %s5228_s17 = scalar_lea.hbm %s7341_s8, 2048  ;;  %s5232_s20 = scalar_lea.hbm %s7406_s7, 4096 }
 0x430   : > { %p5229_p4 = scmp.ne.s32.totalorder %s7341_s8, %s5228_s17  ;;  %p5233_p9 = scmp.lt.s32.totalorder %s7341_s8, %s7406_s7 }
 0x431   : > { %p5234_p10 = scmp.lt.s32.totalorder %s5232_s20, %s5228_s17 }
 0x432   : > { %p5230_p7 = pnand %p5229_p4, %p5359_p5 }
 0x433   : > { %p5235_p11 = por %p5234_p10, %p5233_p9 }
 0x434   : > { %p5231_p8 = pneg %p5230_p7 }
 0x436   : > { %p5236_p12 = pnand %p5235_p11, %p5231_p8 }
 0x438   : > { %5239 = shalt.err (!%p5236_p12)
}
 0x439   : > { %s5279_s28 = smov 64   ;;  %s5280_s9 = smov 4  }
 0x43a   : > { %5061 = dma.vmem_to_hbm [thread:$0]  (%p5359_p5), %s7343_s29, 2048, %s7341_s8, %s7359_s13, %s5279_s28, %s5279_s28, %s5280_s9  }
 0x43b PF: > { %p5067_p13 = scmp.ge.s32.totalorder %s5274_s27, 2  ;;  %s3835_s14 = sand.u32 1, %s5262_s24  }
 0x43c   : > { %s3836_s15 = scalar_lea.sflag [#allocation3], %s3835_s14 }
 0x43d   : > { %p5064_p0 = pnand %p5067_p13, %p5363_p6 }
 0x43f   : > { %p5065_p1 = pneg %p5064_p0 }
 0x441   : > { %5257 = dma.done.wait (%p5065_p1), %s3836_s15, 2048  }
 0x442   : > { %5259 = vsyncadd (%p5065_p1), %s3836_s15, 4294965248  ;;  %p17_p2 = scmp.ge.s32.totalorder %s5346_s30, 4   ;;  %s7631_s24 = smov %s5266_s25 }
 0x443   : > { %s7632_s25 = smov %s5270_s26  ;;  %s7633_s26 = smov %s5357_s10 }
 0x444   : > { %s7634_s27 = smov %s5346_s30  ;;  %19 = sbr.rel (!%p17_p2) target bundleno = 3 (0x3), region = 91 }
 0x449   :  { %3841 = vsyncpa [#allocation3], 1 }
 0x44a   :  { %3843 = vsyncpa [#allocation3 + $0x1], 1 }

</bundles_post_ra>
